<compile_context>
chip_gen: v7x
topology: tpu7x:2x2x1
jax: 0.10.0
libtpu: 0.0.40
codegen_flags: <defaults>
</compile_context>

<pallas_src>
import math

import jax
import jax.numpy as jnp
from jax.experimental import pallas as pl
from jax.experimental.pallas import tpu as pltpu

# Model configuration (groups of 5: kernel, stride, channels, pool_type, pool_size)
# Block 1: conv 3x3 s1 (4->8)  + ELU + BN + MaxPool(2, stride 1) + Dropout
# Block 2: conv 3x3 s1 (8->16) + ELU + BN + AvgPool(2, stride 1)
# Head   : Dropout + Linear(16*14*14 -> 128) + ELU + Linear(128 -> n_class)
CONV_LAYERS = [3, 1, 8, 0, 2, 3, 1, 16, 1, 2]
INPUT_SIZE = 16
PREV_CHANNELS = 4
N_CLASS = 10
HIDDEN = 128
BN_EPS = 1e-5


# ----------------------------------------------------------------------------
# Static plan: spatial sizes + flat-canvas lengths (pure Python, trace-time)
# ----------------------------------------------------------------------------
def build_plan():
    specs = [CONV_LAYERS[i:i + 5] for i in range(0, len(CONV_LAYERS) - 1, 5)]
    blocks = []
    d = INPUT_SIZE
    cin = PREV_CHANNELS
    for (k, s, cout, pooling, psize) in specs:
        k, s, cout, pooling, psize = int(k), int(s), int(cout), int(pooling), int(psize)
        if s != 1:
            # TODO(synk): stride>1 conv not supported by the fused canvas layout.
            raise NotImplementedError("fused canvas kernel assumes stride == 1")
        p = int(math.ceil(((d - 1) * s - d + k) / 2))
        d_conv = (d - k + 2 * p) // s + 1
        d_pool = d_conv - psize + 1 if pooling in (0, 1) else d_conv
        blocks.append(dict(k=k, p=p, cin=cin, cout=cout, pooling=pooling,
                           psize=psize, d_in=d, d_conv=d_conv, d_pool=d_pool))
        d, cin = d_pool, cout

    WR = max(b["d_in"] + 2 * b["p"] for b in blocks)   # canvas row stride
    ROW = WR + 1
    for i, b in enumerate(blocks):
        if i == 0:
            b["L_in"] = (b["d_in"] + 2 * b["p"]) * WR
        else:
            prev = blocks[i - 1]
            b["off"] = b["p"] * ROW
            b["L_in"] = max((b["d_in"] + 2 * b["p"] - 1) * ROW + 1,
                            b["off"] + prev["L_pool"])
        b["L_conv"] = b["L_in"] - (b["k"] - 1) * ROW
        assert b["L_conv"] >= (b["d_conv"] - 1) * ROW + 1
        if b["pooling"] in (0, 1):
            b["L_pool"] = b["L_conv"] - (b["psize"] - 1) * ROW
        else:
            b["L_pool"] = b["L_conv"]
        assert b["L_pool"] >= (b["d_pool"] - 1) * ROW + 1

    F = blocks[-1]["cout"] * blocks[-1]["d_pool"] ** 2
    return dict(blocks=blocks, WR=WR, F=F, c_last=blocks[-1]["cout"])


# ----------------------------------------------------------------------------
# Fused Pallas kernel (one grid step == one image, end to end)
# ----------------------------------------------------------------------------
def _make_fused_kernel(plan):
    blocks = plan["blocks"]
    WR = plan["WR"]
    nblk = len(blocks)
    c_last = plan["c_last"]

    def kernel(*refs):
        pos = 0
        x_ref = refs[pos]; pos += 1
        wt_refs, cp_refs = [], []
        for _ in range(nblk):
            wt_refs.append(refs[pos]); cp_refs.append(refs[pos + 1]); pos += 2
        mask_refs = [refs[pos + i] for i in range(nblk - 1)]; pos += nblk - 1
        w1c_ref, bfc1_ref, wfc2_ref, bfc2_ref, o_ref = refs[pos:pos + 5]; pos += 5
        canvas_refs = list(refs[pos:])          # scratch: next-block input canvases

        final = None
        cur_val = x_ref[0]                      # (Cin0, L_in0) zero-padded input canvas
        for i, b in enumerate(blocks):
            k, cout, Lc = b["k"], b["cout"], b["L_conv"]
            # ---- conv: k*k shifted-slice matmuls accumulated in registers ----
            y = jnp.zeros((cout, Lc), jnp.float32)
            for kh in range(k):
                for kw in range(k):
                    s = kh * WR + kw
                    if i == 0:
                        piece = cur_val[:, s:s + Lc]
                    else:
                        piece = canvas_refs[i - 1][:, s:s + Lc]
                    y = y + jnp.dot(wt_refs[i][kh * k + kw], piece,
                                    preferred_element_type=jnp.float32)
            y = y + cp_refs[i][0]                         # conv bias
            y = jnp.where(y > 0.0, y, jnp.exp(y) - 1.0)   # ELU(alpha=1)
            y = y * cp_refs[i][1] + cp_refs[i][2]         # folded eval-mode BatchNorm
            # ---- pooling (stride 1), fused as shifted max / add ----
            if b["pooling"] in (0, 1):
                ps, Lp = b["psize"], b["L_pool"]
                acc = None
                for ph in range(ps):
                    for pw in range(ps):
                        win = y[:, ph * WR + pw: ph * WR + pw + Lp]
                        if acc is None:
                            acc = win
                        elif b["pooling"] == 0:
                            acc = jnp.maximum(acc, win)
                        else:
                            acc = acc + win
                y = acc if b["pooling"] == 0 else acc * (1.0 / float(ps * ps))
            # Dropout(0.2) after MaxPool: identity in eval mode.
            # ---- re-embed into the next conv's zero-padded input canvas ----
            if i + 1 < nblk:
                off = blocks[i + 1]["off"]
                cref = canvas_refs[i]
                cref[...] = jnp.zeros(cref.shape, jnp.float32)
                cref[:, off:off + b["L_pool"]] = y * mask_refs[i][...]
            else:
                final = y                                 # (C_last, L_pool_last)

        # ---- head: Linear -> ELU -> Linear (Dropout identity in eval) ----
        h = bfc1_ref[...]                                 # (1, HIDDEN)
        for c in range(c_last):
            h = h + jnp.dot(final[c:c + 1, :], w1c_ref[c],
                            preferred_element_type=jnp.float32)
        h = jnp.where(h > 0.0, h, jnp.exp(h) - 1.0)
        o_ref[0] = (jnp.dot(h, wfc2_ref[...],
                            preferred_element_type=jnp.float32) + bfc2_ref[...])

    return kernel


# ----------------------------------------------------------------------------
# Host wrapper
# ----------------------------------------------------------------------------
@jax.jit
def forward(params, x_nchw):
    plan = build_plan()
    blocks = plan["blocks"]
    WR = plan["WR"]
    B = x_nchw.shape[0]
    N = params["w2"].shape[1]
    HID = params["w1"].shape[1]

    # Input image -> zero-padded flat canvas (B, Cin, Hp*WR)
    b0 = blocks[0]
    Hp = b0["d_in"] + 2 * b0["p"]
    x = x_nchw.astype(jnp.float32)
    xp = jnp.pad(x, ((0, 0), (0, 0),
                     (b0["p"], b0["p"]),
                     (b0["p"], b0["p"] + WR - Hp)))
    x0 = xp.reshape(B, b0["cin"], Hp * WR)

    inputs = [x0]
    in_specs = [pl.BlockSpec((1, b0["cin"], Hp * WR), lambda b: (b, 0, 0))]

    # Per-block conv weights (tap-major) + packed per-channel bias/scale/shift
    for meta, blk in zip(blocks, params["blocks"]):
        k, cout, cin = meta["k"], meta["cout"], meta["cin"]
        w_taps = jnp.transpose(blk["w"], (0, 1, 3, 2)).reshape(k * k, cout, cin)
        scale = blk["gamma"] / jnp.sqrt(blk["rvar"] + BN_EPS)
        shift = blk["beta"] - blk["rmean"] * scale
        cp = jnp.stack([blk["b"], scale, shift], axis=0)[:, :, None]   # (3, cout, 1)
        inputs += [w_taps, cp]
        in_specs += [pl.BlockSpec((k * k, cout, cin), lambda b: (0, 0, 0)),
                     pl.BlockSpec((3, cout, 1), lambda b: (0, 0, 0))]

    # Valid-region masks used when re-embedding pooled output with zero padding
    for meta in blocks[:-1]:
        L, d = meta["L_pool"], meta["d_pool"]
        q = jnp.arange(L)
        mask = (((q % WR) < d) & ((q // WR) < d)).astype(jnp.float32)[None, :]
        inputs.append(mask)
        in_specs.append(pl.BlockSpec((1, L), lambda b: (0, 0)))

    # FC1 weight scattered into canvas layout (C_last, L_pool_last, HIDDEN);
    # garbage canvas positions hit zero weight rows -> no in-kernel compaction.
    last = blocks[-1]
    C, L, d = last["cout"], last["L_pool"], last["d_pool"]
    idx = (jnp.arange(C)[:, None, None] * L
           + jnp.arange(d)[None, :, None] * WR
           + jnp.arange(d)[None, None, :]).reshape(-1)
    w1c = jnp.zeros((C * L, HID), jnp.float32).at[idx].set(params["w1"])
    w1c = w1c.reshape(C, L, HID)
    inputs += [w1c, params["b1"][None, :], params["w2"], params["b2"][None, :]]
    in_specs += [pl.BlockSpec((C, L, HID), lambda b: (0, 0, 0)),
                 pl.BlockSpec((1, HID), lambda b: (0, 0)),
                 pl.BlockSpec((HID, N), lambda b: (0, 0)),
                 pl.BlockSpec((1, N), lambda b: (0, 0))]

    scratch = [pltpu.VMEM((blocks[i]["cout"], blocks[i + 1]["L_in"]), jnp.float32)
               for i in range(len(blocks) - 1)]

    out = pl.pallas_call(
        _make_fused_kernel(plan),
        out_shape=jax.ShapeDtypeStruct((B, 1, N), jnp.float32),
        grid=(B,),
        in_specs=in_specs,
        out_specs=pl.BlockSpec((1, 1, N), lambda b: (b, 0, 0)),
        scratch_shapes=scratch,
        compiler_params=pltpu.CompilerParams(
            dimension_semantics=("parallel",)),
    )(*inputs)
    return out.reshape(B, N)


# ----------------------------------------------------------------------------
# Deterministic synthetic parameters (same shapes as conv_net.__init__)
# ----------------------------------------------------------------------------
def init_params(key):
    plan = build_plan()
    params = {"blocks": []}
    for b in plan["blocks"]:
        k, cin, cout = b["k"], b["cin"], b["cout"]
        key, k1, k2, k3, k4, k5, k6 = jax.random.split(key, 7)
        params["blocks"].append(dict(
            w=jax.random.normal(k1, (k, k, cin, cout), jnp.float32) / math.sqrt(k * k * cin),
            b=0.1 * jax.random.normal(k2, (cout,), jnp.float32),
            gamma=1.0 + 0.1 * jax.random.normal(k3, (cout,), jnp.float32),
            beta=0.1 * jax.random.normal(k4, (cout,), jnp.float32),
            rmean=0.1 * jax.random.normal(k5, (cout,), jnp.float32),
            rvar=0.5 + 0.5 * jnp.abs(jax.random.normal(k6, (cout,), jnp.float32)),
        ))
    F = plan["F"]
    key, k1, k2, k3, k4 = jax.random.split(key, 5)
    params["w1"] = jax.random.normal(k1, (F, HIDDEN), jnp.float32) / math.sqrt(F)
    params["b1"] = 0.1 * jax.random.normal(k2, (HIDDEN,), jnp.float32)
    params["w2"] = jax.random.normal(k3, (HIDDEN, N_CLASS), jnp.float32) / math.sqrt(HIDDEN)
    params["b2"] = 0.1 * jax.random.normal(k4, (N_CLASS,), jnp.float32)
    return params


# ----------------------------------------------------------------------------
# Pure-JAX reference of the same eval-mode forward (correctness check)
# ----------------------------------------------------------------------------
def reference(params, x_nchw):
    plan = build_plan()
    x = x_nchw.astype(jnp.float32)
    for meta, blk in zip(plan["blocks"], params["blocks"]):
        w = jnp.transpose(blk["w"], (3, 2, 0, 1))          # (Cout, Cin, KH, KW)
        y = jax.lax.conv_general_dilated(
            x, w, window_strides=(1, 1),
            padding=[(meta["p"], meta["p"])] * 2,
            dimension_numbers=("NCHW", "OIHW", "NCHW"))
        y = y + blk["b"][None, :, None, None]
        y = jnp.where(y > 0.0, y, jnp.exp(y) - 1.0)
        scale = blk["gamma"] / jnp.sqrt(blk["rvar"] + BN_EPS)
        shift = blk["beta"] - blk["rmean"] * scale
        y = y * scale[None, :, None, None] + shift[None, :, None, None]
        ps = meta["psize"]
        if meta["pooling"] == 0:
            y = jax.lax.reduce_window(y, -jnp.inf, jax.lax.max,
                                      (1, 1, ps, ps), (1, 1, 1, 1), "VALID")
        elif meta["pooling"] == 1:
            y = jax.lax.reduce_window(y, 0.0, jax.lax.add,
                                      (1, 1, ps, ps), (1, 1, 1, 1), "VALID") / float(ps * ps)
        x = y
    B = x.shape[0]
    xf = x.reshape(B, -1)
    h = xf @ params["w1"] + params["b1"]
    h = jnp.where(h > 0.0, h, jnp.exp(h) - 1.0)
    return h @ params["w2"] + params["b2"]


if __name__ == "__main__":
    key = jax.random.PRNGKey(0)
    pkey, xkey = jax.random.split(key)
    params = init_params(pkey)
    x = jax.random.normal(xkey, (2, PREV_CHANNELS, INPUT_SIZE, INPUT_SIZE), jnp.float32)

    out = jax.block_until_ready(forward(params, x))
    assert out.shape == (2, N_CLASS), out.shape

    ref = jax.block_until_ready(reference(params, x))
    assert jnp.allclose(out, ref, atol=2e-3, rtol=2e-3), \
        float(jnp.max(jnp.abs(out - ref)))

    print("KERNEL_OK")
</pallas_src>

<mosaic_0001>
module attributes {stable_mosaic.version = 11 : i64} {
  func.func @kernel(%arg0: i32, %arg1: memref<1x4x324xf32, #tpu.memory_space<vmem>>, %arg2: memref<9x8x4xf32, #tpu.memory_space<vmem>>, %arg3: memref<3x8x1xf32, #tpu.memory_space<vmem>>, %arg4: memref<9x16x8xf32, #tpu.memory_space<vmem>>, %arg5: memref<3x16x1xf32, #tpu.memory_space<vmem>>, %arg6: memref<1x267xf32, #tpu.memory_space<vmem>>, %arg7: memref<16x248x128xf32, #tpu.memory_space<vmem>>, %arg8: memref<1x128xf32, #tpu.memory_space<vmem>>, %arg9: memref<128x10xf32, #tpu.memory_space<vmem>>, %arg10: memref<1x10xf32, #tpu.memory_space<vmem>>, %arg11: memref<1x1x10xf32, #tpu.memory_space<vmem>>, %arg12: memref<8x305xf32, #tpu.memory_space<vmem>>) attributes {dimension_semantics = [#tpu.dimension_semantics<parallel>], iteration_bounds = array<i64: 2>, scalar_prefetch = 0 : i64, scratch_operands = 1 : i64, tpu.core_type = #tpu.core_type<tc>, window_params = [{transform_indices = @transform_0, window_bounds = array<i64: 1, 4, 324>}, {pipeline_mode = #tpu.pipeline_mode<synchronous>, transform_indices = @transform_1, window_bounds = array<i64: 9, 8, 4>}, {pipeline_mode = #tpu.pipeline_mode<synchronous>, transform_indices = @transform_2, window_bounds = array<i64: 3, 8, 1>}, {pipeline_mode = #tpu.pipeline_mode<synchronous>, transform_indices = @transform_3, window_bounds = array<i64: 9, 16, 8>}, {pipeline_mode = #tpu.pipeline_mode<synchronous>, transform_indices = @transform_4, window_bounds = array<i64: 3, 16, 1>}, {pipeline_mode = #tpu.pipeline_mode<synchronous>, transform_indices = @transform_5, window_bounds = array<i64: 1, 267>}, {pipeline_mode = #tpu.pipeline_mode<synchronous>, transform_indices = @transform_6, window_bounds = array<i64: 16, 248, 128>}, {pipeline_mode = #tpu.pipeline_mode<synchronous>, transform_indices = @transform_7, window_bounds = array<i64: 1, 128>}, {pipeline_mode = #tpu.pipeline_mode<synchronous>, transform_indices = @transform_8, window_bounds = array<i64: 128, 10>}, {pipeline_mode = #tpu.pipeline_mode<synchronous>, transform_indices = @transform_9, window_bounds = array<i64: 1, 10>}, {transform_indices = @transform_10, window_bounds = array<i64: 1, 1, 10>}]} {
    %c0 = arith.constant 0 : index
    %c0_0 = arith.constant 0 : index
    %c0_1 = arith.constant 0 : index
    %0 = vector.load %arg1[%c0, %c0_0, %c0_1] : memref<1x4x324xf32, #tpu.memory_space<vmem>>, vector<1x4x324xf32>
    %1 = vector.shape_cast %0 : vector<1x4x324xf32> to vector<4x324xf32>
    %cst = arith.constant 0.000000e+00 : f32
    %2 = vector.broadcast %cst : f32 to vector<8x286xf32>
    %3 = vector.extract_strided_slice %1 {offsets = [0, 0], sizes = [4, 286], strides = [1, 1]} : vector<4x324xf32> to vector<4x286xf32>
    %c0_2 = arith.constant 0 : index
    %c0_3 = arith.constant 0 : index
    %c0_4 = arith.constant 0 : index
    %4 = vector.load %arg2[%c0_2, %c0_3, %c0_4] : memref<9x8x4xf32, #tpu.memory_space<vmem>>, vector<1x8x4xf32>
    %5 = vector.shape_cast %4 : vector<1x8x4xf32> to vector<8x4xf32>
    %cst_5 = arith.constant dense<0.000000e+00> : vector<8x286xf32>
    %6 = tpu.matmul %5, %3, %cst_5 {dimension_numbers = #tpu.dot_dimension_numbers<[1], [0], [0], [1], [0, 0, 1, 1], [], []>} : vector<8x4xf32>, vector<4x286xf32>, vector<8x286xf32> -> vector<8x286xf32>
    %7 = arith.addf %2, %6 : vector<8x286xf32>
    %8 = vector.extract_strided_slice %1 {offsets = [0, 1], sizes = [4, 286], strides = [1, 1]} : vector<4x324xf32> to vector<4x286xf32>
    %c1 = arith.constant 1 : index
    %c0_6 = arith.constant 0 : index
    %c0_7 = arith.constant 0 : index
    %9 = vector.load %arg2[%c1, %c0_6, %c0_7] : memref<9x8x4xf32, #tpu.memory_space<vmem>>, vector<1x8x4xf32>
    %10 = vector.shape_cast %9 : vector<1x8x4xf32> to vector<8x4xf32>
    %cst_8 = arith.constant dense<0.000000e+00> : vector<8x286xf32>
    %11 = tpu.matmul %10, %8, %cst_8 {dimension_numbers = #tpu.dot_dimension_numbers<[1], [0], [0], [1], [0, 0, 1, 1], [], []>} : vector<8x4xf32>, vector<4x286xf32>, vector<8x286xf32> -> vector<8x286xf32>
    %12 = arith.addf %7, %11 : vector<8x286xf32>
    %13 = vector.extract_strided_slice %1 {offsets = [0, 2], sizes = [4, 286], strides = [1, 1]} : vector<4x324xf32> to vector<4x286xf32>
    %c2 = arith.constant 2 : index
    %c0_9 = arith.constant 0 : index
    %c0_10 = arith.constant 0 : index
    %14 = vector.load %arg2[%c2, %c0_9, %c0_10] : memref<9x8x4xf32, #tpu.memory_space<vmem>>, vector<1x8x4xf32>
    %15 = vector.shape_cast %14 : vector<1x8x4xf32> to vector<8x4xf32>
    %cst_11 = arith.constant dense<0.000000e+00> : vector<8x286xf32>
    %16 = tpu.matmul %15, %13, %cst_11 {dimension_numbers = #tpu.dot_dimension_numbers<[1], [0], [0], [1], [0, 0, 1, 1], [], []>} : vector<8x4xf32>, vector<4x286xf32>, vector<8x286xf32> -> vector<8x286xf32>
    %17 = arith.addf %12, %16 : vector<8x286xf32>
    %18 = vector.extract_strided_slice %1 {offsets = [0, 18], sizes = [4, 286], strides = [1, 1]} : vector<4x324xf32> to vector<4x286xf32>
    %c3 = arith.constant 3 : index
    %c0_12 = arith.constant 0 : index
    %c0_13 = arith.constant 0 : index
    %19 = vector.load %arg2[%c3, %c0_12, %c0_13] : memref<9x8x4xf32, #tpu.memory_space<vmem>>, vector<1x8x4xf32>
    %20 = vector.shape_cast %19 : vector<1x8x4xf32> to vector<8x4xf32>
    %cst_14 = arith.constant dense<0.000000e+00> : vector<8x286xf32>
    %21 = tpu.matmul %20, %18, %cst_14 {dimension_numbers = #tpu.dot_dimension_numbers<[1], [0], [0], [1], [0, 0, 1, 1], [], []>} : vector<8x4xf32>, vector<4x286xf32>, vector<8x286xf32> -> vector<8x286xf32>
    %22 = arith.addf %17, %21 : vector<8x286xf32>
    %23 = vector.extract_strided_slice %1 {offsets = [0, 19], sizes = [4, 286], strides = [1, 1]} : vector<4x324xf32> to vector<4x286xf32>
    %c4 = arith.constant 4 : index
    %c0_15 = arith.constant 0 : index
    %c0_16 = arith.constant 0 : index
    %24 = vector.load %arg2[%c4, %c0_15, %c0_16] : memref<9x8x4xf32, #tpu.memory_space<vmem>>, vector<1x8x4xf32>
    %25 = vector.shape_cast %24 : vector<1x8x4xf32> to vector<8x4xf32>
    %cst_17 = arith.constant dense<0.000000e+00> : vector<8x286xf32>
    %26 = tpu.matmul %25, %23, %cst_17 {dimension_numbers = #tpu.dot_dimension_numbers<[1], [0], [0], [1], [0, 0, 1, 1], [], []>} : vector<8x4xf32>, vector<4x286xf32>, vector<8x286xf32> -> vector<8x286xf32>
    %27 = arith.addf %22, %26 : vector<8x286xf32>
    %28 = vector.extract_strided_slice %1 {offsets = [0, 20], sizes = [4, 286], strides = [1, 1]} : vector<4x324xf32> to vector<4x286xf32>
    %c5 = arith.constant 5 : index
    %c0_18 = arith.constant 0 : index
    %c0_19 = arith.constant 0 : index
    %29 = vector.load %arg2[%c5, %c0_18, %c0_19] : memref<9x8x4xf32, #tpu.memory_space<vmem>>, vector<1x8x4xf32>
    %30 = vector.shape_cast %29 : vector<1x8x4xf32> to vector<8x4xf32>
    %cst_20 = arith.constant dense<0.000000e+00> : vector<8x286xf32>
    %31 = tpu.matmul %30, %28, %cst_20 {dimension_numbers = #tpu.dot_dimension_numbers<[1], [0], [0], [1], [0, 0, 1, 1], [], []>} : vector<8x4xf32>, vector<4x286xf32>, vector<8x286xf32> -> vector<8x286xf32>
    %32 = arith.addf %27, %31 : vector<8x286xf32>
    %33 = vector.extract_strided_slice %1 {offsets = [0, 36], sizes = [4, 286], strides = [1, 1]} : vector<4x324xf32> to vector<4x286xf32>
    %c6 = arith.constant 6 : index
    %c0_21 = arith.constant 0 : index
    %c0_22 = arith.constant 0 : index
    %34 = vector.load %arg2[%c6, %c0_21, %c0_22] : memref<9x8x4xf32, #tpu.memory_space<vmem>>, vector<1x8x4xf32>
    %35 = vector.shape_cast %34 : vector<1x8x4xf32> to vector<8x4xf32>
    %cst_23 = arith.constant dense<0.000000e+00> : vector<8x286xf32>
    %36 = tpu.matmul %35, %33, %cst_23 {dimension_numbers = #tpu.dot_dimension_numbers<[1], [0], [0], [1], [0, 0, 1, 1], [], []>} : vector<8x4xf32>, vector<4x286xf32>, vector<8x286xf32> -> vector<8x286xf32>
    %37 = arith.addf %32, %36 : vector<8x286xf32>
    %38 = vector.extract_strided_slice %1 {offsets = [0, 37], sizes = [4, 286], strides = [1, 1]} : vector<4x324xf32> to vector<4x286xf32>
    %c7 = arith.constant 7 : index
    %c0_24 = arith.constant 0 : index
    %c0_25 = arith.constant 0 : index
    %39 = vector.load %arg2[%c7, %c0_24, %c0_25] : memref<9x8x4xf32, #tpu.memory_space<vmem>>, vector<1x8x4xf32>
    %40 = vector.shape_cast %39 : vector<1x8x4xf32> to vector<8x4xf32>
    %cst_26 = arith.constant dense<0.000000e+00> : vector<8x286xf32>
    %41 = tpu.matmul %40, %38, %cst_26 {dimension_numbers = #tpu.dot_dimension_numbers<[1], [0], [0], [1], [0, 0, 1, 1], [], []>} : vector<8x4xf32>, vector<4x286xf32>, vector<8x286xf32> -> vector<8x286xf32>
    %42 = arith.addf %37, %41 : vector<8x286xf32>
    %43 = vector.extract_strided_slice %1 {offsets = [0, 38], sizes = [4, 286], strides = [1, 1]} : vector<4x324xf32> to vector<4x286xf32>
    %c8 = arith.constant 8 : index
    %c0_27 = arith.constant 0 : index
    %c0_28 = arith.constant 0 : index
    %44 = vector.load %arg2[%c8, %c0_27, %c0_28] : memref<9x8x4xf32, #tpu.memory_space<vmem>>, vector<1x8x4xf32>
    %45 = vector.shape_cast %44 : vector<1x8x4xf32> to vector<8x4xf32>
    %cst_29 = arith.constant dense<0.000000e+00> : vector<8x286xf32>
    %46 = tpu.matmul %45, %43, %cst_29 {dimension_numbers = #tpu.dot_dimension_numbers<[1], [0], [0], [1], [0, 0, 1, 1], [], []>} : vector<8x4xf32>, vector<4x286xf32>, vector<8x286xf32> -> vector<8x286xf32>
    %47 = arith.addf %42, %46 : vector<8x286xf32>
    %c0_30 = arith.constant 0 : index
    %c0_31 = arith.constant 0 : index
    %c0_32 = arith.constant 0 : index
    %48 = vector.load %arg3[%c0_30, %c0_31, %c0_32] : memref<3x8x1xf32, #tpu.memory_space<vmem>>, vector<1x8x1xf32>
    %49 = vector.shape_cast %48 : vector<1x8x1xf32> to vector<8x1xf32>
    %50 = vector.broadcast %49 : vector<8x1xf32> to vector<8x286xf32>
    %51 = arith.addf %47, %50 : vector<8x286xf32>
    %cst_33 = arith.constant 0.000000e+00 : f32
    %52 = vector.broadcast %cst_33 : f32 to vector<8x286xf32>
    %53 = arith.cmpf ogt, %51, %52 : vector<8x286xf32>
    %54 = math.exp %51 : vector<8x286xf32>
    %cst_34 = arith.constant 1.000000e+00 : f32
    %55 = vector.broadcast %cst_34 : f32 to vector<8x286xf32>
    %56 = arith.subf %54, %55 : vector<8x286xf32>
    %57 = arith.select %53, %51, %56 : vector<8x286xi1>, vector<8x286xf32>
    %c1_35 = arith.constant 1 : index
    %c0_36 = arith.constant 0 : index
    %c0_37 = arith.constant 0 : index
    %58 = vector.load %arg3[%c1_35, %c0_36, %c0_37] : memref<3x8x1xf32, #tpu.memory_space<vmem>>, vector<1x8x1xf32>
    %59 = vector.shape_cast %58 : vector<1x8x1xf32> to vector<8x1xf32>
    %60 = vector.broadcast %59 : vector<8x1xf32> to vector<8x286xf32>
    %61 = arith.mulf %57, %60 : vector<8x286xf32>
    %c2_38 = arith.constant 2 : index
    %c0_39 = arith.constant 0 : index
    %c0_40 = arith.constant 0 : index
    %62 = vector.load %arg3[%c2_38, %c0_39, %c0_40] : memref<3x8x1xf32, #tpu.memory_space<vmem>>, vector<1x8x1xf32>
    %63 = vector.shape_cast %62 : vector<1x8x1xf32> to vector<8x1xf32>
    %64 = vector.broadcast %63 : vector<8x1xf32> to vector<8x286xf32>
    %65 = arith.addf %61, %64 : vector<8x286xf32>
    %66 = vector.extract_strided_slice %65 {offsets = [0, 0], sizes = [8, 267], strides = [1, 1]} : vector<8x286xf32> to vector<8x267xf32>
    %67 = vector.extract_strided_slice %65 {offsets = [0, 1], sizes = [8, 267], strides = [1, 1]} : vector<8x286xf32> to vector<8x267xf32>
    %68 = arith.maximumf %66, %67 : vector<8x267xf32>
    %69 = vector.extract_strided_slice %65 {offsets = [0, 18], sizes = [8, 267], strides = [1, 1]} : vector<8x286xf32> to vector<8x267xf32>
    %70 = arith.maximumf %68, %69 : vector<8x267xf32>
    %71 = vector.extract_strided_slice %65 {offsets = [0, 19], sizes = [8, 267], strides = [1, 1]} : vector<8x286xf32> to vector<8x267xf32>
    %72 = arith.maximumf %70, %71 : vector<8x267xf32>
    %cst_41 = arith.constant 0.000000e+00 : f32
    %73 = vector.broadcast %cst_41 : f32 to vector<8x305xf32>
    %c0_42 = arith.constant 0 : index
    %c0_43 = arith.constant 0 : index
    %74 = vector.load %arg12[%c0_42, %c0_43] : memref<8x305xf32, #tpu.memory_space<vmem>>, vector<8x305xf32>
    tpu.vector_store %arg12[%c0_42, %c0_43], %73 {strides = array<i32>} : memref<8x305xf32, #tpu.memory_space<vmem>>, vector<8x305xf32>,
    %c0_44 = arith.constant 0 : index
    %c0_45 = arith.constant 0 : index
    %75 = vector.load %arg6[%c0_44, %c0_45] : memref<1x267xf32, #tpu.memory_space<vmem>>, vector<1x267xf32>
    %76 = vector.broadcast %75 : vector<1x267xf32> to vector<8x267xf32>
    %77 = arith.mulf %72, %76 : vector<8x267xf32>
    %c0_46 = arith.constant 0 : index
    %c19 = arith.constant 19 : index
    %78 = vector.load %arg12[%c0_46, %c19] : memref<8x305xf32, #tpu.memory_space<vmem>>, vector<8x267xf32>
    tpu.vector_store %arg12[%c0_46, %c19], %77 {strides = array<i32>} : memref<8x305xf32, #tpu.memory_space<vmem>>, vector<8x267xf32>,
    %cst_47 = arith.constant 0.000000e+00 : f32
    %79 = vector.broadcast %cst_47 : f32 to vector<16x267xf32>
    %c0_48 = arith.constant 0 : index
    %c0_49 = arith.constant 0 : index
    %80 = vector.load %arg12[%c0_48, %c0_49] : memref<8x305xf32, #tpu.memory_space<vmem>>, vector<8x267xf32>
    %c0_50 = arith.constant 0 : index
    %c0_51 = arith.constant 0 : index
    %c0_52 = arith.constant 0 : index
    %81 = vector.load %arg4[%c0_50, %c0_51, %c0_52] : memref<9x16x8xf32, #tpu.memory_space<vmem>>, vector<1x16x8xf32>
    %82 = vector.shape_cast %81 : vector<1x16x8xf32> to vector<16x8xf32>
    %cst_53 = arith.constant dense<0.000000e+00> : vector<16x267xf32>
    %83 = tpu.matmul %82, %80, %cst_53 {dimension_numbers = #tpu.dot_dimension_numbers<[1], [0], [0], [1], [0, 0, 1, 1], [], []>} : vector<16x8xf32>, vector<8x267xf32>, vector<16x267xf32> -> vector<16x267xf32>
    %84 = arith.addf %79, %83 : vector<16x267xf32>
    %c0_54 = arith.constant 0 : index
    %c1_55 = arith.constant 1 : index
    %85 = vector.load %arg12[%c0_54, %c1_55] : memref<8x305xf32, #tpu.memory_space<vmem>>, vector<8x267xf32>
    %c1_56 = arith.constant 1 : index
    %c0_57 = arith.constant 0 : index
    %c0_58 = arith.constant 0 : index
    %86 = vector.load %arg4[%c1_56, %c0_57, %c0_58] : memref<9x16x8xf32, #tpu.memory_space<vmem>>, vector<1x16x8xf32>
    %87 = vector.shape_cast %86 : vector<1x16x8xf32> to vector<16x8xf32>
    %cst_59 = arith.constant dense<0.000000e+00> : vector<16x267xf32>
    %88 = tpu.matmul %87, %85, %cst_59 {dimension_numbers = #tpu.dot_dimension_numbers<[1], [0], [0], [1], [0, 0, 1, 1], [], []>} : vector<16x8xf32>, vector<8x267xf32>, vector<16x267xf32> -> vector<16x267xf32>
    %89 = arith.addf %84, %88 : vector<16x267xf32>
    %c0_60 = arith.constant 0 : index
    %c2_61 = arith.constant 2 : index
    %90 = vector.load %arg12[%c0_60, %c2_61] : memref<8x305xf32, #tpu.memory_space<vmem>>, vector<8x267xf32>
    %c2_62 = arith.constant 2 : index
    %c0_63 = arith.constant 0 : index
    %c0_64 = arith.constant 0 : index
    %91 = vector.load %arg4[%c2_62, %c0_63, %c0_64] : memref<9x16x8xf32, #tpu.memory_space<vmem>>, vector<1x16x8xf32>
    %92 = vector.shape_cast %91 : vector<1x16x8xf32> to vector<16x8xf32>
    %cst_65 = arith.constant dense<0.000000e+00> : vector<16x267xf32>
    %93 = tpu.matmul %92, %90, %cst_65 {dimension_numbers = #tpu.dot_dimension_numbers<[1], [0], [0], [1], [0, 0, 1, 1], [], []>} : vector<16x8xf32>, vector<8x267xf32>, vector<16x267xf32> -> vector<16x267xf32>
    %94 = arith.addf %89, %93 : vector<16x267xf32>
    %c0_66 = arith.constant 0 : index
    %c18 = arith.constant 18 : index
    %95 = vector.load %arg12[%c0_66, %c18] : memref<8x305xf32, #tpu.memory_space<vmem>>, vector<8x267xf32>
    %c3_67 = arith.constant 3 : index
    %c0_68 = arith.constant 0 : index
    %c0_69 = arith.constant 0 : index
    %96 = vector.load %arg4[%c3_67, %c0_68, %c0_69] : memref<9x16x8xf32, #tpu.memory_space<vmem>>, vector<1x16x8xf32>
    %97 = vector.shape_cast %96 : vector<1x16x8xf32> to vector<16x8xf32>
    %cst_70 = arith.constant dense<0.000000e+00> : vector<16x267xf32>
    %98 = tpu.matmul %97, %95, %cst_70 {dimension_numbers = #tpu.dot_dimension_numbers<[1], [0], [0], [1], [0, 0, 1, 1], [], []>} : vector<16x8xf32>, vector<8x267xf32>, vector<16x267xf32> -> vector<16x267xf32>
    %99 = arith.addf %94, %98 : vector<16x267xf32>
    %c0_71 = arith.constant 0 : index
    %c19_72 = arith.constant 19 : index
    %100 = vector.load %arg12[%c0_71, %c19_72] : memref<8x305xf32, #tpu.memory_space<vmem>>, vector<8x267xf32>
    %c4_73 = arith.constant 4 : index
    %c0_74 = arith.constant 0 : index
    %c0_75 = arith.constant 0 : index
    %101 = vector.load %arg4[%c4_73, %c0_74, %c0_75] : memref<9x16x8xf32, #tpu.memory_space<vmem>>, vector<1x16x8xf32>
    %102 = vector.shape_cast %101 : vector<1x16x8xf32> to vector<16x8xf32>
    %cst_76 = arith.constant dense<0.000000e+00> : vector<16x267xf32>
    %103 = tpu.matmul %102, %100, %cst_76 {dimension_numbers = #tpu.dot_dimension_numbers<[1], [0], [0], [1], [0, 0, 1, 1], [], []>} : vector<16x8xf32>, vector<8x267xf32>, vector<16x267xf32> -> vector<16x267xf32>
    %104 = arith.addf %99, %103 : vector<16x267xf32>
    %c0_77 = arith.constant 0 : index
    %c20 = arith.constant 20 : index
    %105 = vector.load %arg12[%c0_77, %c20] : memref<8x305xf32, #tpu.memory_space<vmem>>, vector<8x267xf32>
    %c5_78 = arith.constant 5 : index
    %c0_79 = arith.constant 0 : index
    %c0_80 = arith.constant 0 : index
    %106 = vector.load %arg4[%c5_78, %c0_79, %c0_80] : memref<9x16x8xf32, #tpu.memory_space<vmem>>, vector<1x16x8xf32>
    %107 = vector.shape_cast %106 : vector<1x16x8xf32> to vector<16x8xf32>
    %cst_81 = arith.constant dense<0.000000e+00> : vector<16x267xf32>
    %108 = tpu.matmul %107, %105, %cst_81 {dimension_numbers = #tpu.dot_dimension_numbers<[1], [0], [0], [1], [0, 0, 1, 1], [], []>} : vector<16x8xf32>, vector<8x267xf32>, vector<16x267xf32> -> vector<16x267xf32>
    %109 = arith.addf %104, %108 : vector<16x267xf32>
    %c0_82 = arith.constant 0 : index
    %c36 = arith.constant 36 : index
    %110 = vector.load %arg12[%c0_82, %c36] : memref<8x305xf32, #tpu.memory_space<vmem>>, vector<8x267xf32>
    %c6_83 = arith.constant 6 : index
    %c0_84 = arith.constant 0 : index
    %c0_85 = arith.constant 0 : index
    %111 = vector.load %arg4[%c6_83, %c0_84, %c0_85] : memref<9x16x8xf32, #tpu.memory_space<vmem>>, vector<1x16x8xf32>
    %112 = vector.shape_cast %111 : vector<1x16x8xf32> to vector<16x8xf32>
    %cst_86 = arith.constant dense<0.000000e+00> : vector<16x267xf32>
    %113 = tpu.matmul %112, %110, %cst_86 {dimension_numbers = #tpu.dot_dimension_numbers<[1], [0], [0], [1], [0, 0, 1, 1], [], []>} : vector<16x8xf32>, vector<8x267xf32>, vector<16x267xf32> -> vector<16x267xf32>
    %114 = arith.addf %109, %113 : vector<16x267xf32>
    %c0_87 = arith.constant 0 : index
    %c37 = arith.constant 37 : index
    %115 = vector.load %arg12[%c0_87, %c37] : memref<8x305xf32, #tpu.memory_space<vmem>>, vector<8x267xf32>
    %c7_88 = arith.constant 7 : index
    %c0_89 = arith.constant 0 : index
    %c0_90 = arith.constant 0 : index
    %116 = vector.load %arg4[%c7_88, %c0_89, %c0_90] : memref<9x16x8xf32, #tpu.memory_space<vmem>>, vector<1x16x8xf32>
    %117 = vector.shape_cast %116 : vector<1x16x8xf32> to vector<16x8xf32>
    %cst_91 = arith.constant dense<0.000000e+00> : vector<16x267xf32>
    %118 = tpu.matmul %117, %115, %cst_91 {dimension_numbers = #tpu.dot_dimension_numbers<[1], [0], [0], [1], [0, 0, 1, 1], [], []>} : vector<16x8xf32>, vector<8x267xf32>, vector<16x267xf32> -> vector<16x267xf32>
    %119 = arith.addf %114, %118 : vector<16x267xf32>
    %c0_92 = arith.constant 0 : index
    %c38 = arith.constant 38 : index
    %120 = vector.load %arg12[%c0_92, %c38] : memref<8x305xf32, #tpu.memory_space<vmem>>, vector<8x267xf32>
    %c8_93 = arith.constant 8 : index
    %c0_94 = arith.constant 0 : index
    %c0_95 = arith.constant 0 : index
    %121 = vector.load %arg4[%c8_93, %c0_94, %c0_95] : memref<9x16x8xf32, #tpu.memory_space<vmem>>, vector<1x16x8xf32>
    %122 = vector.shape_cast %121 : vector<1x16x8xf32> to vector<16x8xf32>
    %cst_96 = arith.constant dense<0.000000e+00> : vector<16x267xf32>
    %123 = tpu.matmul %122, %120, %cst_96 {dimension_numbers = #tpu.dot_dimension_numbers<[1], [0], [0], [1], [0, 0, 1, 1], [], []>} : vector<16x8xf32>, vector<8x267xf32>, vector<16x267xf32> -> vector<16x267xf32>
    %124 = arith.addf %119, %123 : vector<16x267xf32>
    %c0_97 = arith.constant 0 : index
    %c0_98 = arith.constant 0 : index
    %c0_99 = arith.constant 0 : index
    %125 = vector.load %arg5[%c0_97, %c0_98, %c0_99] : memref<3x16x1xf32, #tpu.memory_space<vmem>>, vector<1x16x1xf32>
    %126 = vector.shape_cast %125 : vector<1x16x1xf32> to vector<16x1xf32>
    %127 = vector.broadcast %126 : vector<16x1xf32> to vector<16x267xf32>
    %128 = arith.addf %124, %127 : vector<16x267xf32>
    %cst_100 = arith.constant 0.000000e+00 : f32
    %129 = vector.broadcast %cst_100 : f32 to vector<16x267xf32>
    %130 = arith.cmpf ogt, %128, %129 : vector<16x267xf32>
    %131 = math.exp %128 : vector<16x267xf32>
    %cst_101 = arith.constant 1.000000e+00 : f32
    %132 = vector.broadcast %cst_101 : f32 to vector<16x267xf32>
    %133 = arith.subf %131, %132 : vector<16x267xf32>
    %134 = arith.select %130, %128, %133 : vector<16x267xi1>, vector<16x267xf32>
    %c1_102 = arith.constant 1 : index
    %c0_103 = arith.constant 0 : index
    %c0_104 = arith.constant 0 : index
    %135 = vector.load %arg5[%c1_102, %c0_103, %c0_104] : memref<3x16x1xf32, #tpu.memory_space<vmem>>, vector<1x16x1xf32>
    %136 = vector.shape_cast %135 : vector<1x16x1xf32> to vector<16x1xf32>
    %137 = vector.broadcast %136 : vector<16x1xf32> to vector<16x267xf32>
    %138 = arith.mulf %134, %137 : vector<16x267xf32>
    %c2_105 = arith.constant 2 : index
    %c0_106 = arith.constant 0 : index
    %c0_107 = arith.constant 0 : index
    %139 = vector.load %arg5[%c2_105, %c0_106, %c0_107] : memref<3x16x1xf32, #tpu.memory_space<vmem>>, vector<1x16x1xf32>
    %140 = vector.shape_cast %139 : vector<1x16x1xf32> to vector<16x1xf32>
    %141 = vector.broadcast %140 : vector<16x1xf32> to vector<16x267xf32>
    %142 = arith.addf %138, %141 : vector<16x267xf32>
    %143 = vector.extract_strided_slice %142 {offsets = [0, 0], sizes = [16, 248], strides = [1, 1]} : vector<16x267xf32> to vector<16x248xf32>
    %144 = vector.extract_strided_slice %142 {offsets = [0, 1], sizes = [16, 248], strides = [1, 1]} : vector<16x267xf32> to vector<16x248xf32>
    %145 = arith.addf %143, %144 : vector<16x248xf32>
    %146 = vector.extract_strided_slice %142 {offsets = [0, 18], sizes = [16, 248], strides = [1, 1]} : vector<16x267xf32> to vector<16x248xf32>
    %147 = arith.addf %145, %146 : vector<16x248xf32>
    %148 = vector.extract_strided_slice %142 {offsets = [0, 19], sizes = [16, 248], strides = [1, 1]} : vector<16x267xf32> to vector<16x248xf32>
    %149 = arith.addf %147, %148 : vector<16x248xf32>
    %cst_108 = arith.constant 2.500000e-01 : f32
    %150 = vector.broadcast %cst_108 : f32 to vector<16x248xf32>
    %151 = arith.mulf %149, %150 : vector<16x248xf32>
    %c0_109 = arith.constant 0 : index
    %c0_110 = arith.constant 0 : index
    %152 = vector.load %arg8[%c0_109, %c0_110] : memref<1x128xf32, #tpu.memory_space<vmem>>, vector<1x128xf32>
    %153 = vector.extract_strided_slice %151 {offsets = [0, 0], sizes = [1, 248], strides = [1, 1]} : vector<16x248xf32> to vector<1x248xf32>
    %c0_111 = arith.constant 0 : index
    %c0_112 = arith.constant 0 : index
    %c0_113 = arith.constant 0 : index
    %154 = vector.load %arg7[%c0_111, %c0_112, %c0_113] : memref<16x248x128xf32, #tpu.memory_space<vmem>>, vector<1x248x128xf32>
    %155 = vector.shape_cast %154 : vector<1x248x128xf32> to vector<248x128xf32>
    %cst_114 = arith.constant dense<0.000000e+00> : vector<1x128xf32>
    %156 = tpu.matmul %153, %155, %cst_114 {dimension_numbers = #tpu.dot_dimension_numbers<[1], [0], [0], [1], [0, 0, 1, 1], [], []>} : vector<1x248xf32>, vector<248x128xf32>, vector<1x128xf32> -> vector<1x128xf32>
    %157 = arith.addf %152, %156 : vector<1x128xf32>
    %158 = vector.extract_strided_slice %151 {offsets = [1, 0], sizes = [1, 248], strides = [1, 1]} : vector<16x248xf32> to vector<1x248xf32>
    %c1_115 = arith.constant 1 : index
    %c0_116 = arith.constant 0 : index
    %c0_117 = arith.constant 0 : index
    %159 = vector.load %arg7[%c1_115, %c0_116, %c0_117] : memref<16x248x128xf32, #tpu.memory_space<vmem>>, vector<1x248x128xf32>
    %160 = vector.shape_cast %159 : vector<1x248x128xf32> to vector<248x128xf32>
    %cst_118 = arith.constant dense<0.000000e+00> : vector<1x128xf32>
    %161 = tpu.matmul %158, %160, %cst_118 {dimension_numbers = #tpu.dot_dimension_numbers<[1], [0], [0], [1], [0, 0, 1, 1], [], []>} : vector<1x248xf32>, vector<248x128xf32>, vector<1x128xf32> -> vector<1x128xf32>
    %162 = arith.addf %157, %161 : vector<1x128xf32>
    %163 = vector.extract_strided_slice %151 {offsets = [2, 0], sizes = [1, 248], strides = [1, 1]} : vector<16x248xf32> to vector<1x248xf32>
    %c2_119 = arith.constant 2 : index
    %c0_120 = arith.constant 0 : index
    %c0_121 = arith.constant 0 : index
    %164 = vector.load %arg7[%c2_119, %c0_120, %c0_121] : memref<16x248x128xf32, #tpu.memory_space<vmem>>, vector<1x248x128xf32>
    %165 = vector.shape_cast %164 : vector<1x248x128xf32> to vector<248x128xf32>
    %cst_122 = arith.constant dense<0.000000e+00> : vector<1x128xf32>
    %166 = tpu.matmul %163, %165, %cst_122 {dimension_numbers = #tpu.dot_dimension_numbers<[1], [0], [0], [1], [0, 0, 1, 1], [], []>} : vector<1x248xf32>, vector<248x128xf32>, vector<1x128xf32> -> vector<1x128xf32>
    %167 = arith.addf %162, %166 : vector<1x128xf32>
    %168 = vector.extract_strided_slice %151 {offsets = [3, 0], sizes = [1, 248], strides = [1, 1]} : vector<16x248xf32> to vector<1x248xf32>
    %c3_123 = arith.constant 3 : index
    %c0_124 = arith.constant 0 : index
    %c0_125 = arith.constant 0 : index
    %169 = vector.load %arg7[%c3_123, %c0_124, %c0_125] : memref<16x248x128xf32, #tpu.memory_space<vmem>>, vector<1x248x128xf32>
    %170 = vector.shape_cast %169 : vector<1x248x128xf32> to vector<248x128xf32>
    %cst_126 = arith.constant dense<0.000000e+00> : vector<1x128xf32>
    %171 = tpu.matmul %168, %170, %cst_126 {dimension_numbers = #tpu.dot_dimension_numbers<[1], [0], [0], [1], [0, 0, 1, 1], [], []>} : vector<1x248xf32>, vector<248x128xf32>, vector<1x128xf32> -> vector<1x128xf32>
    %172 = arith.addf %167, %171 : vector<1x128xf32>
    %173 = vector.extract_strided_slice %151 {offsets = [4, 0], sizes = [1, 248], strides = [1, 1]} : vector<16x248xf32> to vector<1x248xf32>
    %c4_127 = arith.constant 4 : index
    %c0_128 = arith.constant 0 : index
    %c0_129 = arith.constant 0 : index
    %174 = vector.load %arg7[%c4_127, %c0_128, %c0_129] : memref<16x248x128xf32, #tpu.memory_space<vmem>>, vector<1x248x128xf32>
    %175 = vector.shape_cast %174 : vector<1x248x128xf32> to vector<248x128xf32>
    %cst_130 = arith.constant dense<0.000000e+00> : vector<1x128xf32>
    %176 = tpu.matmul %173, %175, %cst_130 {dimension_numbers = #tpu.dot_dimension_numbers<[1], [0], [0], [1], [0, 0, 1, 1], [], []>} : vector<1x248xf32>, vector<248x128xf32>, vector<1x128xf32> -> vector<1x128xf32>
    %177 = arith.addf %172, %176 : vector<1x128xf32>
    %178 = vector.extract_strided_slice %151 {offsets = [5, 0], sizes = [1, 248], strides = [1, 1]} : vector<16x248xf32> to vector<1x248xf32>
    %c5_131 = arith.constant 5 : index
    %c0_132 = arith.constant 0 : index
    %c0_133 = arith.constant 0 : index
    %179 = vector.load %arg7[%c5_131, %c0_132, %c0_133] : memref<16x248x128xf32, #tpu.memory_space<vmem>>, vector<1x248x128xf32>
    %180 = vector.shape_cast %179 : vector<1x248x128xf32> to vector<248x128xf32>
    %cst_134 = arith.constant dense<0.000000e+00> : vector<1x128xf32>
    %181 = tpu.matmul %178, %180, %cst_134 {dimension_numbers = #tpu.dot_dimension_numbers<[1], [0], [0], [1], [0, 0, 1, 1], [], []>} : vector<1x248xf32>, vector<248x128xf32>, vector<1x128xf32> -> vector<1x128xf32>
    %182 = arith.addf %177, %181 : vector<1x128xf32>
    %183 = vector.extract_strided_slice %151 {offsets = [6, 0], sizes = [1, 248], strides = [1, 1]} : vector<16x248xf32> to vector<1x248xf32>
    %c6_135 = arith.constant 6 : index
    %c0_136 = arith.constant 0 : index
    %c0_137 = arith.constant 0 : index
    %184 = vector.load %arg7[%c6_135, %c0_136, %c0_137] : memref<16x248x128xf32, #tpu.memory_space<vmem>>, vector<1x248x128xf32>
    %185 = vector.shape_cast %184 : vector<1x248x128xf32> to vector<248x128xf32>
    %cst_138 = arith.constant dense<0.000000e+00> : vector<1x128xf32>
    %186 = tpu.matmul %183, %185, %cst_138 {dimension_numbers = #tpu.dot_dimension_numbers<[1], [0], [0], [1], [0, 0, 1, 1], [], []>} : vector<1x248xf32>, vector<248x128xf32>, vector<1x128xf32> -> vector<1x128xf32>
    %187 = arith.addf %182, %186 : vector<1x128xf32>
    %188 = vector.extract_strided_slice %151 {offsets = [7, 0], sizes = [1, 248], strides = [1, 1]} : vector<16x248xf32> to vector<1x248xf32>
    %c7_139 = arith.constant 7 : index
    %c0_140 = arith.constant 0 : index
    %c0_141 = arith.constant 0 : index
    %189 = vector.load %arg7[%c7_139, %c0_140, %c0_141] : memref<16x248x128xf32, #tpu.memory_space<vmem>>, vector<1x248x128xf32>
    %190 = vector.shape_cast %189 : vector<1x248x128xf32> to vector<248x128xf32>
    %cst_142 = arith.constant dense<0.000000e+00> : vector<1x128xf32>
    %191 = tpu.matmul %188, %190, %cst_142 {dimension_numbers = #tpu.dot_dimension_numbers<[1], [0], [0], [1], [0, 0, 1, 1], [], []>} : vector<1x248xf32>, vector<248x128xf32>, vector<1x128xf32> -> vector<1x128xf32>
    %192 = arith.addf %187, %191 : vector<1x128xf32>
    %193 = vector.extract_strided_slice %151 {offsets = [8, 0], sizes = [1, 248], strides = [1, 1]} : vector<16x248xf32> to vector<1x248xf32>
    %c8_143 = arith.constant 8 : index
    %c0_144 = arith.constant 0 : index
    %c0_145 = arith.constant 0 : index
    %194 = vector.load %arg7[%c8_143, %c0_144, %c0_145] : memref<16x248x128xf32, #tpu.memory_space<vmem>>, vector<1x248x128xf32>
    %195 = vector.shape_cast %194 : vector<1x248x128xf32> to vector<248x128xf32>
    %cst_146 = arith.constant dense<0.000000e+00> : vector<1x128xf32>
    %196 = tpu.matmul %193, %195, %cst_146 {dimension_numbers = #tpu.dot_dimension_numbers<[1], [0], [0], [1], [0, 0, 1, 1], [], []>} : vector<1x248xf32>, vector<248x128xf32>, vector<1x128xf32> -> vector<1x128xf32>
    %197 = arith.addf %192, %196 : vector<1x128xf32>
    %198 = vector.extract_strided_slice %151 {offsets = [9, 0], sizes = [1, 248], strides = [1, 1]} : vector<16x248xf32> to vector<1x248xf32>
    %c9 = arith.constant 9 : index
    %c0_147 = arith.constant 0 : index
    %c0_148 = arith.constant 0 : index
    %199 = vector.load %arg7[%c9, %c0_147, %c0_148] : memref<16x248x128xf32, #tpu.memory_space<vmem>>, vector<1x248x128xf32>
    %200 = vector.shape_cast %199 : vector<1x248x128xf32> to vector<248x128xf32>
    %cst_149 = arith.constant dense<0.000000e+00> : vector<1x128xf32>
    %201 = tpu.matmul %198, %200, %cst_149 {dimension_numbers = #tpu.dot_dimension_numbers<[1], [0], [0], [1], [0, 0, 1, 1], [], []>} : vector<1x248xf32>, vector<248x128xf32>, vector<1x128xf32> -> vector<1x128xf32>
    %202 = arith.addf %197, %201 : vector<1x128xf32>
    %203 = vector.extract_strided_slice %151 {offsets = [10, 0], sizes = [1, 248], strides = [1, 1]} : vector<16x248xf32> to vector<1x248xf32>
    %c10 = arith.constant 10 : index
    %c0_150 = arith.constant 0 : index
    %c0_151 = arith.constant 0 : index
    %204 = vector.load %arg7[%c10, %c0_150, %c0_151] : memref<16x248x128xf32, #tpu.memory_space<vmem>>, vector<1x248x128xf32>
    %205 = vector.shape_cast %204 : vector<1x248x128xf32> to vector<248x128xf32>
    %cst_152 = arith.constant dense<0.000000e+00> : vector<1x128xf32>
    %206 = tpu.matmul %203, %205, %cst_152 {dimension_numbers = #tpu.dot_dimension_numbers<[1], [0], [0], [1], [0, 0, 1, 1], [], []>} : vector<1x248xf32>, vector<248x128xf32>, vector<1x128xf32> -> vector<1x128xf32>
    %207 = arith.addf %202, %206 : vector<1x128xf32>
    %208 = vector.extract_strided_slice %151 {offsets = [11, 0], sizes = [1, 248], strides = [1, 1]} : vector<16x248xf32> to vector<1x248xf32>
    %c11 = arith.constant 11 : index
    %c0_153 = arith.constant 0 : index
    %c0_154 = arith.constant 0 : index
    %209 = vector.load %arg7[%c11, %c0_153, %c0_154] : memref<16x248x128xf32, #tpu.memory_space<vmem>>, vector<1x248x128xf32>
    %210 = vector.shape_cast %209 : vector<1x248x128xf32> to vector<248x128xf32>
    %cst_155 = arith.constant dense<0.000000e+00> : vector<1x128xf32>
    %211 = tpu.matmul %208, %210, %cst_155 {dimension_numbers = #tpu.dot_dimension_numbers<[1], [0], [0], [1], [0, 0, 1, 1], [], []>} : vector<1x248xf32>, vector<248x128xf32>, vector<1x128xf32> -> vector<1x128xf32>
    %212 = arith.addf %207, %211 : vector<1x128xf32>
    %213 = vector.extract_strided_slice %151 {offsets = [12, 0], sizes = [1, 248], strides = [1, 1]} : vector<16x248xf32> to vector<1x248xf32>
    %c12 = arith.constant 12 : index
    %c0_156 = arith.constant 0 : index
    %c0_157 = arith.constant 0 : index
    %214 = vector.load %arg7[%c12, %c0_156, %c0_157] : memref<16x248x128xf32, #tpu.memory_space<vmem>>, vector<1x248x128xf32>
    %215 = vector.shape_cast %214 : vector<1x248x128xf32> to vector<248x128xf32>
    %cst_158 = arith.constant dense<0.000000e+00> : vector<1x128xf32>
    %216 = tpu.matmul %213, %215, %cst_158 {dimension_numbers = #tpu.dot_dimension_numbers<[1], [0], [0], [1], [0, 0, 1, 1], [], []>} : vector<1x248xf32>, vector<248x128xf32>, vector<1x128xf32> -> vector<1x128xf32>
    %217 = arith.addf %212, %216 : vector<1x128xf32>
    %218 = vector.extract_strided_slice %151 {offsets = [13, 0], sizes = [1, 248], strides = [1, 1]} : vector<16x248xf32> to vector<1x248xf32>
    %c13 = arith.constant 13 : index
    %c0_159 = arith.constant 0 : index
    %c0_160 = arith.constant 0 : index
    %219 = vector.load %arg7[%c13, %c0_159, %c0_160] : memref<16x248x128xf32, #tpu.memory_space<vmem>>, vector<1x248x128xf32>
    %220 = vector.shape_cast %219 : vector<1x248x128xf32> to vector<248x128xf32>
    %cst_161 = arith.constant dense<0.000000e+00> : vector<1x128xf32>
    %221 = tpu.matmul %218, %220, %cst_161 {dimension_numbers = #tpu.dot_dimension_numbers<[1], [0], [0], [1], [0, 0, 1, 1], [], []>} : vector<1x248xf32>, vector<248x128xf32>, vector<1x128xf32> -> vector<1x128xf32>
    %222 = arith.addf %217, %221 : vector<1x128xf32>
    %223 = vector.extract_strided_slice %151 {offsets = [14, 0], sizes = [1, 248], strides = [1, 1]} : vector<16x248xf32> to vector<1x248xf32>
    %c14 = arith.constant 14 : index
    %c0_162 = arith.constant 0 : index
    %c0_163 = arith.constant 0 : index
    %224 = vector.load %arg7[%c14, %c0_162, %c0_163] : memref<16x248x128xf32, #tpu.memory_space<vmem>>, vector<1x248x128xf32>
    %225 = vector.shape_cast %224 : vector<1x248x128xf32> to vector<248x128xf32>
    %cst_164 = arith.constant dense<0.000000e+00> : vector<1x128xf32>
    %226 = tpu.matmul %223, %225, %cst_164 {dimension_numbers = #tpu.dot_dimension_numbers<[1], [0], [0], [1], [0, 0, 1, 1], [], []>} : vector<1x248xf32>, vector<248x128xf32>, vector<1x128xf32> -> vector<1x128xf32>
    %227 = arith.addf %222, %226 : vector<1x128xf32>
    %228 = vector.extract_strided_slice %151 {offsets = [15, 0], sizes = [1, 248], strides = [1, 1]} : vector<16x248xf32> to vector<1x248xf32>
    %c15 = arith.constant 15 : index
    %c0_165 = arith.constant 0 : index
    %c0_166 = arith.constant 0 : index
    %229 = vector.load %arg7[%c15, %c0_165, %c0_166] : memref<16x248x128xf32, #tpu.memory_space<vmem>>, vector<1x248x128xf32>
    %230 = vector.shape_cast %229 : vector<1x248x128xf32> to vector<248x128xf32>
    %cst_167 = arith.constant dense<0.000000e+00> : vector<1x128xf32>
    %231 = tpu.matmul %228, %230, %cst_167 {dimension_numbers = #tpu.dot_dimension_numbers<[1], [0], [0], [1], [0, 0, 1, 1], [], []>} : vector<1x248xf32>, vector<248x128xf32>, vector<1x128xf32> -> vector<1x128xf32>
    %232 = arith.addf %227, %231 : vector<1x128xf32>
    %cst_168 = arith.constant 0.000000e+00 : f32
    %233 = vector.broadcast %cst_168 : f32 to vector<1x128xf32>
    %234 = arith.cmpf ogt, %232, %233 : vector<1x128xf32>
    %235 = math.exp %232 : vector<1x128xf32>
    %cst_169 = arith.constant 1.000000e+00 : f32
    %236 = vector.broadcast %cst_169 : f32 to vector<1x128xf32>
    %237 = arith.subf %235, %236 : vector<1x128xf32>
    %238 = arith.select %234, %232, %237 : vector<1x128xi1>, vector<1x128xf32>
    %c0_170 = arith.constant 0 : index
    %c0_171 = arith.constant 0 : index
    %239 = vector.load %arg9[%c0_170, %c0_171] : memref<128x10xf32, #tpu.memory_space<vmem>>, vector<128x10xf32>
    %cst_172 = arith.constant dense<0.000000e+00> : vector<1x10xf32>
    %240 = tpu.matmul %238, %239, %cst_172 {dimension_numbers = #tpu.dot_dimension_numbers<[1], [0], [0], [1], [0, 0, 1, 1], [], []>} : vector<1x128xf32>, vector<128x10xf32>, vector<1x10xf32> -> vector<1x10xf32>
    %c0_173 = arith.constant 0 : index
    %c0_174 = arith.constant 0 : index
    %241 = vector.load %arg10[%c0_173, %c0_174] : memref<1x10xf32, #tpu.memory_space<vmem>>, vector<1x10xf32>
    %242 = arith.addf %240, %241 : vector<1x10xf32>
    %c0_175 = arith.constant 0 : index
    %c0_176 = arith.constant 0 : index
    %c0_177 = arith.constant 0 : index
    %243 = vector.load %arg11[%c0_175, %c0_176, %c0_177] : memref<1x1x10xf32, #tpu.memory_space<vmem>>, vector<1x1x10xf32>
    %244 = vector.shape_cast %243 : vector<1x1x10xf32> to vector<1x10xf32>
    %245 = vector.shape_cast %242 : vector<1x10xf32> to vector<1x1x10xf32>
    tpu.vector_store %arg11[%c0_175, %c0_176, %c0_177], %245 {strides = array<i32>} : memref<1x1x10xf32, #tpu.memory_space<vmem>>, vector<1x1x10xf32>,
    return
  }
  func.func @transform_0(%arg0: i32) -> (i32, i32, i32) {
    %c0_i32 = arith.constant 0 : i32
    %c0_i32_0 = arith.constant 0 : i32
    %c0_i32_1 = arith.constant 0 : i32
    return %arg0, %c0_i32, %c0_i32_0 : i32, i32, i32
  }
  func.func @transform_1(%arg0: i32) -> (i32, i32, i32) {
    %c0_i32 = arith.constant 0 : i32
    %c0_i32_0 = arith.constant 0 : i32
    %c0_i32_1 = arith.constant 0 : i32
    %c0_i32_2 = arith.constant 0 : i32
    return %c0_i32, %c0_i32_0, %c0_i32_1 : i32, i32, i32
  }
  func.func @transform_2(%arg0: i32) -> (i32, i32, i32) {
    %c0_i32 = arith.constant 0 : i32
    %c0_i32_0 = arith.constant 0 : i32
    %c0_i32_1 = arith.constant 0 : i32
    %c0_i32_2 = arith.constant 0 : i32
    return %c0_i32, %c0_i32_0, %c0_i32_1 : i32, i32, i32
  }
  func.func @transform_3(%arg0: i32) -> (i32, i32, i32) {
    %c0_i32 = arith.constant 0 : i32
    %c0_i32_0 = arith.constant 0 : i32
    %c0_i32_1 = arith.constant 0 : i32
    %c0_i32_2 = arith.constant 0 : i32
    return %c0_i32, %c0_i32_0, %c0_i32_1 : i32, i32, i32
  }
  func.func @transform_4(%arg0: i32) -> (i32, i32, i32) {
    %c0_i32 = arith.constant 0 : i32
    %c0_i32_0 = arith.constant 0 : i32
    %c0_i32_1 = arith.constant 0 : i32
    %c0_i32_2 = arith.constant 0 : i32
    return %c0_i32, %c0_i32_0, %c0_i32_1 : i32, i32, i32
  }
  func.func @transform_5(%arg0: i32) -> (i32, i32) {
    %c0_i32 = arith.constant 0 : i32
    %c0_i32_0 = arith.constant 0 : i32
    %c0_i32_1 = arith.constant 0 : i32
    return %c0_i32, %c0_i32_0 : i32, i32
  }
  func.func @transform_6(%arg0: i32) -> (i32, i32, i32) {
    %c0_i32 = arith.constant 0 : i32
    %c0_i32_0 = arith.constant 0 : i32
    %c0_i32_1 = arith.constant 0 : i32
    %c0_i32_2 = arith.constant 0 : i32
    return %c0_i32, %c0_i32_0, %c0_i32_1 : i32, i32, i32
  }
  func.func @transform_7(%arg0: i32) -> (i32, i32) {
    %c0_i32 = arith.constant 0 : i32
    %c0_i32_0 = arith.constant 0 : i32
    %c0_i32_1 = arith.constant 0 : i32
    return %c0_i32, %c0_i32_0 : i32, i32
  }
  func.func @transform_8(%arg0: i32) -> (i32, i32) {
    %c0_i32 = arith.constant 0 : i32
    %c0_i32_0 = arith.constant 0 : i32
    %c0_i32_1 = arith.constant 0 : i32
    return %c0_i32, %c0_i32_0 : i32, i32
  }
  func.func @transform_9(%arg0: i32) -> (i32, i32) {
    %c0_i32 = arith.constant 0 : i32
    %c0_i32_0 = arith.constant 0 : i32
    %c0_i32_1 = arith.constant 0 : i32
    return %c0_i32, %c0_i32_0 : i32, i32
  }
  func.func @transform_10(%arg0: i32) -> (i32, i32, i32) {
    %c0_i32 = arith.constant 0 : i32
    %c0_i32_0 = arith.constant 0 : i32
    %c0_i32_1 = arith.constant 0 : i32
    return %arg0, %c0_i32, %c0_i32_0 : i32, i32, i32
  }
}

</mosaic_0001>

<bundles_post_ra>
// kernel: forward.1
= control target key start
LH: loop header
LB: loop body
LE: loop exit
PB: predicated region body
PF: predicated region fallthrough
CT: control target
= control target key end

     0   :  { %15 = vsyncpa [#allocation4], 0  ;;  %s9844_s0 = inlined_call_operand.vmem [shape: f32[2,4,324], index: 0, kind: input, shape index: {}]   ;;  %s9845_s1 = inlined_call_operand.vmem [shape: f32[9,8,4], index: 1, kind: input, shape index: {}]   ;;  %s9846_s2 = inlined_call_operand.vmem [shape: f32[3,8,1], index: 2, kind: input, shape index: {}]   ;;  %s9847_s3 = inlined_call_operand.vmem [shape: f32[9,16,8], index: 3, kind: input, shape index: {}]   ;;  %s9848_s4 = inlined_call_operand.vmem [shape: f32[3,16,1], index: 4, kind: input, shape index: {}]   ;;  %s9849_s5 = inlined_call_operand.vmem [shape: f32[1,267], index: 5, kind: input, shape index: {}]   ;;  %s9850_s6 = inlined_call_operand.vmem [shape: f32[16,248,128], index: 6, kind: input, shape index: {}]   ;;  %s9851_s7 = inlined_call_operand.vmem [shape: f32[1,128], index: 7, kind: input, shape index: {}]   ;;  %s9852_s8 = inlined_call_operand.vmem [shape: f32[128,10], index: 8, kind: input, shape index: {}]   ;;  %s9853_s9 = inlined_call_operand.vmem [shape: f32[1,10], index: 9, kind: input, shape index: {}]   ;;  %s9854_s10 = inlined_call_operand.hbm [shape: f32[2,1,10], index: 10, kind: output, shape index: {}]  }
   0x1   :  { %17 = vsyncpa [#allocation4 + $0x1], 0  ;;  %s7437_s13 = smov 0   ;;  %s7439_s14 = smov 0  }
   0x2   :  { %s7441_s15 = smov 0   ;;  %s7443_s16 = smov 0  }
   0x3 LB: > { %s7458_s17 = sadd.s32 4294967295, %s7366_s16   ;;  %s5593_s18 = sadd.s32 4294967294, %s7366_s16   ;;  %s7366_s16 = sphi %s7443_s16, %s9875_s16   ;;  %s7362_s15 = sphi %s7441_s15, %s9874_s15   ;;  %s7358_s14 = sphi %s7439_s14, %s9873_s14   ;;  %s7354_s13 = sphi %s7437_s13, %s9872_s13  }
   0x4   : > { %s7462_s19 = sadd.s32 1, %s7366_s16   ;;  %s245_s20 = sadd.s32 1, %s7362_s15 }
   0x5   : > { %s242_s21 = ssub.s32 %s7366_s16, %s7462_s19  ;;  %p255_p0 = scmp.ne.s32.totalorder %s7362_s15, %s7358_s14 }
   0x6   : > { %p243_p1 = scmp.eq.s32.totalorder %s242_s21, 0  ;;  %p256_p2 = scmp.eq.s32.totalorder %s7458_s17, 1 }
   0x7   : > { %p261_p3 = scmp.ne.s32.totalorder %s7358_s14, %s7354_s13  ;;  %p262_p4 = scmp.eq.s32.totalorder %s5593_s18, 1 }
   0x8   : > { %s7473_s22 = scalar_select %p243_p1, %s7362_s15, %s245_s20  }
   0x9   : > { %p7475_p5 = por %p256_p2, %p255_p0  ;;  %p7479_p6 = por %p262_p4, %p261_p3 }
   0xa   : > { %p5596_p7 = scmp.ge.s32.totalorder %s7366_s16, 1  ;;  %p315_p8 = scmp.lt.s32.totalorder %s7366_s16, 3 }
   0xc   : > { %p316_p9 = pnand %p5596_p7, %p315_p8 }
   0xd   : > { %p352_p10 = scmp.lt.s32.totalorder (!%p316_p9), %s7458_s17, 1  ;;  %v7368_v0 = vmov (!%p316_p9), 0.0   ;;  %vm7369_vm0 = vmmov (!%p316_p9), 0   ;;  %s9863_s30 = smov (!%p316_p9), 127   ;;  %v1824_v4 = vld [vmem:[%s9846_s2] sm:$0xff] (!%p316_p9)  ;;  %v5654_v5 = vld [vmem:[%s9846_s2 + $0x8] sm:$0xff] (!%p316_p9) }
   0xe   : > { %319 = sbr.rel (%p316_p9) target bundleno = 2214 (0x8a6), region = 60  ;;  %449 = vmatprep.mubr.f32.mxu0 (!%p316_p9), %v7368_v0  ;;  %1913 = vst [vmem:[#allocation2] sm:$0xff] (!%p316_p9), %v7368_v0  ;;  %6300 = vmatprep.subr.mxu1 (!%p316_p9), %v7368_v0  ;;  %s7371_s11 = smov (!%p316_p9), 126   ;;  %v7378_v6 = vmov (!%p316_p9), 0   ;;  %v5655_v7 = vld [vmem:[%s9846_s2 + $0x10] sm:$0xff] (!%p316_p9)  ;;  %vm371_vm1 = vcmask (!%p316_p9), 1039360  }
   0xf   : > { %6302 = vmatprep.mubr.msk.f32.mxu1 (!%p316_p9), %vm7369_vm0, %v7368_v0  ;;  %s7372_s12 = smov (!%p316_p9), 110   ;;  %s9861_s18 = smov (!%p316_p9), 109   ;;  %7281 = vset.pattern.permute.xlu0 (!%p316_p9), %v7378_v6  ;;  %vm378_vm2 = vcmask (!%p316_p9), 1043456   ;;  %v5598_v13 = vld [vmem:[%s9845_s1 + $0x8] sm:$0xff] (!%p316_p9)  ;;  %vm374_vm3 = vcmask (!%p316_p9), 31744   ;;  %vm684_vm4 = vcmask (!%p316_p9), 1031168  }
  0x10   : > { %s9859_s20 = smov (!%p316_p9), 108   ;;  %s9855_s21 = smov (!%p316_p9), 92   ;;  %7282 = vset.pattern.permute.xlu1 (!%p316_p9), %v7378_v6  ;;  %v359_v19 = vld [vmem:[%s9845_s1] sm:$0xff] (!%p316_p9)  ;;  %vm848_vm5 = vcmask (!%p316_p9), 900096   ;;  %v5609_v26 = vld [vmem:[%s9845_s1 + $0x10] sm:$0xff] (!%p316_p9)  ;;  %vm1012_vm6 = vcmask (!%p316_p9), 891904  }
  0x11   : > { %v5615_v33 = vld [vmem:[%s9845_s1 + $0x18] sm:$0xff] (!%p316_p9)  ;;  %vm1176_vm7 = vcmask (!%p316_p9), 883712   ;;  %v5621_v41 = vld [vmem:[%s9845_s1 + $0x20] sm:$0xff] (!%p316_p9)  ;;  %vm1340_vm8 = vcmask (!%p316_p9), 752640   ;;  %v5627_v47 = vld [vmem:[%s9845_s1 + $0x28] sm:$0xff] (!%p316_p9)  ;;  %vm1504_vm9 = vcmask (!%p316_p9), 744448  }
  0x12   : > { %v5639_v37 = vld [vmem:[%s9845_s1 + $0x38] sm:$0xff] (!%p316_p9)  ;;  %v5645_v46 = vld [vmem:[%s9845_s1 + $0x40] sm:$0xff] (!%p316_p9)  ;;  %v5633_v50 = vld [vmem:[%s9845_s1 + $0x30] sm:$0xff] (!%p316_p9)  ;;  %vm1668_vm10 = vcmask (!%p316_p9), 736256   ;;  %vm1915_vm14 = vcmask (!%p316_p9), 400384   ;;  %vm1952_vm15 = vcmask (!%p316_p9), 1047704  }
  0x13   : > { %1916 = vst.msk [vmem:[#allocation2 + $0x10] sm:$0xff] (!%p316_p9), %vm1915_vm14, %v7368_v0  ;;  %s9870_s28 = smov (!%p316_p9), 127  }
  0x15   : > { %s353_s25 = scalar_select %p352_p10, %s7458_s17, 1 }
  0x17   : > { %s7228_s26 = smul.u32 12, %s353_s25  ;;  %s9857_s25 = smov 91  }
  0x19   : > { %s356_s29 = scalar_lea.vmem %s9844_s0, %s7228_s26  ;;  %s7377_s26 = smov 90  }
  0x1a   : > { %v7495_v1 = vld [vmem:[%s356_s29] sm:$0xff]  ;;  %v7502_v3 = vld [vmem:[%s356_s29 + $0x8] sm:$0xf]  ;;  %s9867_s29 = smov 108  }
  0x1b   : > { %365 = vrot.lane.b32.xlu1 %v7495_v1, %s9863_s30  ;;  %v364_v2 = vcombine.high %v7495_v1, %v7495_v1 }
  0x1d   : > { %367 = vrot.lane.b32.xlu0 %v364_v2, %s9863_s30 }
  0x1f   : > { %680 = vrot.lane.b32.xlu1 %v364_v2, %s7371_s11 }
  0x21   : > { %369 = vrot.lane.b32.xlu0 %v7502_v3, %s9863_s30 }
  0x23   : > { %678 = vrot.lane.b32.xlu1 %v7495_v1, %s7371_s11 }
  0x25   : > { %682 = vrot.lane.b32.xlu0 %v7502_v3, %s7371_s11 }
  0x27   : > { %846 = vrot.lane.b32.xlu1 %v7502_v3, %s7372_s12 }
  0x29   : > { %844 = vrot.lane.b32.xlu0 %v364_v2, %s7372_s12 }
  0x2b   : > { %1008 = vrot.lane.b32.xlu1 %v364_v2, %s9861_s18 }
  0x2d   : > { %842 = vrot.lane.b32.xlu0 %v7495_v1, %s7372_s12 }
  0x2f   : > { %1006 = vrot.lane.b32.xlu1 %v7495_v1, %s9861_s18 }
  0x31   : > { %1010 = vrot.lane.b32.xlu0 %v7502_v3, %s9861_s18 }
  0x33   : > { %1174 = vrot.lane.b32.xlu1 %v7502_v3, %s9859_s20 }
  0x35   : > { %1172 = vrot.lane.b32.xlu0 %v364_v2, %s9859_s20 }
  0x37   : > { %1336 = vrot.lane.b32.xlu1 %v364_v2, %s9855_s21 }
  0x39   : > { %1170 = vrot.lane.b32.xlu0 %v7495_v1, %s9859_s20  ;;  %s7379_s20 = smov 19  }
  0x3b   : > { %1334 = vrot.lane.b32.xlu1 %v7495_v1, %s9855_s21 }
  0x3d   : > { %1338 = vrot.lane.b32.xlu0 %v7502_v3, %s9855_s21  ;;  %s9868_s21 = smov 92  }
  0x3f   : > { %1502 = vrot.lane.b32.xlu1 %v7502_v3, %s9857_s25 }
  0x41   : > { %1500 = vrot.lane.b32.xlu0 %v364_v2, %s9857_s25 }
  0x43   : > { %1664 = vrot.lane.b32.xlu1 %v364_v2, %s7377_s26 }
  0x45   : > { %1498 = vrot.lane.b32.xlu0 %v7495_v1, %s9857_s25 }
  0x47   : > { %1662 = vrot.lane.b32.xlu1 %v7495_v1, %s7377_s26 }
  0x49   : > { %1666 = vrot.lane.b32.xlu0 %v7502_v3, %s7377_s26 }
  0x4b   : > { %1852 = vperm.xlu1 %7282, %v5654_v5  }
  0x4d   : > { %1827 = vperm.xlu0 %7281, %v1824_v4  }
  0x4f   : > { %1862 = vperm.xlu1 %7282, %v5655_v7  }
  0x8d   : > { %v366_v8 = vpop.permute.xlu1 %365 }
  0x8f   : > { %v368_v9 = vpop.permute.xlu0 %367 }
  0x90   : > { %v372_v14 = vsel %vm371_vm1, %v366_v8, %v368_v9 }
  0x91   : > { %v681_v10 = vpop.permute.xlu1 %680 }
  0x93   : > { %v370_v11 = vpop.permute.xlu0 %369 }
  0x94   : > { %v373_v12 = vsel %vm371_vm1, %v368_v9, %v370_v11 }
  0x95   : > { %5599 = vmatprep.subr.msk.mxu0 %vm378_vm2, %v373_v12  ;;  %v679_v15 = vpop.permute.xlu1 %678 }
  0x96   : > { %5600 = vmatpush1.msk.msra.mxu0 %vm378_vm2, %v372_v14  ;;  %v685_v23 = vsel %vm684_vm4, %v679_v15, %v681_v10 }
  0x97   : > { %5601 = vmatmul.mubr.msk.f32.vlgmr.msra.gmra.mrb[0].mxu0 %vm374_vm3, %v5598_v13  ;;  %6265 = vmatprep.subr.mxu0 %v7368_v0  ;;  %v683_v16 = vpop.permute.xlu0 %682 }
  0x98   : > { %6266 = vmatpush3.msk.msra.mxu0 %vm378_vm2, %v370_v11  ;;  %6267 = vmatprep.mubr.msk.f32.mxu0 %vm7369_vm0, %v7368_v0  ;;  %v686_v21 = vsel %vm684_vm4, %v681_v10, %v683_v16 }
  0x99   : > { %5604 = vmatprep.subr.msk.mxu0 %vm378_vm2, %v364_v2  ;;  %v847_v17 = vpop.permute.xlu1 %846 }
  0x9b   : > { %6268 = vmatmul.mubr.msk.f32.vlgmr.msra.gmra.mrb[2].mxu0 %vm374_vm3, %v5598_v13  ;;  %v845_v18 = vpop.permute.xlu0 %844 }
  0x9c   : > { %5605 = vmatpush1.msk.msra.mxu0 %vm378_vm2, %v7495_v1  ;;  %599 = vmatprep.mubr.f32.mxu0 %v7368_v0  ;;  %v850_v28 = vsel %vm848_vm5, %v845_v18, %v847_v17 }
  0x9d   : > { %6270 = vmatprep.subr.mxu0 %v7368_v0  ;;  %v1009_v20 = vpop.permute.xlu1 %1008 }
  0x9f   : > { %5606 = vmatmul.mubr.msk.f32.vlgmr.msra.gmra.mrb[0].mxu0 %vm374_vm3, %v359_v19  ;;  %v843_v22 = vpop.permute.xlu0 %842 }
  0xa0   : > { %6271 = vmatpush3.msk.msra.mxu0 %vm378_vm2, %v7502_v3  ;;  %6272 = vmatprep.mubr.msk.f32.mxu0 %vm7369_vm0, %v7368_v0  ;;  %v849_v30 = vsel %vm848_vm5, %v843_v22, %v845_v18 }
  0xa1   : > { %5610 = vmatprep.subr.msk.mxu0 %vm378_vm2, %v686_v21  ;;  %v1007_v24 = vpop.permute.xlu1 %1006 }
  0xa2   : > { %v1013_v38 = vsel %vm1012_vm6, %v1007_v24, %v1009_v20 }
  0xa3   : > { %6273 = vmatmul.mubr.msk.f32.vlgmr.msra.gmra.mrb[4].mxu0 %vm374_vm3, %v359_v19  ;;  %v1011_v25 = vpop.permute.xlu0 %1010 }
  0xa4   : > { %5611 = vmatpush1.msk.msra.mxu0 %vm378_vm2, %v685_v23  ;;  %760 = vmatprep.mubr.f32.mxu0 %v7368_v0  ;;  %v1014_v35 = vsel %vm1012_vm6, %v1009_v20, %v1011_v25 }
  0xa5   : > { %6275 = vmatprep.subr.mxu0 %v7368_v0  ;;  %v1175_v27 = vpop.permute.xlu1 %1174 }
  0xa7   : > { %5612 = vmatmul.mubr.msk.f32.vlgmr.msra.gmra.mrb[0].mxu0 %vm374_vm3, %v5609_v26  ;;  %v1173_v29 = vpop.permute.xlu0 %1172 }
  0xa8   : > { %6276 = vmatpush3.msk.msra.mxu0 %vm378_vm2, %v683_v16  ;;  %6277 = vmatprep.mubr.msk.f32.mxu0 %vm7369_vm0, %v7368_v0  ;;  %v1178_v42 = vsel %vm1176_vm7, %v1173_v29, %v1175_v27 }
  0xa9   : > { %5616 = vmatprep.subr.msk.mxu0 %vm378_vm2, %v850_v28  ;;  %v1337_v31 = vpop.permute.xlu1 %1336 }
  0xab   : > { %6278 = vmatmul.mubr.msk.f32.vlgmr.msra.gmra.mrb[6].mxu0 %vm374_vm3, %v5609_v26  ;;  %v1171_v32 = vpop.permute.xlu0 %1170 }
  0xac   : > { %5617 = vmatpush1.msk.msra.mxu0 %vm378_vm2, %v849_v30  ;;  %924 = vmatprep.mubr.f32.mxu0 %v7368_v0  ;;  %v1177_v44 = vsel %vm1176_vm7, %v1171_v32, %v1173_v29 }
  0xad   : > { %6280 = vmatprep.subr.mxu0 %v7368_v0  ;;  %v1335_v34 = vpop.permute.xlu1 %1334 }
  0xae   : > { %v1341_v49 = vsel %vm1340_vm8, %v1335_v34, %v1337_v31 }
  0xaf   : > { %5618 = vmatmul.mubr.msk.f32.vlgmr.msra.gmra.mrb[0].mxu0 %vm374_vm3, %v5615_v33  ;;  %v1339_v36 = vpop.permute.xlu0 %1338 }
  0xb0   : > { %6281 = vmatpush3.msk.msra.mxu0 %vm378_vm2, %v847_v17  ;;  %6282 = vmatprep.mubr.msk.f32.mxu0 %vm7369_vm0, %v7368_v0  ;;  %v1342_v48 = vsel %vm1340_vm8, %v1337_v31, %v1339_v36 }
  0xb1   : > { %5622 = vmatprep.subr.msk.mxu0 %vm378_vm2, %v1014_v35  ;;  %v1503_v39 = vpop.permute.xlu1 %1502 }
  0xb2   : > { %6301 = vmatpush3.msk.msra.mxu1 %vm378_vm2, %v1503_v39 }
  0xb3   : > { %6283 = vmatmul.mubr.msk.f32.vlgmr.msra.gmra.mrb[8].mxu0 %vm374_vm3, %v5615_v33  ;;  %v1501_v40 = vpop.permute.xlu0 %1500  ;;  %6303 = vmatmul.mubr.msk.f32.vlgmr.msra.gmra.mrb[0].mxu1 %vm374_vm3, %v5639_v37 }
  0xb4   : > { %5623 = vmatpush1.msk.msra.mxu0 %vm378_vm2, %v1013_v38  ;;  %1088 = vmatprep.mubr.f32.mxu0 %v7368_v0  ;;  %v1506_v52 = vsel %vm1504_vm9, %v1501_v40, %v1503_v39 }
  0xb5   : > { %6285 = vmatprep.subr.mxu0 %v7368_v0  ;;  %6305 = vmatprep.subr.mxu1 %v7368_v0  ;;  %v1665_v51 = vpop.permute.xlu1 %1664 }
  0xb6   : > { %6307 = vmatprep.mubr.msk.f32.mxu1 %vm7369_vm0, %v7368_v0 }
  0xb7   : > { %5624 = vmatmul.mubr.msk.f32.vlgmr.msra.gmra.mrb[0].mxu0 %vm374_vm3, %v5621_v41  ;;  %v1499_v43 = vpop.permute.xlu0 %1498 }
  0xb8   : > { %6286 = vmatpush3.msk.msra.mxu0 %vm378_vm2, %v1011_v25  ;;  %6287 = vmatprep.mubr.msk.f32.mxu0 %vm7369_vm0, %v7368_v0  ;;  %v1505_v55 = vsel %vm1504_vm9, %v1499_v43, %v1501_v40 }
  0xb9   : > { %5628 = vmatprep.subr.msk.mxu0 %vm378_vm2, %v1178_v42  ;;  %v1663_v53 = vpop.permute.xlu1 %1662 }
  0xba   : > { %v1669_v56 = vsel %vm1668_vm10, %v1663_v53, %v1665_v51 }
  0xbb   : > { %6288 = vmatmul.mubr.msk.f32.vlgmr.msra.gmra.mrb[10].mxu0 %vm374_vm3, %v5621_v41  ;;  %v1667_v45 = vpop.permute.xlu0 %1666 }
  0xbc   : > { %5629 = vmatpush1.msk.msra.mxu0 %vm378_vm2, %v1177_v44  ;;  %1252 = vmatprep.mubr.f32.mxu0 %v7368_v0  ;;  %v1670_v54 = vsel %vm1668_vm10, %v1665_v51, %v1667_v45 }
  0xbd   : > { %6290 = vmatprep.subr.mxu0 %v7368_v0  ;;  %6306 = vmatpush3.msk.msra.mxu1 %vm378_vm2, %v1667_v45 }
  0xbe   : > { %6308 = vmatmul.mubr.msk.f32.vlgmr.msra.gmra.mrb[2].mxu1 %vm374_vm3, %v5645_v46 }
  0xbf   : > { %5630 = vmatmul.mubr.msk.f32.vlgmr.msra.gmra.mrb[0].mxu0 %vm374_vm3, %v5627_v47 }
  0xc0   : > { %6291 = vmatpush3.msk.msra.mxu0 %vm378_vm2, %v1175_v27  ;;  %6292 = vmatprep.mubr.msk.f32.mxu0 %vm7369_vm0, %v7368_v0 }
  0xc1   : > { %5634 = vmatprep.subr.msk.mxu0 %vm378_vm2, %v1342_v48  ;;  %v1919_v48 = vlaneseq }
  0xc3   : > { %6293 = vmatmul.mubr.msk.f32.vlgmr.msra.gmra.mrb[12].mxu0 %vm374_vm3, %v5627_v47  ;;  %v1920_v51 = vshrl.u32 %v1919_v48, 7 }
  0xc4   : > { %5635 = vmatpush1.msk.msra.mxu0 %vm378_vm2, %v1341_v49  ;;  %1416 = vmatprep.mubr.f32.mxu0 %v7368_v0 }
  0xc5   : > { %6295 = vmatprep.subr.mxu0 %v7368_v0 }
  0xc7   : > { %5636 = vmatmul.mubr.msk.f32.vlgmr.msra.gmra.mrb[0].mxu0 %vm374_vm3, %v5633_v50 }
  0xc8   : > { %6296 = vmatpush3.msk.msra.mxu0 %vm378_vm2, %v1339_v36  ;;  %6297 = vmatprep.mubr.msk.f32.mxu0 %vm7369_vm0, %v7368_v0 }
  0xc9   : > { %5640 = vmatprep.subr.msk.mxu0 %vm378_vm2, %v1506_v52 }
  0xca   : > { %v1853_v29 = vpop.permute.xlu1 %1852 }
  0xcb   : > { %6298 = vmatmul.mubr.msk.f32.vlgmr.msra.gmra.mrb[14].mxu0 %vm374_vm3, %v5633_v50 }
  0xcc   : > { %5641 = vmatpush1.msk.msra.mxu0 %vm378_vm2, %v1505_v55  ;;  %1580 = vmatprep.mubr.f32.mxu0 %v7368_v0  ;;  %v1828_v19 = vpop.permute.xlu0 %1827  ;;  %v1921_v55 = vsub.s32 0, %v1920_v51 }
  0xcd   : > { %5646 = vmatprep.subr.msk.mxu0 %vm378_vm2, %v1670_v54 }
  0xce   : > { %v1863_v34 = vpop.permute.xlu1 %1862 }
  0xcf   : > { %5642 = vmatmul.mubr.msk.f32.vlgmr.msra.gmra.mrb[0].mxu0 %vm374_vm3, %v5639_v37 }
  0xd0   : > { %5647 = vmatpush1.msk.msra.mxu0 %vm378_vm2, %v1669_v56  ;;  %1744 = vmatprep.mubr.f32.mxu0 %v7368_v0  ;;  %vm1946_vm2 = vcmask 154624  }
  0xd7   : > { %5648 = vmatmul.mubr.msk.f32.vlgmr.msra.gmra.mrb[0].mxu0 %vm374_vm3, %v5645_v46  ;;  %vm1979_vm3 = vcmask 64512  }
  0xd8   : > { %2050 = vmatprep.mubr.f32.mxu0 %v7368_v0 }
 0x16e   : > { %v522_v57 = vpop.f32.mrb[2].mxu0 }
 0x16f   : > { %v6269_v58 = vpop.f32.mrb[3].mxu0 }
 0x176   : > { %v672_v59 = vpop.f32.mrb[4].mxu0 }
 0x177   : > { %v673_v60 = vadd.f32 %v672_v59, %v522_v57  ;;  %v6274_v61 = vpop.f32.mrb[5].mxu0  ;;  %v1917_v57 = vld [vmem:[%s9849_s5] sm:$0x7] }
 0x17e   : > { %v833_v62 = vpop.f32.mrb[6].mxu0 }
 0x17f   : > { %v839_v63 = vadd.f32 %v833_v62, %v673_v60  ;;  %v6279_v1 = vpop.f32.mrb[7].mxu0  ;;  %v1925_v62 = vsub.s32 1, %v1920_v51 }
 0x186   : > { %v997_v2 = vpop.f32.mrb[8].mxu0  ;;  %v1653_v3 = vpop.f32.mrb[0].mxu1 }
 0x187   : > { %v1003_v4 = vadd.f32 %v997_v2, %v839_v63  ;;  %v6284_v5 = vpop.f32.mrb[9].mxu0  ;;  %v6304_v6 = vpop.f32.mrb[1].mxu1 }
 0x188   : > { %v1922_v5 = vrot.slane %v1917_v57, %v1921_v55 }
 0x18e   : > { %v1161_v7 = vpop.f32.mrb[10].mxu0 }
 0x18f   : > { %v1167_v8 = vadd.f32 %v1161_v7, %v1003_v4  ;;  %v6289_v9 = vpop.f32.mrb[11].mxu0  ;;  %v1929_v4 = vsub.s32 2, %v1920_v51 }
 0x191   : > { %v1817_v10 = vpop.f32.mrb[2].mxu1 }
 0x192   : > { %v6309_v11 = vpop.f32.mrb[3].mxu1 }
 0x193   : > { %v1926_v11 = vrot.slane %v1917_v57, %v1925_v62 }
 0x196   : > { %v1325_v12 = vpop.f32.mrb[12].mxu0 }
 0x197   : > { %v1331_v13 = vadd.f32 %v1325_v12, %v1167_v8  ;;  %v6294_v14 = vpop.f32.mrb[13].mxu0 }
 0x19e   : > { %v1489_v15 = vpop.f32.mrb[14].mxu0 }
 0x19f   : > { %v1495_v16 = vadd.f32 %v1489_v15, %v1331_v13  ;;  %v6299_v17 = vpop.f32.mrb[15].mxu0  ;;  %v1930_v13 = vrot.slane %v1917_v57, %v1929_v4  ;;  %v5684_v4 = vld [vmem:[%s9847_s3 + $0x50] sm:$0xff] }
 0x1a1   : > { %v1659_v18 = vadd.f32 %v1653_v3, %v1495_v16 }
 0x1a3   : > { %v1823_v20 = vadd.f32 %v1817_v10, %v1659_v18 }
 0x1a5   : > { %v1832_v21 = vadd.f32 %v1828_v19, %v1823_v20 }
 0x1a7   : > { %v1840_v22 = vmul.f32 1.442695, %v1832_v21  ;;  %vm1835_vm11 = vcmp.gt.f32.partialorder %v1832_v21, 0.0 }
 0x1a9   : > { %7284 = vpow2.f32 %v1840_v22 }
 0x1aa   : > { %v1746_v23 = vpop.f32.mrb[0].mxu0 }
 0x1ab   : > { %v1830_v24 = vadd.f32 %v1828_v19, %v1746_v23  ;;  %v1748_v25 = vpop.f32.mrb[1].mxu0 }
 0x1ac   : > { %v1831_v26 = vadd.f32 %v1828_v19, %v1748_v25 }
 0x1ad   : > { %v1836_v27 = vmul.f32 1.442695, %v1830_v24  ;;  %vm1833_vm12 = vcmp.gt.f32.partialorder %v1830_v24, 0.0 }
 0x1ae   : > { %v1838_v28 = vmul.f32 1.442695, %v1831_v26  ;;  %vm1834_vm13 = vcmp.gt.f32.partialorder %v1831_v26, 0.0 }
 0x1af   : > { %7286 = vpow2.f32 %v1836_v27  ;;  %v3542_v27 = vld [vmem:[%s9848_s4] sm:$0xff] }
 0x1b0   : > { %7288 = vpow2.f32 %v1838_v28  ;;  %v5716_v28 = vld [vmem:[%s9848_s4 + $0x20] sm:$0xff] }
 0x1b3   : > { %v7285_v30 = vpop.eup %7284 }
 0x1b4   : > { %v5653_v31 = vadd.f32 -1.0, %v7285_v30  ;;  %v5715_v30 = vld [vmem:[%s9848_s4 + $0x18] sm:$0xff] }
 0x1b6   : > { %v1847_v32 = vsel %vm1835_vm11, %v1832_v21, %v5653_v31  ;;  %v5656_v21 = vld [vmem:[%s9847_s3 + $0x10] sm:$0xff]  ;;  %vm1955_vm11 = vcmask 244736   ;;  %v3543_v31 = vld [vmem:[%s9848_s4 + $0x8] sm:$0xff] }
 0x1b7   : > { %v1857_v33 = vmul.f32 %v1853_v29, %v1847_v32  ;;  %6312 = vmatprep.mubr.msk.f32.mxu1 %vm1979_vm3, %v5656_v21  ;;  %v5717_v32 = vld [vmem:[%s9848_s4 + $0x28] sm:$0xff] }
 0x1b9   : > { %v7287_v35 = vpop.eup %7286  ;;  %v1867_v36 = vadd.f32 %v1863_v34, %v1857_v33 }
 0x1ba   : > { %v7289_v37 = vpop.eup %7288  ;;  %v5651_v38 = vadd.f32 -1.0, %v7287_v35 }
 0x1bb   : > { %v5652_v39 = vadd.f32 -1.0, %v7289_v37  ;;  %1889 = vrot.lane.b32.xlu1 %v1867_v36, %s7372_s12  ;;  %1875 = vrot.lane.b32.xlu0 %v1867_v36, %s9863_s30 }
 0x1bc   : > { %v1845_v40 = vsel %vm1833_vm12, %v1830_v24, %v5651_v38 }
 0x1bd   : > { %v1846_v41 = vsel %vm1834_vm13, %v1831_v26, %v5652_v39  ;;  %v1855_v42 = vmul.f32 %v1853_v29, %v1845_v40  ;;  %vm3736_vm13 = vcmask 982016  }
 0x1be   : > { %v1856_v43 = vmul.f32 %v1853_v29, %v1846_v41  ;;  %v5714_v29 = vld [vmem:[%s9848_s4 + $0x10] sm:$0xff] }
 0x1bf   : > { %v1865_v44 = vadd.f32 %v1863_v34, %v1855_v42 }
 0x1c0   : > { %v1866_v45 = vadd.f32 %v1863_v34, %v1856_v43  ;;  %v1960_v43 = vld [vmem:[%s9847_s3] sm:$0xff] }
 0x1c1   : > { %1885 = vrot.lane.b32.xlu1 %v1865_v44, %s7372_s12  ;;  %1871 = vrot.lane.b32.xlu0 %v1865_v44, %s9863_s30 }
 0x1c5   : > { %1873 = vrot.lane.b32.xlu1 %v1866_v45, %s9863_s30  ;;  %1899 = vrot.lane.b32.xlu0 %v1865_v44, %s9861_s18 }
 0x1c9   : > { %1901 = vrot.lane.b32.xlu1 %v1866_v45, %s9861_s18  ;;  %1887 = vrot.lane.b32.xlu0 %v1866_v45, %s7372_s12 }
 0x1cd   : > { %1903 = vrot.lane.b32.xlu0 %v1867_v36, %s9861_s18 }
 0x22d   : > { %v1890_v46 = vpop.permute.xlu1 %1889  ;;  %v1876_v47 = vpop.permute.xlu0 %1875 }
 0x22e   : > { %v1884_v58 = vmax.f32 %v1867_v36, %v1876_v47  ;;  %v5657_v36 = vld [vmem:[%s9847_s3 + $0x18] sm:$0xff] }
 0x230   : > { %v1898_v9 = vmax.f32 %v1884_v58, %v1890_v46 }
 0x233   : > { %v1886_v49 = vpop.permute.xlu1 %1885  ;;  %v1872_v50 = vpop.permute.xlu0 %1871 }
 0x237   : > { %v1874_v52 = vpop.permute.xlu1 %1873  ;;  %v1900_v53 = vpop.permute.xlu0 %1899 }
 0x238   : > { %v1877_v54 = vsel %vm371_vm1, %v1872_v50, %v1874_v52  ;;  %v1878_v56 = vsel %vm371_vm1, %v1874_v52, %v1876_v47 }
 0x239   : > { %v1882_v59 = vmax.f32 %v1865_v44, %v1877_v54  ;;  %v1883_v2 = vmax.f32 %v1866_v45, %v1878_v56  ;;  %v1961_v45 = vld [vmem:[%s9847_s3 + $0x8] sm:$0xff]  ;;  %v5672_v54 = vld [vmem:[%s9847_s3 + $0x30] sm:$0xff] }
 0x23b   : > { %v1902_v60 = vpop.permute.xlu1 %1901  ;;  %v1888_v61 = vpop.permute.xlu0 %1887 }
 0x23c   : > { %v1891_v63 = vsel %vm848_vm5, %v1886_v49, %v1888_v61  ;;  %v1892_v1 = vsel %vm848_vm5, %v1888_v61, %v1890_v46  ;;  %v1905_v6 = vsel %vm1012_vm6, %v1900_v53, %v1902_v60  ;;  %v5666_v46 = vld [vmem:[%s9847_s3 + $0x20] sm:$0xff]  ;;  %v5667_v53 = vld [vmem:[%s9847_s3 + $0x28] sm:$0xff] }
 0x23d   : > { %v1896_v3 = vmax.f32 %v1882_v59, %v1891_v63  ;;  %v1897_v7 = vmax.f32 %v1883_v2, %v1892_v1  ;;  %v5673_v59 = vld [vmem:[%s9847_s3 + $0x38] sm:$0xff]  ;;  %v5678_v61 = vld [vmem:[%s9847_s3 + $0x40] sm:$0xff] }
 0x23f   : > { %v1910_v8 = vmax.f32 %v1896_v3, %v1905_v6  ;;  %v1904_v10 = vpop.permute.xlu0 %1903  ;;  %v5679_v3 = vld [vmem:[%s9847_s3 + $0x48] sm:$0xff] }
 0x240   : > { %v1906_v12 = vsel %vm1012_vm6, %v1902_v60, %v1904_v10  ;;  %v1912_v15 = vmax.f32 %v1898_v9, %v1904_v10  ;;  %v5685_v10 = vld [vmem:[%s9847_s3 + $0x58] sm:$0xff] }
 0x241   : > { %v1911_v14 = vmax.f32 %v1897_v7, %v1906_v12  ;;  %v1934_v16 = vmul.f32 %v1922_v5, %v1910_v8 }
 0x242   : > { %v1936_v18 = vmul.f32 %v1930_v13, %v1912_v15 }
 0x243   : > { %1940 = vrot.lane.b32.xlu1 %v1934_v16, %s7379_s20  ;;  %v1935_v17 = vmul.f32 %v1926_v11, %v1911_v14  ;;  %v5690_v11 = vld [vmem:[%s9847_s3 + $0x60] sm:$0xff]  ;;  %v5691_v16 = vld [vmem:[%s9847_s3 + $0x68] sm:$0xff] }
 0x245   : > { %1942 = vrot.lane.b32.xlu0 %v1935_v17, %s7379_s20  ;;  %v5696_v17 = vld [vmem:[%s9847_s3 + $0x70] sm:$0xff] }
 0x247   : > { %1944 = vrot.lane.b32.xlu1 %v1936_v18, %s7379_s20  ;;  %s6200_s20 = sshll.u32 %s7458_s17, 4  ;;  %s7381_s17 = smov [#allocation3]  }
 0x2b5   : > { %v1941_v19 = vpop.permute.xlu1 %1940 }
 0x2b6   : > { %1953 = vst.msk [vmem:[#allocation2] sm:$0xff] %vm1952_vm15, %v1941_v19 }
 0x2b7   : > { %v1943_v20 = vpop.permute.xlu0 %1942 }
 0x2b8   : > { %v1947_v22 = vsel %vm1946_vm2, %v1941_v19, %v1943_v20 }
 0x2b9   : > { %v1945_v23 = vpop.permute.xlu1 %1944  ;;  %1970 = vrot.lane.b32.xlu0 %v1947_v22, %s9863_s30 }
 0x2ba   : > { %v1948_v24 = vsel %vm1946_vm2, %v1943_v20, %v1945_v23  ;;  %v5702_v23 = vld [vmem:[%s9847_s3 + $0x80] sm:$0xff] }
 0x2bb   : > { %1956 = vst.msk [vmem:[#allocation2 + $0x10] sm:$0xff] %vm1955_vm11, %v1948_v24 }
 0x2bd   : > { %v1957_v25 = vld [vmem:[#allocation2] sm:$0xff] }
 0x2be   : > { %1968 = vrot.lane.b32.xlu0 %v1957_v25, %s9863_s30 }
 0x2c2   : > { %v1959_v26 = vld [vmem:[#allocation2 + $0x10] sm:$0xff] }
 0x2c3   : > { %1972 = vrot.lane.b32.xlu1 %v1959_v26, %s9863_s30  ;;  %2303 = vrot.lane.b32.xlu0 %v1959_v26, %s7371_s11 }
 0x2c7   : > { %2301 = vrot.lane.b32.xlu1 %v1947_v22, %s7371_s11  ;;  %2479 = vrot.lane.b32.xlu0 %v1947_v22, %s7372_s12 }
 0x2cb   : > { %2299 = vrot.lane.b32.xlu1 %v1957_v25, %s7371_s11  ;;  %2477 = vrot.lane.b32.xlu0 %v1957_v25, %s7372_s12  ;;  %s9869_s11 = smov 91  }
 0x2cf   : > { %2481 = vrot.lane.b32.xlu1 %v1959_v26, %s7372_s12  ;;  %2659 = vrot.lane.b32.xlu0 %v1959_v26, %s9861_s18 }
 0x2d3   : > { %2657 = vrot.lane.b32.xlu1 %v1947_v22, %s9861_s18  ;;  %2835 = vrot.lane.b32.xlu0 %v1947_v22, %s9867_s29 }
 0x2d7   : > { %2655 = vrot.lane.b32.xlu1 %v1957_v25, %s9861_s18  ;;  %2833 = vrot.lane.b32.xlu0 %v1957_v25, %s9867_s29 }
 0x2db   : > { %2837 = vrot.lane.b32.xlu1 %v1959_v26, %s9867_s29  ;;  %3015 = vrot.lane.b32.xlu0 %v1959_v26, %s9868_s21  ;;  %s9802_s29 = scalar_lea.hbm %s9854_s10, %s6200_s20 }
 0x2df   : > { %3013 = vrot.lane.b32.xlu1 %v1947_v22, %s9868_s21  ;;  %3191 = vrot.lane.b32.xlu0 %v1947_v22, %s9869_s11 }
 0x2e3   : > { %3011 = vrot.lane.b32.xlu1 %v1957_v25, %s9868_s21  ;;  %3189 = vrot.lane.b32.xlu0 %v1957_v25, %s9869_s11  ;;  %s9871_s21 = smov 109  }
 0x2e7   : > { %3193 = vrot.lane.b32.xlu1 %v1959_v26, %s9869_s11  ;;  %3371 = vrot.lane.b32.xlu0 %v1959_v26, %s7377_s26  ;;  %s7308_s11 = sshll.u32 %s7381_s17, 4  ;;  %s7309_s11 = int_to_ptr.vmem [resolvable:$false] %s7308_s11 }
 0x2e8   : > { %s7310_s27 = scalar_lea.vmem %s7309_s11, 32 }
 0x2eb   : > { %3369 = vrot.lane.b32.xlu1 %v1947_v22, %s7377_s26  ;;  %3546 = vperm.xlu0 %7281, %v3542_v27   ;;  %v3705_v27 = vld [vmem:[%s9850_s6] sm:$0xff] }
 0x2ef   : > { %3367 = vrot.lane.b32.xlu1 %v1957_v25, %s7377_s26  ;;  %3614 = vperm.xlu0 %7281, %v5716_v28   ;;  %v3706_v28 = vld [vmem:[%s9850_s6 + $0x8] sm:$0xff] }
 0x2f3   : > { %3595 = vperm.xlu1 %7282, %v5714_v29   ;;  %3600 = vperm.xlu0 %7281, %v5715_v30   ;;  %v5911_v29 = vld [vmem:[%s9850_s6 + $0x6c8] sm:$0xff]  ;;  %v7380_v30 = vmov 0.0|0.0  }
 0x2f7   : > { %3551 = vperm.xlu1 %7282, %v3543_v31   ;;  %v6391_v31 = vpack.c.bf16 %v3706_v28, %v3705_v27  ;;  %v5931_v27 = vld [vmem:[%s9850_s6 + $0x768] sm:$0xff]  ;;  %v5932_v28 = vld [vmem:[%s9850_s6 + $0x770] sm:$0xff] }
 0x2fb   : > { %3619 = vperm.xlu1 %7282, %v5717_v32   ;;  %v5912_v32 = vld [vmem:[%s9850_s6 + $0x6d0] sm:$0xff] }
 0x32b   : > { %v1971_v33 = vpop.permute.xlu0 %1970 }
 0x330   : > { %v1969_v34 = vpop.permute.xlu0 %1968 }
 0x331   : > { %v1974_v39 = vsel %vm371_vm1, %v1969_v34, %v1971_v33  ;;  %v3708_v34 = vld [vmem:[%s9850_s6 + $0x18] sm:$0xff] }
 0x335   : > { %v1973_v35 = vpop.permute.xlu1 %1972  ;;  %v2304_v37 = vpop.permute.xlu0 %2303 }
 0x336   : > { %6310 = vmatprep.subr.mxu1 %v1973_v35  ;;  %v1975_v38 = vsel %vm371_vm1, %v1971_v33, %v1973_v35  ;;  %v3707_v33 = vld [vmem:[%s9850_s6 + $0x10] sm:$0xff] }
 0x337   : > { %1986 = vmatprep.subr.mxu0 %v1975_v38  ;;  %6311 = vmatpush3.msra.mxu1 %v1973_v35  ;;  %v6706_v35 = vpack.c.bf16 %v5912_v32, %v5911_v29  ;;  %v6394_v38 = vpack.c.bf16 %v3708_v34, %v3707_v33 }
 0x338   : > { %6313 = vmatmul.mubr.msk.f32.vlgmr.msra.gmra.mrb[4].mxu1 %vm1979_vm3, %v5657_v36  ;;  %6315 = vmatprep.subr.mxu1 %v1959_v26 }
 0x339   : > { %6316 = vmatpush3.msra.mxu1 %v1959_v26  ;;  %v2302_v40 = vpop.permute.xlu1 %2301  ;;  %1987 = vmatpush1.msra.mxu0 %v1974_v39  ;;  %v2480_v41 = vpop.permute.xlu0 %2479  ;;  %v5703_v26 = vld [vmem:[%s9847_s3 + $0x88] sm:$0xff] }
 0x33a   : > { %5658 = vmatmul.mubr.msk.f32.vlgmr.msra.gmra.mrb[16].mxu0 %vm1979_vm3, %v5656_v21  ;;  %2144 = vmatprep.subr.mxu0 %v1947_v22  ;;  %v2306_v42 = vsel %vm684_vm4, %v2302_v40, %v2304_v37  ;;  %v5697_v22 = vld [vmem:[%s9847_s3 + $0x78] sm:$0xff] }
 0x33b   : > { %2145 = vmatpush1.msra.mxu0 %v1957_v25  ;;  %6320 = vmatprep.subr.mxu1 %v2304_v37 }
 0x33c   : > { %2056 = vmatprep.mubr.f32.mxu0 %v7368_v0  ;;  %2316 = vmatprep.subr.mxu0 %v2306_v42  ;;  %v5915_v42 = vld [vmem:[%s9850_s6 + $0x6e8] sm:$0xff] }
 0x33d   : > { %v2300_v44 = vpop.permute.xlu1 %2299  ;;  %6317 = vmatprep.mubr.msk.f32.mxu1 %vm1979_vm3, %v1960_v43  ;;  %v2478_v47 = vpop.permute.xlu0 %2477 }
 0x33e   : > { %5659 = vmatmul.mubr.msk.f32.gmra.mrb[18].mxu0 %vm1979_vm3, %v5657_v36  ;;  %v2305_v49 = vsel %vm684_vm4, %v2300_v44, %v2302_v40  ;;  %v2483_v56 = vsel %vm848_vm5, %v2478_v47, %v2480_v41  ;;  %v5913_v36 = vld [vmem:[%s9850_s6 + $0x6d8] sm:$0xff]  ;;  %v3709_v40 = vld [vmem:[%s9850_s6 + $0x20] sm:$0xff] }
 0x33f   : > { %2208 = vmatprep.mubr.f32.mxu0 %v7368_v0  ;;  %v3712_v47 = vld [vmem:[%s9850_s6 + $0x38] sm:$0xff] }
 0x340   : > { %6318 = vmatmul.mubr.msk.f32.vlgmr.msra.gmra.mrb[4].mxu1 %vm1979_vm3, %v1961_v45 }
 0x341   : > { %6321 = vmatpush3.msra.mxu1 %v2304_v37  ;;  %v2482_v48 = vpop.permute.xlu1 %2481  ;;  %6322 = vmatprep.mubr.msk.f32.mxu1 %vm1979_vm3, %v5666_v46  ;;  %v2660_v52 = vpop.permute.xlu0 %2659  ;;  %v5914_v37 = vld [vmem:[%s9850_s6 + $0x6e0] sm:$0xff] }
 0x342   : > { %5662 = vmatmul.mubr.msk.f32.vlgmr.msra.gmra.mrb[16].mxu0 %vm1979_vm3, %v1960_v43  ;;  %6325 = vmatprep.subr.mxu1 %v2482_v48  ;;  %v2484_v50 = vsel %vm848_vm5, %v2480_v41, %v2482_v48  ;;  %v6709_v39 = vpack.c.bf16 %v5914_v37, %v5913_v36  ;;  %v3710_v41 = vld [vmem:[%s9850_s6 + $0x28] sm:$0xff]  ;;  %v5916_v43 = vld [vmem:[%s9850_s6 + $0x6f0] sm:$0xff] }
 0x343   : > { %2317 = vmatpush1.msra.mxu0 %v2305_v49  ;;  %2214 = vmatprep.mubr.f32.mxu0 %v7368_v0  ;;  %v6397_v44 = vpack.c.bf16 %v3710_v41, %v3709_v40  ;;  %v5918_v49 = vld [vmem:[%s9850_s6 + $0x700] sm:$0xff] }
 0x344   : > { %2494 = vmatprep.subr.mxu0 %v2484_v50 }
 0x345   : > { %v2658_v51 = vpop.permute.xlu1 %2657  ;;  %v2836_v58 = vpop.permute.xlu0 %2835 }
 0x346   : > { %5663 = vmatmul.mubr.msk.f32.gmra.mrb[18].mxu0 %vm1979_vm3, %v1961_v45  ;;  %v2662_v57 = vsel %vm1012_vm6, %v2658_v51, %v2660_v52  ;;  %v6712_v45 = vpack.c.bf16 %v5916_v43, %v5915_v42 }
 0x347   : > { %2380 = vmatprep.mubr.f32.mxu0 %v7368_v0 }
 0x348   : > { %6323 = vmatmul.mubr.msk.f32.vlgmr.msra.gmra.mrb[4].mxu1 %vm1979_vm3, %v5667_v53 }
 0x349   : > { %6326 = vmatpush3.msra.mxu1 %v2482_v48  ;;  %v2656_v55 = vpop.permute.xlu1 %2655  ;;  %6327 = vmatprep.mubr.msk.f32.mxu1 %vm1979_vm3, %v5672_v54  ;;  %v2834_v62 = vpop.permute.xlu0 %2833  ;;  %v5917_v48 = vld [vmem:[%s9850_s6 + $0x6f8] sm:$0xff] }
 0x34a   : > { %6330 = vmatprep.subr.mxu1 %v2660_v52  ;;  %5668 = vmatmul.mubr.msk.f32.vlgmr.msra.gmra.mrb[16].mxu0 %vm1979_vm3, %v5666_v46  ;;  %v2661_v63 = vsel %vm1012_vm6, %v2656_v55, %v2658_v51  ;;  %v2839_v6 = vsel %vm1176_vm7, %v2834_v62, %v2836_v58  ;;  %v3711_v46 = vld [vmem:[%s9850_s6 + $0x30] sm:$0xff]  ;;  %v6715_v51 = vpack.c.bf16 %v5918_v49, %v5917_v48 }
 0x34b   : > { %2495 = vmatpush1.msra.mxu0 %v2483_v56  ;;  %2386 = vmatprep.mubr.f32.mxu0 %v7368_v0  ;;  %v6400_v50 = vpack.c.bf16 %v3712_v47, %v3711_v46  ;;  %v5920_v55 = vld [vmem:[%s9850_s6 + $0x710] sm:$0xff] }
 0x34c   : > { %2672 = vmatprep.subr.mxu0 %v2662_v57 }
 0x34d   : > { %v2838_v60 = vpop.permute.xlu1 %2837  ;;  %v3016_v5 = vpop.permute.xlu0 %3015 }
 0x34e   : > { %5669 = vmatmul.mubr.msk.f32.gmra.mrb[18].mxu0 %vm1979_vm3, %v5667_v53  ;;  %v2840_v1 = vsel %vm1176_vm7, %v2836_v58, %v2838_v60  ;;  %v3714_v53 = vld [vmem:[%s9850_s6 + $0x48] sm:$0xff]  ;;  %v3715_v58 = vld [vmem:[%s9850_s6 + $0x50] sm:$0xff] }
 0x34f   : > { %2558 = vmatprep.mubr.f32.mxu0 %v7368_v0 }
 0x350   : > { %6328 = vmatmul.mubr.msk.f32.vlgmr.msra.gmra.mrb[4].mxu1 %vm1979_vm3, %v5673_v59 }
 0x351   : > { %6331 = vmatpush3.msra.mxu1 %v2660_v52  ;;  %6332 = vmatprep.mubr.msk.f32.mxu1 %vm1979_vm3, %v5678_v61  ;;  %v3014_v2 = vpop.permute.xlu1 %3013  ;;  %v3192_v9 = vpop.permute.xlu0 %3191  ;;  %v3713_v52 = vld [vmem:[%s9850_s6 + $0x40] sm:$0xff] }
 0x352   : > { %6335 = vmatprep.subr.mxu1 %v2838_v60  ;;  %5674 = vmatmul.mubr.msk.f32.vlgmr.msra.gmra.mrb[16].mxu0 %vm1979_vm3, %v5672_v54  ;;  %v3018_v8 = vsel %vm1340_vm8, %v3014_v2, %v3016_v5  ;;  %v5919_v54 = vld [vmem:[%s9850_s6 + $0x708] sm:$0xff]  ;;  %v6403_v56 = vpack.c.bf16 %v3714_v53, %v3713_v52  ;;  %v3728_v52 = vld [vmem:[%s9850_s6 + $0xb8] sm:$0xff] }
 0x353   : > { %2673 = vmatpush1.msra.mxu0 %v2661_v63  ;;  %2564 = vmatprep.mubr.f32.mxu0 %v7368_v0  ;;  %v6718_v57 = vpack.c.bf16 %v5920_v55, %v5919_v54  ;;  %v5933_v55 = vld [vmem:[%s9850_s6 + $0x778] sm:$0xff] }
 0x354   : > { %2850 = vmatprep.subr.mxu0 %v2840_v1  ;;  %v3717_v1 = vld [vmem:[%s9850_s6 + $0x60] sm:$0xff] }
 0x355   : > { %v3012_v7 = vpop.permute.xlu1 %3011  ;;  %v3190_v14 = vpop.permute.xlu0 %3189 }
 0x356   : > { %5675 = vmatmul.mubr.msk.f32.gmra.mrb[18].mxu0 %vm1979_vm3, %v5673_v59  ;;  %v3017_v13 = vsel %vm1340_vm8, %v3012_v7, %v3014_v2  ;;  %v3195_v20 = vsel %vm1504_vm9, %v3190_v14, %v3192_v9  ;;  %v3716_v59 = vld [vmem:[%s9850_s6 + $0x58] sm:$0xff]  ;;  %v3718_v2 = vld [vmem:[%s9850_s6 + $0x68] sm:$0xff]  ;;  %v3719_v7 = vld [vmem:[%s9850_s6 + $0x70] sm:$0xff] }
 0x357   : > { %2736 = vmatprep.mubr.f32.mxu0 %v7368_v0  ;;  %v6406_v62 = vpack.c.bf16 %v3716_v59, %v3715_v58  ;;  %v3722_v14 = vld [vmem:[%s9850_s6 + $0x88] sm:$0xff]  ;;  %v3729_v59 = vld [vmem:[%s9850_s6 + $0xc0] sm:$0xff] }
 0x358   : > { %6333 = vmatmul.mubr.msk.f32.vlgmr.msra.gmra.mrb[4].mxu1 %vm1979_vm3, %v5679_v3 }
 0x359   : > { %6336 = vmatpush3.msra.mxu1 %v2838_v60  ;;  %6337 = vmatprep.mubr.msk.f32.mxu1 %vm1979_vm3, %v5684_v4  ;;  %v3194_v12 = vpop.permute.xlu1 %3193  ;;  %v3372_v19 = vpop.permute.xlu0 %3371  ;;  %v5921_v60 = vld [vmem:[%s9850_s6 + $0x718] sm:$0xff] }
 0x35a   : > { %6340 = vmatprep.subr.mxu1 %v3016_v5  ;;  %5680 = vmatmul.mubr.msk.f32.vlgmr.msra.gmra.mrb[16].mxu0 %vm1979_vm3, %v5678_v61  ;;  %v3196_v15 = vsel %vm1504_vm9, %v3192_v9, %v3194_v12  ;;  %v5922_v61 = vld [vmem:[%s9850_s6 + $0x720] sm:$0xff]  ;;  %v5925_v9 = vld [vmem:[%s9850_s6 + $0x738] sm:$0xff] }
 0x35b   : > { %2851 = vmatpush1.msra.mxu0 %v2839_v6  ;;  %2742 = vmatprep.mubr.f32.mxu0 %v7368_v0  ;;  %v6721_v63 = vpack.c.bf16 %v5922_v61, %v5921_v60  ;;  %v3730_v60 = vld [vmem:[%s9850_s6 + $0xc8] sm:$0xff] }
 0x35c   : > { %3028 = vmatprep.subr.mxu0 %v3018_v8  ;;  %v3720_v8 = vld [vmem:[%s9850_s6 + $0x78] sm:$0xff]  ;;  %v6427_v61 = vpack.c.bf16 %v3730_v60, %v3729_v59 }
 0x35d   : > { %v3370_v18 = vpop.permute.xlu1 %3369 }
 0x35e   : > { %5681 = vmatmul.mubr.msk.f32.gmra.mrb[18].mxu0 %vm1979_vm3, %v5679_v3  ;;  %v3374_v21 = vsel %vm1668_vm10, %v3370_v18, %v3372_v19  ;;  %v5923_v3 = vld [vmem:[%s9850_s6 + $0x728] sm:$0xff] }
 0x35f   : > { %2914 = vmatprep.mubr.f32.mxu0 %v7368_v0 }
 0x360   : > { %6338 = vmatmul.mubr.msk.f32.vlgmr.msra.gmra.mrb[4].mxu1 %vm1979_vm3, %v5685_v10 }
 0x361   : > { %6341 = vmatpush3.msra.mxu1 %v3016_v5  ;;  %6342 = vmatprep.mubr.msk.f32.mxu1 %vm1979_vm3, %v5690_v11  ;;  %v3368_v24 = vpop.permute.xlu1 %3367  ;;  %v6409_v5 = vpack.c.bf16 %v3718_v2, %v3717_v1  ;;  %v5936_v1 = vld [vmem:[%s9850_s6 + $0x790] sm:$0xff] }
 0x362   : > { %6345 = vmatprep.subr.mxu1 %v3194_v12  ;;  %5686 = vmatmul.mubr.msk.f32.vlgmr.msra.gmra.mrb[16].mxu0 %vm1979_vm3, %v5684_v4  ;;  %v3373_v25 = vsel %vm1668_vm10, %v3368_v24, %v3370_v18  ;;  %v5924_v4 = vld [vmem:[%s9850_s6 + $0x730] sm:$0xff] }
 0x363   : > { %3029 = vmatpush1.msra.mxu0 %v3017_v13  ;;  %2920 = vmatprep.mubr.f32.mxu0 %v7368_v0  ;;  %v6724_v6 = vpack.c.bf16 %v5924_v4, %v5923_v3  ;;  %v3721_v13 = vld [vmem:[%s9850_s6 + $0x80] sm:$0xff] }
 0x364   : > { %3206 = vmatprep.subr.mxu0 %v3196_v15  ;;  %v5927_v15 = vld [vmem:[%s9850_s6 + $0x748] sm:$0xff] }
 0x366   : > { %5687 = vmatmul.mubr.msk.f32.gmra.mrb[18].mxu0 %vm1979_vm3, %v5685_v10  ;;  %v5926_v10 = vld [vmem:[%s9850_s6 + $0x740] sm:$0xff] }
 0x367   : > { %3092 = vmatprep.mubr.f32.mxu0 %v7368_v0 }
 0x368   : > { %6343 = vmatmul.mubr.msk.f32.vlgmr.msra.gmra.mrb[4].mxu1 %vm1979_vm3, %v5691_v16 }
 0x369   : > { %6346 = vmatpush3.msra.mxu1 %v3194_v12  ;;  %6347 = vmatprep.mubr.msk.f32.mxu1 %vm1979_vm3, %v5696_v17  ;;  %v6727_v12 = vpack.c.bf16 %v5926_v10, %v5925_v9 }
 0x36a   : > { %6350 = vmatprep.subr.mxu1 %v3372_v19  ;;  %5692 = vmatmul.mubr.msk.f32.vlgmr.msra.gmra.mrb[16].mxu0 %vm1979_vm3, %v5690_v11  ;;  %v6412_v11 = vpack.c.bf16 %v3720_v8, %v3719_v7  ;;  %v3547_v34 = vpop.permute.xlu0 %3546  ;;  %v3731_v7 = vld [vmem:[%s9850_s6 + $0xd0] sm:$0xff]  ;;  %v3732_v8 = vld [vmem:[%s9850_s6 + $0xd8] sm:$0xff] }
 0x36b   : > { %3207 = vmatpush1.msra.mxu0 %v3195_v20  ;;  %3098 = vmatprep.mubr.f32.mxu0 %v7368_v0  ;;  %v3724_v20 = vld [vmem:[%s9850_s6 + $0x98] sm:$0xff] }
 0x36c   : > { %3384 = vmatprep.subr.mxu0 %v3374_v21  ;;  %v5929_v21 = vld [vmem:[%s9850_s6 + $0x758] sm:$0xff] }
 0x36e   : > { %5693 = vmatmul.mubr.msk.f32.gmra.mrb[18].mxu0 %vm1979_vm3, %v5691_v16  ;;  %v5928_v16 = vld [vmem:[%s9850_s6 + $0x750] sm:$0xff] }
 0x36f   : > { %3270 = vmatprep.mubr.f32.mxu0 %v7368_v0  ;;  %v6730_v18 = vpack.c.bf16 %v5928_v16, %v5927_v15  ;;  %v5938_v15 = vld [vmem:[%s9850_s6 + $0x7a0] sm:$0xff]  ;;  %v3615_v16 = vpop.permute.xlu0 %3614 }
 0x370   : > { %6348 = vmatmul.mubr.msk.f32.vlgmr.msra.gmra.mrb[4].mxu1 %vm1979_vm3, %v5697_v22 }
 0x371   : > { %6351 = vmatpush3.msra.mxu1 %v3372_v19  ;;  %6352 = vmatprep.mubr.msk.f32.mxu1 %vm1979_vm3, %v5702_v23  ;;  %v3723_v19 = vld [vmem:[%s9850_s6 + $0x90] sm:$0xff] }
 0x372   : > { %5698 = vmatmul.mubr.msk.f32.vlgmr.msra.gmra.mrb[16].mxu0 %vm1979_vm3, %v5696_v17  ;;  %6705 = vmatprep.subr.bf16.mxu1 %v7380_v30  ;;  %v6415_v17 = vpack.c.bf16 %v3722_v14, %v3721_v13  ;;  %v8013_v32 = vpop.permute.xlu1 %3595  ;;  %v5937_v14 = vld [vmem:[%s9850_s6 + $0x798] sm:$0xff] }
 0x373   : > { %3385 = vmatpush1.msra.mxu0 %v3373_v25  ;;  %3276 = vmatprep.mubr.f32.mxu0 %v7368_v0  ;;  %v3725_v25 = vld [vmem:[%s9850_s6 + $0xa0] sm:$0xff] }
 0x374   : > { %6390 = vmatprep.subr.bf16.mxu0 %v7380_v30 }
 0x376   : > { %5699 = vmatmul.mubr.msk.f32.gmra.mrb[18].mxu0 %vm1979_vm3, %v5697_v22  ;;  %v5930_v22 = vld [vmem:[%s9850_s6 + $0x760] sm:$0xff]  ;;  %v3552_v42 = vpop.permute.xlu1 %3551 }
 0x377   : > { %3448 = vmatprep.mubr.f32.mxu0 %v7368_v0  ;;  %v6733_v24 = vpack.c.bf16 %v5930_v22, %v5929_v21  ;;  %v3733_v22 = vld [vmem:[%s9850_s6 + $0xe0] sm:$0xff] }
 0x378   : > { %6353 = vmatmul.mubr.msk.f32.vlgmr.msra.gmra.mrb[4].mxu1 %vm1979_vm3, %v5703_v26 }
 0x379   : > { %6707 = vmatpush1.bf16.msra.mxu1 %v6706_v35 }
 0x37a   : > { %5704 = vmatmul.mubr.msk.f32.vlgmr.msra.gmra.mrb[16].mxu0 %vm1979_vm3, %v5702_v23  ;;  %6708 = vmatprep.subr.bf16.mxu1 %v7380_v30  ;;  %v6418_v23 = vpack.c.bf16 %v3724_v20, %v3723_v19  ;;  %v6745_v19 = vpack.c.bf16 %v5938_v15, %v5937_v14  ;;  %v5944_v14 = vld [vmem:[%s9850_s6 + $0x7c8] sm:$0xff] }
 0x37b   : > { %3454 = vmatprep.mubr.f32.mxu0 %v7368_v0  ;;  %6392 = vmatpush1.bf16.msra.mxu0 %v6391_v31  ;;  %v6736_v31 = vpack.c.bf16 %v5932_v28, %v5931_v27  ;;  %v5939_v27 = vld [vmem:[%s9850_s6 + $0x7a8] sm:$0xff]  ;;  %v5940_v28 = vld [vmem:[%s9850_s6 + $0x7b0] sm:$0xff] }
 0x37c   : > { %6393 = vmatprep.subr.bf16.mxu0 %v7380_v30  ;;  %v5721_v15 = vld [vmem:[%s9850_s6 + $0x108] sm:$0xff] }
 0x37d   : > { %6710 = vmatpush1.bf16.msra.mxu1 %v6709_v39 }
 0x37e   : > { %5705 = vmatmul.mubr.msk.f32.gmra.mrb[18].mxu0 %vm1979_vm3, %v5703_v26  ;;  %6711 = vmatprep.subr.bf16.mxu1 %v7380_v30  ;;  %v3726_v26 = vld [vmem:[%s9850_s6 + $0xa8] sm:$0xff] }
 0x37f   : > { %6395 = vmatpush1.bf16.msra.mxu0 %v6394_v38  ;;  %v6421_v29 = vpack.c.bf16 %v3726_v26, %v3725_v25 }
 0x380   : > { %6396 = vmatprep.subr.bf16.mxu0 %v7380_v30 }
 0x381   : > { %6713 = vmatpush1.bf16.msra.mxu1 %v6712_v45 }
 0x382   : > { %6714 = vmatprep.subr.bf16.mxu1 %v7380_v30 }
 0x383   : > { %6398 = vmatpush1.bf16.msra.mxu0 %v6397_v44 }
 0x384   : > { %6399 = vmatprep.subr.bf16.mxu0 %v7380_v30 }
 0x385   : > { %6716 = vmatpush1.bf16.msra.mxu1 %v6715_v51  ;;  %v3727_v51 = vld [vmem:[%s9850_s6 + $0xb0] sm:$0xff] }
 0x386   : > { %6717 = vmatprep.subr.bf16.mxu1 %v7380_v30  ;;  %v6424_v54 = vpack.c.bf16 %v3728_v52, %v3727_v51 }
 0x387   : > { %6401 = vmatpush1.bf16.msra.mxu0 %v6400_v50 }
 0x388   : > { %6402 = vmatprep.subr.bf16.mxu0 %v7380_v30 }
 0x389   : > { %6719 = vmatpush1.bf16.msra.mxu1 %v6718_v57 }
 0x38a   : > { %6720 = vmatprep.subr.bf16.mxu1 %v7380_v30 }
 0x38b   : > { %6404 = vmatpush1.bf16.msra.mxu0 %v6403_v56  ;;  %v5934_v56 = vld [vmem:[%s9850_s6 + $0x780] sm:$0xff] }
 0x38c   : > { %6405 = vmatprep.subr.bf16.mxu0 %v7380_v30  ;;  %v6739_v57 = vpack.c.bf16 %v5934_v56, %v5933_v55 }
 0x38d   : > { %6722 = vmatpush1.bf16.msra.mxu1 %v6721_v63  ;;  %v5935_v63 = vld [vmem:[%s9850_s6 + $0x788] sm:$0xff] }
 0x38e   : > { %6723 = vmatprep.subr.bf16.mxu1 %v7380_v30  ;;  %v6742_v4 = vpack.c.bf16 %v5936_v1, %v5935_v63 }
 0x38f   : > { %6407 = vmatpush1.bf16.msra.mxu0 %v6406_v62 }
 0x390   : > { %6408 = vmatprep.subr.bf16.mxu0 %v7380_v30 }
 0x391   : > { %6725 = vmatpush1.bf16.msra.mxu1 %v6724_v6 }
 0x392   : > { %6726 = vmatprep.subr.bf16.mxu1 %v7380_v30 }
 0x393   : > { %6410 = vmatpush1.bf16.msra.mxu0 %v6409_v5 }
 0x394   : > { %6411 = vmatprep.subr.bf16.mxu0 %v7380_v30 }
 0x395   : > { %6728 = vmatpush1.bf16.msra.mxu1 %v6727_v12 }
 0x396   : > { %6729 = vmatprep.subr.bf16.mxu1 %v7380_v30 }
 0x397   : > { %6413 = vmatpush1.bf16.msra.mxu0 %v6412_v11  ;;  %v6430_v11 = vpack.c.bf16 %v3732_v8, %v3731_v7 }
 0x398   : > { %6414 = vmatprep.subr.bf16.mxu0 %v7380_v30 }
 0x399   : > { %6731 = vmatpush1.bf16.msra.mxu1 %v6730_v18 }
 0x39a   : > { %6732 = vmatprep.subr.bf16.mxu1 %v7380_v30 }
 0x39b   : > { %6416 = vmatpush1.bf16.msra.mxu0 %v6415_v17 }
 0x39c   : > { %6417 = vmatprep.subr.bf16.mxu0 %v7380_v30 }
 0x39d   : > { %6734 = vmatpush1.bf16.msra.mxu1 %v6733_v24 }
 0x39e   : > { %6735 = vmatprep.subr.bf16.mxu1 %v7380_v30 }
 0x39f   : > { %6419 = vmatpush1.bf16.msra.mxu0 %v6418_v23  ;;  %v3734_v23 = vld [vmem:[%s9850_s6 + $0xe8] sm:$0xff] }
 0x3a0   : > { %6420 = vmatprep.subr.bf16.mxu0 %v7380_v30  ;;  %v6433_v25 = vpack.c.bf16 %v3734_v23, %v3733_v22  ;;  %v5945_v23 = vld [vmem:[%s9850_s6 + $0x7d0] sm:$0xff] }
 0x3a1   : > { %6737 = vmatpush1.bf16.msra.mxu1 %v6736_v31  ;;  %v6748_v31 = vpack.c.bf16 %v5940_v28, %v5939_v27 }
 0x3a2   : > { %6738 = vmatprep.subr.bf16.mxu1 %v7380_v30 }
 0x3a3   : > { %6422 = vmatpush1.bf16.msra.mxu0 %v6421_v29 }
 0x3a4   : > { %6423 = vmatprep.subr.bf16.mxu0 %v7380_v30 }
 0x3a5   : > { %6740 = vmatpush1.bf16.msra.mxu1 %v6739_v57 }
 0x3a6   : > { %6741 = vmatprep.subr.bf16.mxu1 %v7380_v30 }
 0x3a7   : > { %6425 = vmatpush1.bf16.msra.mxu0 %v6424_v54 }
 0x3a8   : > { %6426 = vmatprep.subr.bf16.mxu0 %v7380_v30 }
 0x3a9   : > { %6743 = vmatpush1.bf16.msra.mxu1 %v6742_v4 }
 0x3aa   : > { %6744 = vmatprep.subr.bf16.mxu1 %v7380_v30 }
 0x3ab   : > { %6428 = vmatpush1.bf16.msra.mxu0 %v6427_v61 }
 0x3ac   : > { %6429 = vmatprep.subr.bf16.mxu0 %v7380_v30 }
 0x3ad   : > { %6746 = vmatpush1.bf16.msra.mxu1 %v6745_v19 }
 0x3ae   : > { %6747 = vmatprep.subr.bf16.mxu1 %v7380_v30 }
 0x3af   : > { %6431 = vmatpush1.bf16.msra.mxu0 %v6430_v11 }
 0x3b0   : > { %6432 = vmatprep.subr.bf16.mxu0 %v7380_v30 }
 0x3b1   : > { %6749 = vmatpush1.bf16.msra.mxu1 %v6748_v31 }
 0x3b2   : > { %4557 = vmatprep.subr.mxu1 %v7368_v0 }
 0x3b3   : > { %6434 = vmatpush1.bf16.msra.mxu0 %v6433_v25  ;;  %v5723_v25 = vld [vmem:[%s9850_s6 + $0x118] sm:$0xff] }
 0x3b4   : > { %3800 = vmatprep.subr.mxu0 %v7368_v0 }
 0x44b   : > { %v6354_v33 = vpop.f32.mrb[4].mxu1 }
 0x44c   : > { %v3527_v35 = vpop.f32.mrb[5].mxu1  ;;  %v8015_v44 = vadd.f32 %v6354_v33, %v3552_v42 }
 0x44d   : > { %v3556_v36 = vadd.f32 %v3547_v34, %v3527_v35  ;;  %v3450_v37 = vpop.f32.mrb[16].mxu0 }
 0x44e   : > { %v3554_v38 = vadd.f32 %v3547_v34, %v3450_v37  ;;  %v3452_v39 = vpop.f32.mrb[17].mxu0  ;;  %v3576_v49 = vmul.f32 1.442695, %v8015_v44  ;;  %v5941_v37 = vld [vmem:[%s9850_s6 + $0x7b8] sm:$0xff]  ;;  %vm3565_vm9 = vcmp.gt.f32.partialorder %v8015_v44, 0.0 }
 0x44f   : > { %v3570_v40 = vmul.f32 1.442695, %v3556_v36  ;;  %v3555_v41 = vadd.f32 %v3547_v34, %v3452_v39  ;;  %vm3562_vm4 = vcmp.gt.f32.partialorder %v3556_v36, 0.0  ;;  %v3735_v34 = vld [vmem:[%s9850_s6 + $0xf0] sm:$0xff]  ;;  %4558 = vmatpush1.msra.mxu1 %v5941_v37 }
 0x450   : > { %v3566_v43 = vmul.f32 1.442695, %v3554_v38  ;;  %vm3560_vm7 = vcmp.gt.f32.partialorder %v3554_v38, 0.0  ;;  %3801 = vmatpush1.msra.mxu0 %v3735_v34  ;;  %6750 = vmatprep.subr.bf16.mxu1 %v7380_v30 }
 0x451   : > { %7290 = vpow2.f32 %v3570_v40  ;;  %v3568_v45 = vmul.f32 1.442695, %v3555_v41  ;;  %v3456_v46 = vpop.f32.mrb[18].mxu0  ;;  %vm3561_vm8 = vcmp.gt.f32.partialorder %v3555_v41, 0.0  ;;  %6435 = vmatprep.subr.bf16.mxu0 %v7380_v30 }
 0x452   : > { %7292 = vpow2.f32 %v3566_v43  ;;  %v8017_v47 = vadd.f32 %v3552_v42, %v3456_v46  ;;  %v3458_v48 = vpop.f32.mrb[19].mxu0 }
 0x453   : > { %7294 = vpow2.f32 %v3568_v45  ;;  %v8020_v50 = vadd.f32 %v3552_v42, %v3458_v48 }
 0x454   : > { %v3572_v53 = vmul.f32 1.442695, %v8017_v47  ;;  %7296 = vpow2.f32 %v3576_v49  ;;  %vm3563_vm10 = vcmp.gt.f32.partialorder %v8017_v47, 0.0 }
 0x455   : > { %v3574_v58 = vmul.f32 1.442695, %v8020_v50  ;;  %vm3564_vm12 = vcmp.gt.f32.partialorder %v8020_v50, 0.0 }
 0x456   : > { %7298 = vpow2.f32 %v3572_v53 }
 0x457   : > { %7300 = vpow2.f32 %v3574_v58 }
 0x45b   : > { %v7291_v62 = vpop.eup %7290 }
 0x45c   : > { %v7293_v2 = vpop.eup %7292  ;;  %v5710_v3 = vadd.f32 -1.0, %v7291_v62 }
 0x45d   : > { %v7295_v5 = vpop.eup %7294  ;;  %v5708_v6 = vadd.f32 -1.0, %v7293_v2 }
 0x45e   : > { %v3586_v9 = vsel %vm3562_vm4, %v3556_v36, %v5710_v3  ;;  %v5709_v10 = vadd.f32 -1.0, %v7295_v5  ;;  %v7297_v26 = vpop.eup %7296  ;;  %v5719_v5 = vld [vmem:[%s9850_s6 + $0xf8] sm:$0xff] }
 0x45f   : > { %v3584_v12 = vsel %vm3560_vm7, %v3554_v38, %v5708_v6  ;;  %v3605_v13 = vmul.f32 %v8013_v32, %v3586_v9  ;;  %v5713_v33 = vadd.f32 -1.0, %v7297_v26  ;;  %v5720_v6 = vld [vmem:[%s9850_s6 + $0x100] sm:$0xff] }
 0x460   : > { %v3603_v17 = vmul.f32 %v8013_v32, %v3584_v12  ;;  %v3585_v18 = vsel %vm3561_vm8, %v3555_v41, %v5709_v10  ;;  %v7299_v29 = vpop.eup %7298  ;;  %v3601_v41 = vpop.permute.xlu0 %3600  ;;  %v6436_v12 = vpack.c.bf16 %v5720_v6, %v5719_v5  ;;  %v5724_v26 = vld [vmem:[%s9850_s6 + $0x120] sm:$0xff]  ;;  %v5734_v5 = vld [vmem:[%s9850_s6 + $0x170] sm:$0xff] }
 0x461   : > { %v3604_v20 = vmul.f32 %v8013_v32, %v3585_v18  ;;  %v3624_v21 = vadd.f32 %v3615_v16, %v3605_v13  ;;  %v7301_v35 = vpop.eup %7300  ;;  %v5711_v36 = vadd.f32 -1.0, %v7299_v29  ;;  %v3589_v38 = vsel %vm3565_vm9, %v8015_v44, %v5713_v33  ;;  %v3620_v44 = vpop.permute.xlu1 %3619  ;;  %v5943_v13 = vld [vmem:[%s9850_s6 + $0x7c0] sm:$0xff]  ;;  %v5948_v33 = vld [vmem:[%s9850_s6 + $0x7e8] sm:$0xff] }
 0x462   : > { %v3622_v24 = vadd.f32 %v3615_v16, %v3603_v17  ;;  %v5712_v39 = vadd.f32 -1.0, %v7301_v35  ;;  %v3608_v42 = vmul.f32 %v3601_v41, %v3589_v38  ;;  %v6442_v31 = vpack.c.bf16 %v5724_v26, %v5723_v25  ;;  %v5725_v35 = vld [vmem:[%s9850_s6 + $0x128] sm:$0xff]  ;;  %v5962_v25 = vld [vmem:[%s9850_s6 + $0x858] sm:$0xff] }
 0x463   : > { %3656 = vrot.lane.b32.xlu1 %v3624_v21, %s7372_s12  ;;  %v3623_v32 = vadd.f32 %v3615_v16, %v3604_v20  ;;  %v3587_v40 = vsel %vm3563_vm10, %v8017_v47, %v5711_v36  ;;  %v5722_v16 = vld [vmem:[%s9850_s6 + $0x110] sm:$0xff]  ;;  %v6751_v20 = vpack.c.bf16 %v5944_v14, %v5943_v13  ;;  %v5735_v13 = vld [vmem:[%s9850_s6 + $0x178] sm:$0xff]  ;;  %v5736_v14 = vld [vmem:[%s9850_s6 + $0x180] sm:$0xff] }
 0x464   : > { %3632 = vrot.lane.b32.xlu0 %v3622_v24, %s9870_s28  ;;  %v3606_v43 = vmul.f32 %v3601_v41, %v3587_v40  ;;  %v3588_v45 = vsel %vm3564_vm12, %v8020_v50, %v5712_v39  ;;  %v3627_v47 = vadd.f32 %v3620_v44, %v3608_v42  ;;  %v6439_v22 = vpack.c.bf16 %v5722_v16, %v5721_v15  ;;  %v5726_v36 = vld [vmem:[%s9850_s6 + $0x130] sm:$0xff]  ;;  %v5739_v26 = vld [vmem:[%s9850_s6 + $0x198] sm:$0xff] }
 0x465   : > { %v3607_v46 = vmul.f32 %v3601_v41, %v3588_v45  ;;  %v6445_v42 = vpack.c.bf16 %v5726_v36, %v5725_v35  ;;  %v5950_v45 = vld [vmem:[%s9850_s6 + $0x7f8] sm:$0xff]  ;;  %v6460_v16 = vpack.c.bf16 %v5736_v14, %v5735_v13  ;;  %v5741_v35 = vld [vmem:[%s9850_s6 + $0x1a8] sm:$0xff]  ;;  %v5742_v36 = vld [vmem:[%s9850_s6 + $0x1b0] sm:$0xff] }
 0x466   : > { %v8105_v48 = vadd.f32 %v3620_v44, %v3606_v43  ;;  %v5949_v43 = vld [vmem:[%s9850_s6 + $0x7f0] sm:$0xff] }
 0x467   : > { %3634 = vrot.lane.b32.xlu1 %v3623_v32, %s9870_s28  ;;  %v8110_v49 = vadd.f32 %v3620_v44, %v3607_v46  ;;  %v5727_v46 = vld [vmem:[%s9850_s6 + $0x138] sm:$0xff]  ;;  %v5973_v14 = vld [vmem:[%s9850_s6 + $0x8b0] sm:$0xff] }
 0x468   : > { %3652 = vrot.lane.b32.xlu0 %v3622_v24, %s7372_s12 }
 0x46b   : > { %3678 = vrot.lane.b32.xlu1 %v3623_v32, %s9871_s21 }
 0x46c   : > { %3654 = vrot.lane.b32.xlu0 %v3623_v32, %s7372_s12 }
 0x46f   : > { %3676 = vrot.lane.b32.xlu1 %v3622_v24, %s9871_s21 }
 0x470   : > { %3680 = vrot.lane.b32.xlu0 %v3624_v21, %s9871_s21 }
 0x473   : > { %3662 = vrot.lane.b32.xlu1 %v3627_v47, %s7372_s12 }
 0x474   : > { %3636 = vrot.lane.b32.xlu0 %v8105_v48, %s9870_s28 }
 0x477   : > { %3638 = vrot.lane.b32.xlu1 %v8110_v49, %s9870_s28 }
 0x478   : > { %3658 = vrot.lane.b32.xlu0 %v8105_v48, %s7372_s12 }
 0x47b   : > { %3684 = vrot.lane.b32.xlu1 %v8110_v49, %s9871_s21 }
 0x47c   : > { %3660 = vrot.lane.b32.xlu0 %v8110_v49, %s7372_s12  ;;  %s350_s12 = sand.u32 1, %s7358_s14  }
 0x47d   : > { %s351_s25 = scalar_lea.vmem [#allocation3], %s350_s12  ;;  %s5526_s18 = scalar_lea.sflag [#allocation4], %s350_s12 }
 0x47e   : > { %s5538_s28 = sshll.u32 %s351_s25, 4  ;;  %s9804_s28 = int_to_ptr.vmem [resolvable:$true] %s5538_s28 }
 0x47f   : > { %3682 = vrot.lane.b32.xlu1 %v8105_v48, %s9871_s21  ;;  %p7311_p0 = scmp.lt.s32.totalorder %s9804_s28, %s7309_s11 }
 0x480   : > { %3686 = vrot.lane.b32.xlu0 %v3627_v47, %s9871_s21  ;;  %v5728_v47 = vld [vmem:[%s9850_s6 + $0x140] sm:$0xff]  ;;  %s7304_s21 = scalar_lea.vmem %s9804_s28, 16 }
 0x481   : > { %p7305_p11 = scmp.ne.s32.totalorder %s9804_s28, %s7304_s21  ;;  %p7312_p1 = scmp.lt.s32.totalorder %s7310_s27, %s7304_s21 }
 0x483   : > { %p7306_p12 = pnand %p7305_p11, %p7475_p5  ;;  %p7313_p2 = por %p7312_p1, %p7311_p0 }
 0x485   : > { %p7307_p13 = pneg %p7306_p12 }
 0x487   : > { %p7314_p3 = pnand %p7313_p2, %p7307_p13 }
 0x4d5   : > { %v3657_v50 = vpop.permute.xlu1 %3656 }
 0x4d6   : > { %v3633_v51 = vpop.permute.xlu0 %3632 }
 0x4d9   : > { %v3635_v52 = vpop.permute.xlu1 %3634 }
 0x4da   : > { %v3653_v53 = vpop.permute.xlu0 %3652  ;;  %v3640_v54 = vsel %vm371_vm1, %v3633_v51, %v3635_v52  ;;  %v3647_v60 = vadd.f32 %v3635_v52, %v3623_v32  ;;  %v5947_v32 = vld [vmem:[%s9850_s6 + $0x7e0] sm:$0xff]  ;;  %v6448_v52 = vpack.c.bf16 %v5728_v47, %v5727_v46  ;;  %v5968_v47 = vld [vmem:[%s9850_s6 + $0x888] sm:$0xff] }
 0x4db   : > { %v3646_v57 = vadd.f32 %v3640_v54, %v3622_v24  ;;  %v5946_v24 = vld [vmem:[%s9850_s6 + $0x7d8] sm:$0xff]  ;;  %v6757_v38 = vpack.c.bf16 %v5948_v33, %v5947_v32  ;;  %v5952_v54 = vld [vmem:[%s9850_s6 + $0x808] sm:$0xff]  ;;  %v5963_v33 = vld [vmem:[%s9850_s6 + $0x860] sm:$0xff] }
 0x4dc   : > { %v6754_v28 = vpack.c.bf16 %v5946_v24, %v5945_v23  ;;  %v5961_v24 = vld [vmem:[%s9850_s6 + $0x850] sm:$0xff]  ;;  %v5967_v46 = vld [vmem:[%s9850_s6 + $0x880] sm:$0xff] }
 0x4dd   : > { %v3679_v55 = vpop.permute.xlu1 %3678 }
 0x4de   : > { %v3655_v56 = vpop.permute.xlu0 %3654 }
 0x4df   : > { %v3664_v58 = vsel %vm848_vm5, %v3653_v53, %v3655_v56  ;;  %v3665_v59 = vsel %vm848_vm5, %v3655_v56, %v3657_v50  ;;  %v6760_v50 = vpack.c.bf16 %v5950_v45, %v5949_v43  ;;  %v5951_v53 = vld [vmem:[%s9850_s6 + $0x800] sm:$0xff]  ;;  %v5730_v56 = vld [vmem:[%s9850_s6 + $0x150] sm:$0xff] }
 0x4e0   : > { %v3672_v61 = vadd.f32 %v3664_v58, %v3646_v57  ;;  %v3673_v63 = vadd.f32 %v3665_v59, %v3647_v60  ;;  %v6763_v57 = vpack.c.bf16 %v5952_v54, %v5951_v53  ;;  %v5953_v59 = vld [vmem:[%s9850_s6 + $0x810] sm:$0xff]  ;;  %v5954_v60 = vld [vmem:[%s9850_s6 + $0x818] sm:$0xff]  ;;  %v5744_v43 = vld [vmem:[%s9850_s6 + $0x1c0] sm:$0xff] }
 0x4e1   : > { %v3677_v62 = vpop.permute.xlu1 %3676  ;;  %v5969_v54 = vld [vmem:[%s9850_s6 + $0x890] sm:$0xff] }
 0x4e2   : > { %v3688_v1 = vsel %vm1012_vm6, %v3677_v62, %v3679_v55  ;;  %v3681_v2 = vpop.permute.xlu0 %3680  ;;  %v5732_v62 = vld [vmem:[%s9850_s6 + $0x160] sm:$0xff] }
 0x4e3   : > { %v3696_v3 = vadd.f32 %v3688_v1, %v3672_v61  ;;  %v3689_v4 = vsel %vm1012_vm6, %v3679_v55, %v3681_v2  ;;  %v5729_v55 = vld [vmem:[%s9850_s6 + $0x148] sm:$0xff]  ;;  %v5731_v61 = vld [vmem:[%s9850_s6 + $0x158] sm:$0xff]  ;;  %v5955_v2 = vld [vmem:[%s9850_s6 + $0x820] sm:$0xff] }
 0x4e4   : > { %v3697_v7 = vadd.f32 %v3689_v4, %v3673_v63  ;;  %v6451_v58 = vpack.c.bf16 %v5730_v56, %v5729_v55  ;;  %v6766_v63 = vpack.c.bf16 %v5954_v60, %v5953_v59  ;;  %v6454_v1 = vpack.c.bf16 %v5732_v62, %v5731_v61  ;;  %v5733_v4 = vld [vmem:[%s9850_s6 + $0x168] sm:$0xff]  ;;  %v5970_v55 = vld [vmem:[%s9850_s6 + $0x898] sm:$0xff]  ;;  %v5971_v62 = vld [vmem:[%s9850_s6 + $0x8a0] sm:$0xff] }
 0x4e5   : > { %v8134_v8 = vmul.f32 0.25, %v3696_v3  ;;  %v3663_v10 = vpop.permute.xlu1 %3662  ;;  %v5956_v3 = vld [vmem:[%s9850_s6 + $0x828] sm:$0xff]  ;;  %v5747_v56 = vld [vmem:[%s9850_s6 + $0x1d8] sm:$0xff]  ;;  %v6790_v59 = vpack.c.bf16 %v5970_v55, %v5969_v54 }
 0x4e6   : > { %v8136_v9 = vmul.f32 0.25, %v3697_v7  ;;  %v8138_v11 = vpop.permute.xlu0 %3636  ;;  %v6769_v6 = vpack.c.bf16 %v5956_v3, %v5955_v2  ;;  %v6457_v7 = vpack.c.bf16 %v5734_v5, %v5733_v4  ;;  %v5751_v3 = vld [vmem:[%s9850_s6 + $0x1f0] sm:$0xff]  ;;  %v5752_v4 = vld [vmem:[%s9850_s6 + $0x1f8] sm:$0xff] }
 0x4e7   : > { %v4492_v19 = vrot.slane %v8134_v8, 7 }
 0x4e8   : > { %5718 = vmatprep.mubr.msk.f32.mxu0 %vm3736_vm13, %v8136_v9  ;;  %v3845_v17 = vrot.slane %v8136_v9, 1  ;;  %v4493_v18 = vrot.slane %v8136_v9, 7  ;;  %v3953_v13 = vrot.slane %v8136_v9, 2 }
 0x4e9   : > { %3805 = vmatmul.mubr.f32.vlgmr.msra.gmra.mrb[20].mxu0 %v8134_v8  ;;  %v8175_v27 = vpop.permute.xlu1 %3638 }
 0x4ea   : > { %6437 = vmatpush1.bf16.msra.mxu0 %v6436_v12  ;;  %5750 = vmatprep.mubr.msk.f32.mxu0 %vm3736_vm13, %v3845_v17  ;;  %v8159_v21 = vpop.permute.xlu0 %3658  ;;  %v3649_v37 = vadd.f32 %v8175_v27, %v8110_v49  ;;  %v5958_v12 = vld [vmem:[%s9850_s6 + $0x838] sm:$0xff]  ;;  %v5959_v17 = vld [vmem:[%s9850_s6 + $0x840] sm:$0xff] }
 0x4eb   : > { %5942 = vmatprep.mubr.msk.f32.mxu1 %vm3736_vm13, %v4493_v18  ;;  %6438 = vmatprep.subr.bf16.mxu0 %v7380_v30  ;;  %v5960_v18 = vld [vmem:[%s9850_s6 + $0x848] sm:$0xff] }
 0x4ec   : > { %4562 = vmatmul.mubr.f32.vlgmr.msra.gmra.mrb[6].mxu1 %v4492_v19  ;;  %v5737_v19 = vld [vmem:[%s9850_s6 + $0x188] sm:$0xff] }
 0x4ed   : > { %6752 = vmatpush1.bf16.msra.mxu1 %v6751_v20  ;;  %v8197_v39 = vpop.permute.xlu1 %3684  ;;  %v5738_v20 = vld [vmem:[%s9850_s6 + $0x190] sm:$0xff] }
 0x4ee   : > { %6440 = vmatpush1.bf16.msra.mxu0 %v6439_v22  ;;  %6753 = vmatprep.subr.bf16.mxu1 %v7380_v30  ;;  %v8178_v29 = vpop.permute.xlu0 %3660  ;;  %v6775_v22 = vpack.c.bf16 %v5960_v18, %v5959_v17  ;;  %v6463_v23 = vpack.c.bf16 %v5738_v20, %v5737_v19  ;;  %v5977_v18 = vld [vmem:[%s9850_s6 + $0x8c8] sm:$0xff]  ;;  %v5978_v19 = vld [vmem:[%s9850_s6 + $0x8d0] sm:$0xff] }
 0x4ef   : > { %v3667_v34 = vsel %vm848_vm5, %v8178_v29, %v3663_v10  ;;  %6441 = vmatprep.subr.bf16.mxu0 %v7380_v30  ;;  %v5957_v10 = vld [vmem:[%s9850_s6 + $0x830] sm:$0xff] }
 0x4f0   : > { %v3675_v40 = vadd.f32 %v3667_v34, %v3649_v37  ;;  %v6772_v15 = vpack.c.bf16 %v5958_v12, %v5957_v10  ;;  %v5964_v34 = vld [vmem:[%s9850_s6 + $0x868] sm:$0xff]  ;;  %v5753_v10 = vld [vmem:[%s9850_s6 + $0x200] sm:$0xff] }
 0x4f1   : > { %6755 = vmatpush1.bf16.msra.mxu1 %v6754_v28  ;;  %v5740_v28 = vld [vmem:[%s9850_s6 + $0x1a0] sm:$0xff]  ;;  %v6781_v37 = vpack.c.bf16 %v5964_v34, %v5963_v33  ;;  %v3683_v60 = vpop.permute.xlu1 %3682  ;;  %v5754_v12 = vld [vmem:[%s9850_s6 + $0x208] sm:$0xff] }
 0x4f2   : > { %6443 = vmatpush1.bf16.msra.mxu0 %v6442_v31  ;;  %6756 = vmatprep.subr.bf16.mxu1 %v7380_v30  ;;  %v3687_v41 = vpop.permute.xlu0 %3686  ;;  %v6778_v31 = vpack.c.bf16 %v5962_v25, %v5961_v24  ;;  %v6466_v32 = vpack.c.bf16 %v5740_v28, %v5739_v26  ;;  %v6484_v17 = vpack.c.bf16 %v5754_v12, %v5753_v10  ;;  %v5979_v26 = vld [vmem:[%s9850_s6 + $0x8d8] sm:$0xff]  ;;  %v5980_v28 = vld [vmem:[%s9850_s6 + $0x8e0] sm:$0xff] }
 0x4f3   : > { %v3691_v44 = vsel %vm1012_vm6, %v8197_v39, %v3687_v41  ;;  %6444 = vmatprep.subr.bf16.mxu0 %v7380_v30  ;;  %v5966_v41 = vld [vmem:[%s9850_s6 + $0x878] sm:$0xff]  ;;  %v6799_v24 = vpack.c.bf16 %v5978_v19, %v5977_v18  ;;  %v6802_v33 = vpack.c.bf16 %v5980_v28, %v5979_v26  ;;  %v5774_v18 = vld [vmem:[%s9850_s6 + $0x2a8] sm:$0xff] }
 0x4f4   : > { %v3699_v49 = vadd.f32 %v3691_v44, %v3675_v40  ;;  %v5965_v40 = vld [vmem:[%s9850_s6 + $0x870] sm:$0xff]  ;;  %v5772_v10 = vld [vmem:[%s9850_s6 + $0x298] sm:$0xff] }
 0x4f5   : > { %6758 = vmatpush1.bf16.msra.mxu1 %v6757_v38  ;;  %v6469_v38 = vpack.c.bf16 %v5742_v36, %v5741_v35  ;;  %v6784_v45 = vpack.c.bf16 %v5966_v41, %v5965_v40  ;;  %v5981_v35 = vld [vmem:[%s9850_s6 + $0x8e8] sm:$0xff]  ;;  %v5982_v36 = vld [vmem:[%s9850_s6 + $0x8f0] sm:$0xff] }
 0x4f6   : > { %v8215_v51 = vmul.f32 0.25, %v3699_v49  ;;  %6446 = vmatpush1.bf16.msra.mxu0 %v6445_v42  ;;  %6759 = vmatprep.subr.bf16.mxu1 %v7380_v30  ;;  %v5743_v42 = vld [vmem:[%s9850_s6 + $0x1b8] sm:$0xff]  ;;  %v5745_v49 = vld [vmem:[%s9850_s6 + $0x1c8] sm:$0xff]  ;;  %v6805_v40 = vpack.c.bf16 %v5982_v36, %v5981_v35 }
 0x4f7   : > { %6447 = vmatprep.subr.bf16.mxu0 %v7380_v30  ;;  %v6472_v44 = vpack.c.bf16 %v5744_v43, %v5743_v42  ;;  %v5983_v42 = vld [vmem:[%s9850_s6 + $0x8f8] sm:$0xff]  ;;  %v5984_v43 = vld [vmem:[%s9850_s6 + $0x900] sm:$0xff] }
 0x4f8   : > { %5974 = vmatprep.mubr.msk.f32.mxu1 %vm3736_vm13, %v8215_v51  ;;  %v4708_v20 = vrot.slane %v8215_v51, 1 }
 0x4f9   : > { %6761 = vmatpush1.bf16.msra.mxu1 %v6760_v50  ;;  %v5746_v50 = vld [vmem:[%s9850_s6 + $0x1d0] sm:$0xff] }
 0x4fa   : > { %6449 = vmatpush1.bf16.msra.mxu0 %v6448_v52  ;;  %6762 = vmatprep.subr.bf16.mxu1 %v7380_v30  ;;  %v6787_v52 = vpack.c.bf16 %v5968_v47, %v5967_v46  ;;  %v6475_v53 = vpack.c.bf16 %v5746_v50, %v5745_v49  ;;  %v6808_v46 = vpack.c.bf16 %v5984_v43, %v5983_v42  ;;  %v5985_v49 = vld [vmem:[%s9850_s6 + $0x908] sm:$0xff]  ;;  %v5986_v50 = vld [vmem:[%s9850_s6 + $0x910] sm:$0xff] }
 0x4fb   : > { %6450 = vmatprep.subr.bf16.mxu0 %v7380_v30  ;;  %v6811_v54 = vpack.c.bf16 %v5986_v50, %v5985_v49  ;;  %v5784_v49 = vld [vmem:[%s9850_s6 + $0x2f0] sm:$0xff]  ;;  %v5781_v50 = vld [vmem:[%s9850_s6 + $0x2e0] sm:$0xff] }
 0x4fd   : > { %6764 = vmatpush1.bf16.msra.mxu1 %v6763_v57  ;;  %v5748_v57 = vld [vmem:[%s9850_s6 + $0x1e0] sm:$0xff] }
 0x4fe   : > { %6452 = vmatpush1.bf16.msra.mxu0 %v6451_v58  ;;  %6765 = vmatprep.subr.bf16.mxu1 %v7380_v30  ;;  %v3641_v58 = vsel %vm371_vm1, %v8138_v11, %v8175_v27  ;;  %v6478_v61 = vpack.c.bf16 %v5748_v57, %v5747_v56  ;;  %v3690_v27 = vsel %vm1012_vm6, %v3683_v60, %v8197_v39  ;;  %v5975_v39 = vld [vmem:[%s9850_s6 + $0x8b8] sm:$0xff]  ;;  %v5988_v57 = vld [vmem:[%s9850_s6 + $0x920] sm:$0xff]  ;;  %vm5523_vm1 = vcmask 73728  }
 0x4ff   : > { %6453 = vmatprep.subr.bf16.mxu0 %v7380_v30  ;;  %v3648_v11 = vadd.f32 %v3641_v58, %v8105_v48  ;;  %v5749_v48 = vld [vmem:[%s9850_s6 + $0x1e8] sm:$0xff]  ;;  %v5987_v56 = vld [vmem:[%s9850_s6 + $0x918] sm:$0xff]  ;;  %v5765_v58 = vld [vmem:[%s9850_s6 + $0x260] sm:$0xff] }
 0x500   : > { %v6814_v60 = vpack.c.bf16 %v5988_v57, %v5987_v56  ;;  %v5785_v56 = vld [vmem:[%s9850_s6 + $0x2f8] sm:$0xff]  ;;  %v5786_v57 = vld [vmem:[%s9850_s6 + $0x300] sm:$0xff] }
 0x501   : > { %6767 = vmatpush1.bf16.msra.mxu1 %v6766_v63  ;;  %v5972_v63 = vld [vmem:[%s9850_s6 + $0x8a8] sm:$0xff] }
 0x502   : > { %6455 = vmatpush1.bf16.msra.mxu0 %v6454_v1  ;;  %6768 = vmatprep.subr.bf16.mxu1 %v7380_v30  ;;  %v3666_v1 = vsel %vm848_vm5, %v8159_v21, %v8178_v29  ;;  %v6793_v2 = vpack.c.bf16 %v5972_v63, %v5971_v62  ;;  %v6481_v29 = vpack.c.bf16 %v5752_v4, %v5751_v3  ;;  %v5989_v62 = vld [vmem:[%s9850_s6 + $0x928] sm:$0xff]  ;;  %v5990_v63 = vld [vmem:[%s9850_s6 + $0x930] sm:$0xff]  ;;  %v5991_v3 = vld [vmem:[%s9850_s6 + $0x938] sm:$0xff] }
 0x503   : > { %6456 = vmatprep.subr.bf16.mxu0 %v7380_v30  ;;  %v3674_v5 = vadd.f32 %v3666_v1, %v3648_v11  ;;  %v5767_v1 = vld [vmem:[%s9850_s6 + $0x270] sm:$0xff]  ;;  %v5768_v11 = vld [vmem:[%s9850_s6 + $0x278] sm:$0xff]  ;;  %v5992_v4 = vld [vmem:[%s9850_s6 + $0x940] sm:$0xff] }
 0x505   : > { %6770 = vmatpush1.bf16.msra.mxu1 %v6769_v6  ;;  %v3698_v21 = vadd.f32 %v3690_v27, %v3674_v5  ;;  %v5976_v6 = vld [vmem:[%s9850_s6 + $0x8c0] sm:$0xff]  ;;  %v6817_v27 = vpack.c.bf16 %v5990_v63, %v5989_v62  ;;  %v6529_v62 = vpack.c.bf16 %v5786_v57, %v5785_v56  ;;  %v5803_v56 = vld [vmem:[%s9850_s6 + $0x388] sm:$0xff]  ;;  %v5804_v57 = vld [vmem:[%s9850_s6 + $0x390] sm:$0xff] }
 0x506   : > { %6458 = vmatpush1.bf16.msra.mxu0 %v6457_v7  ;;  %6771 = vmatprep.subr.bf16.mxu1 %v7380_v30  ;;  %v3844_v7 = vrot.slane %v8134_v8, 1  ;;  %v5769_v5 = vld [vmem:[%s9850_s6 + $0x280] sm:$0xff] }
 0x507   : > { %6459 = vmatprep.subr.bf16.mxu0 %v7380_v30  ;;  %v6009_v63 = vld [vmem:[%s9850_s6 + $0x9c0] sm:$0xff] }
 0x509   : > { %6773 = vmatpush1.bf16.msra.mxu1 %v6772_v15  ;;  %v6796_v15 = vpack.c.bf16 %v5976_v6, %v5975_v39  ;;  %v5993_v39 = vld [vmem:[%s9850_s6 + $0x948] sm:$0xff]  ;;  %v5994_v6 = vld [vmem:[%s9850_s6 + $0x950] sm:$0xff] }
 0x50a   : > { %6461 = vmatpush1.bf16.msra.mxu0 %v6460_v16  ;;  %6774 = vmatprep.subr.bf16.mxu1 %v7380_v30  ;;  %v8406_v16 = vmul.f32 0.25, %v3698_v21  ;;  %v6820_v21 = vpack.c.bf16 %v5992_v4, %v5991_v3  ;;  %v6823_v12 = vpack.c.bf16 %v5994_v6, %v5993_v39 }
 0x50b   : > { %6462 = vmatprep.subr.bf16.mxu0 %v7380_v30 }
 0x50d   : > { %6776 = vmatpush1.bf16.msra.mxu1 %v6775_v22  ;;  %v5755_v22 = vld [vmem:[%s9850_s6 + $0x210] sm:$0xff] }
 0x50e   : > { %6464 = vmatpush1.bf16.msra.mxu0 %v6463_v23  ;;  %6777 = vmatprep.subr.bf16.mxu1 %v7380_v30  ;;  %v5756_v23 = vld [vmem:[%s9850_s6 + $0x218] sm:$0xff] }
 0x50f   : > { %6465 = vmatprep.subr.bf16.mxu0 %v7380_v30  ;;  %v6487_v25 = vpack.c.bf16 %v5756_v23, %v5755_v22  ;;  %v5997_v22 = vld [vmem:[%s9850_s6 + $0x968] sm:$0xff]  ;;  %v5998_v23 = vld [vmem:[%s9850_s6 + $0x970] sm:$0xff] }
 0x510   : > { %v6829_v26 = vpack.c.bf16 %v5998_v23, %v5997_v22 }
 0x511   : > { %6779 = vmatpush1.bf16.msra.mxu1 %v6778_v31  ;;  %v5757_v31 = vld [vmem:[%s9850_s6 + $0x220] sm:$0xff] }
 0x512   : > { %6467 = vmatpush1.bf16.msra.mxu0 %v6466_v32  ;;  %6780 = vmatprep.subr.bf16.mxu1 %v7380_v30  ;;  %v5758_v32 = vld [vmem:[%s9850_s6 + $0x228] sm:$0xff] }
 0x513   : > { %6468 = vmatprep.subr.bf16.mxu0 %v7380_v30  ;;  %v6490_v34 = vpack.c.bf16 %v5758_v32, %v5757_v31  ;;  %v5999_v31 = vld [vmem:[%s9850_s6 + $0x978] sm:$0xff]  ;;  %v6000_v32 = vld [vmem:[%s9850_s6 + $0x980] sm:$0xff] }
 0x514   : > { %v6832_v35 = vpack.c.bf16 %v6000_v32, %v5999_v31 }
 0x515   : > { %6782 = vmatpush1.bf16.msra.mxu1 %v6781_v37  ;;  %v5759_v37 = vld [vmem:[%s9850_s6 + $0x230] sm:$0xff] }
 0x516   : > { %6470 = vmatpush1.bf16.msra.mxu0 %v6469_v38  ;;  %6783 = vmatprep.subr.bf16.mxu1 %v7380_v30  ;;  %v5760_v38 = vld [vmem:[%s9850_s6 + $0x238] sm:$0xff] }
 0x517   : > { %6471 = vmatprep.subr.bf16.mxu0 %v7380_v30  ;;  %v6493_v41 = vpack.c.bf16 %v5760_v38, %v5759_v37  ;;  %v6001_v37 = vld [vmem:[%s9850_s6 + $0x988] sm:$0xff]  ;;  %v6002_v38 = vld [vmem:[%s9850_s6 + $0x990] sm:$0xff] }
 0x518   : > { %v6835_v42 = vpack.c.bf16 %v6002_v38, %v6001_v37 }
 0x519   : > { %6785 = vmatpush1.bf16.msra.mxu1 %v6784_v45  ;;  %v5761_v45 = vld [vmem:[%s9850_s6 + $0x240] sm:$0xff] }
 0x51a   : > { %6473 = vmatpush1.bf16.msra.mxu0 %v6472_v44  ;;  %6786 = vmatprep.subr.bf16.mxu1 %v7380_v30  ;;  %v5762_v44 = vld [vmem:[%s9850_s6 + $0x248] sm:$0xff] }
 0x51b   : > { %6474 = vmatprep.subr.bf16.mxu0 %v7380_v30  ;;  %v6496_v47 = vpack.c.bf16 %v5762_v44, %v5761_v45  ;;  %v6003_v45 = vld [vmem:[%s9850_s6 + $0x998] sm:$0xff]  ;;  %v6004_v44 = vld [vmem:[%s9850_s6 + $0x9a0] sm:$0xff] }
 0x51d   : > { %6788 = vmatpush1.bf16.msra.mxu1 %v6787_v52  ;;  %v5763_v52 = vld [vmem:[%s9850_s6 + $0x250] sm:$0xff] }
 0x51e   : > { %6476 = vmatpush1.bf16.msra.mxu0 %v6475_v53  ;;  %6789 = vmatprep.subr.bf16.mxu1 %v7380_v30  ;;  %v5764_v53 = vld [vmem:[%s9850_s6 + $0x258] sm:$0xff] }
 0x51f   : > { %6477 = vmatprep.subr.bf16.mxu0 %v7380_v30  ;;  %v6499_v55 = vpack.c.bf16 %v5764_v53, %v5763_v52  ;;  %v6007_v53 = vld [vmem:[%s9850_s6 + $0x9b0] sm:$0xff] }
 0x521   : > { %6791 = vmatpush1.bf16.msra.mxu1 %v6790_v59  ;;  %v5766_v59 = vld [vmem:[%s9850_s6 + $0x268] sm:$0xff] }
 0x522   : > { %6479 = vmatpush1.bf16.msra.mxu0 %v6478_v61  ;;  %6792 = vmatprep.subr.bf16.mxu1 %v7380_v30  ;;  %v6502_v61 = vpack.c.bf16 %v5766_v59, %v5765_v58  ;;  %v4061_v58 = vrot.slane %v8136_v9, 3  ;;  %v6005_v59 = vld [vmem:[%s9850_s6 + $0x9a8] sm:$0xff] }
 0x523   : > { %3909 = vmatprep.subr.mxu0 %v7368_v0 }
 0x525   : > { %6794 = vmatpush1.bf16.msra.mxu1 %v6793_v2  ;;  %v6505_v2 = vpack.c.bf16 %v5768_v11, %v5767_v1  ;;  %v6010_v1 = vld [vmem:[%s9850_s6 + $0x9c8] sm:$0xff]  ;;  %v4816_v11 = vrot.slane %v8215_v51, 2 }
 0x526   : > { %3910 = vmatpush1.msra.mxu0 %v5749_v48  ;;  %4663 = vmatprep.subr.mxu1 %v7368_v0  ;;  %v5770_v48 = vld [vmem:[%s9850_s6 + $0x288] sm:$0xff]  ;;  %v6844_v3 = vpack.c.bf16 %v6010_v1, %v6009_v63  ;;  %v5806_v63 = vld [vmem:[%s9850_s6 + $0x3a0] sm:$0xff] }
 0x527   : > { %3914 = vmatmul.mubr.f32.vlgmr.msra.gmra.mrb[20].mxu0 %v3844_v7  ;;  %6480 = vmatprep.subr.bf16.mxu0 %v7380_v30  ;;  %v5771_v7 = vld [vmem:[%s9850_s6 + $0x290] sm:$0xff] }
 0x528   : > { %6482 = vmatpush1.bf16.msra.mxu0 %v6481_v29  ;;  %5782 = vmatprep.mubr.msk.f32.mxu0 %vm3736_vm13, %v3953_v13  ;;  %v6508_v29 = vpack.c.bf16 %v5770_v48, %v5769_v5  ;;  %v6511_v13 = vpack.c.bf16 %v5772_v10, %v5771_v7  ;;  %v6011_v5 = vld [vmem:[%s9850_s6 + $0x9d0] sm:$0xff]  ;;  %v6012_v48 = vld [vmem:[%s9850_s6 + $0x9d8] sm:$0xff]  ;;  %v6013_v7 = vld [vmem:[%s9850_s6 + $0x9e0] sm:$0xff] }
 0x529   : > { %4664 = vmatpush1.msra.mxu1 %v5973_v14  ;;  %6483 = vmatprep.subr.bf16.mxu0 %v7380_v30  ;;  %v5995_v14 = vld [vmem:[%s9850_s6 + $0x958] sm:$0xff]  ;;  %v6847_v39 = vpack.c.bf16 %v6012_v48, %v6011_v5  ;;  %v6014_v10 = vld [vmem:[%s9850_s6 + $0x9e8] sm:$0xff] }
 0x52a   : > { %4668 = vmatmul.mubr.f32.vlgmr.msra.gmra.mrb[6].mxu1 %v8406_v16  ;;  %6795 = vmatprep.subr.bf16.mxu1 %v7380_v30 }
 0x52b   : > { %6797 = vmatpush1.bf16.msra.mxu1 %v6796_v15  ;;  %6006 = vmatprep.mubr.msk.f32.mxu1 %vm3736_vm13, %v4708_v20  ;;  %v5996_v15 = vld [vmem:[%s9850_s6 + $0x960] sm:$0xff] }
 0x52c   : > { %6485 = vmatpush1.bf16.msra.mxu0 %v6484_v17  ;;  %6798 = vmatprep.subr.bf16.mxu1 %v7380_v30  ;;  %v5773_v17 = vld [vmem:[%s9850_s6 + $0x2a0] sm:$0xff]  ;;  %v6826_v19 = vpack.c.bf16 %v5996_v15, %v5995_v14  ;;  %v6850_v14 = vpack.c.bf16 %v6014_v10, %v6013_v7 }
 0x52d   : > { %6486 = vmatprep.subr.bf16.mxu0 %v7380_v30  ;;  %v6514_v20 = vpack.c.bf16 %v5774_v18, %v5773_v17  ;;  %v6015_v17 = vld [vmem:[%s9850_s6 + $0x9f0] sm:$0xff]  ;;  %v6016_v18 = vld [vmem:[%s9850_s6 + $0x9f8] sm:$0xff] }
 0x52e   : > { %v6853_v22 = vpack.c.bf16 %v6016_v18, %v6015_v17 }
 0x52f   : > { %6800 = vmatpush1.bf16.msra.mxu1 %v6799_v24  ;;  %v5775_v24 = vld [vmem:[%s9850_s6 + $0x2b0] sm:$0xff] }
 0x530   : > { %6488 = vmatpush1.bf16.msra.mxu0 %v6487_v25  ;;  %6801 = vmatprep.subr.bf16.mxu1 %v7380_v30  ;;  %v5776_v25 = vld [vmem:[%s9850_s6 + $0x2b8] sm:$0xff] }
 0x531   : > { %6489 = vmatprep.subr.bf16.mxu0 %v7380_v30  ;;  %v6517_v28 = vpack.c.bf16 %v5776_v25, %v5775_v24  ;;  %v6017_v24 = vld [vmem:[%s9850_s6 + $0xa00] sm:$0xff]  ;;  %v6018_v25 = vld [vmem:[%s9850_s6 + $0xa08] sm:$0xff] }
 0x532   : > { %v6856_v31 = vpack.c.bf16 %v6018_v25, %v6017_v24  ;;  %v5816_v24 = vld [vmem:[%s9850_s6 + $0x3e8] sm:$0xff]  ;;  %v5813_v25 = vld [vmem:[%s9850_s6 + $0x3d8] sm:$0xff] }
 0x533   : > { %6803 = vmatpush1.bf16.msra.mxu1 %v6802_v33  ;;  %v5777_v33 = vld [vmem:[%s9850_s6 + $0x2c0] sm:$0xff] }
 0x534   : > { %6491 = vmatpush1.bf16.msra.mxu0 %v6490_v34  ;;  %6804 = vmatprep.subr.bf16.mxu1 %v7380_v30  ;;  %v5778_v34 = vld [vmem:[%s9850_s6 + $0x2c8] sm:$0xff] }
 0x535   : > { %6492 = vmatprep.subr.bf16.mxu0 %v7380_v30  ;;  %v6520_v36 = vpack.c.bf16 %v5778_v34, %v5777_v33  ;;  %v6019_v33 = vld [vmem:[%s9850_s6 + $0xa10] sm:$0xff]  ;;  %v6020_v34 = vld [vmem:[%s9850_s6 + $0xa18] sm:$0xff] }
 0x536   : > { %v6859_v37 = vpack.c.bf16 %v6020_v34, %v6019_v33  ;;  %v5817_v33 = vld [vmem:[%s9850_s6 + $0x3f0] sm:$0xff]  ;;  %v5818_v34 = vld [vmem:[%s9850_s6 + $0x3f8] sm:$0xff] }
 0x537   : > { %6806 = vmatpush1.bf16.msra.mxu1 %v6805_v40  ;;  %v5779_v40 = vld [vmem:[%s9850_s6 + $0x2d0] sm:$0xff] }
 0x538   : > { %6494 = vmatpush1.bf16.msra.mxu0 %v6493_v41  ;;  %6807 = vmatprep.subr.bf16.mxu1 %v7380_v30  ;;  %v5780_v41 = vld [vmem:[%s9850_s6 + $0x2d8] sm:$0xff] }
 0x539   : > { %6495 = vmatprep.subr.bf16.mxu0 %v7380_v30  ;;  %v6523_v43 = vpack.c.bf16 %v5780_v41, %v5779_v40  ;;  %v6021_v40 = vld [vmem:[%s9850_s6 + $0xa20] sm:$0xff]  ;;  %v6022_v41 = vld [vmem:[%s9850_s6 + $0xa28] sm:$0xff] }
 0x53b   : > { %6809 = vmatpush1.bf16.msra.mxu1 %v6808_v46  ;;  %v6838_v46 = vpack.c.bf16 %v6004_v44, %v6003_v45  ;;  %v6862_v45 = vpack.c.bf16 %v6022_v41, %v6021_v40  ;;  %v6574_v40 = vpack.c.bf16 %v5818_v34, %v5817_v33  ;;  %v6041_v41 = vld [vmem:[%s9850_s6 + $0xab8] sm:$0xff]  ;;  %v5835_v33 = vld [vmem:[%s9850_s6 + $0x480] sm:$0xff]  ;;  %v5836_v34 = vld [vmem:[%s9850_s6 + $0x488] sm:$0xff] }
 0x53c   : > { %6497 = vmatpush1.bf16.msra.mxu0 %v6496_v47  ;;  %6810 = vmatprep.subr.bf16.mxu1 %v7380_v30  ;;  %v5783_v47 = vld [vmem:[%s9850_s6 + $0x2e8] sm:$0xff] }
 0x53d   : > { %6498 = vmatprep.subr.bf16.mxu0 %v7380_v30  ;;  %v6526_v52 = vpack.c.bf16 %v5784_v49, %v5783_v47  ;;  %v6024_v47 = vld [vmem:[%s9850_s6 + $0xa38] sm:$0xff] }
 0x53e   : > { %v5801_v49 = vld [vmem:[%s9850_s6 + $0x378] sm:$0xff] }
 0x53f   : > { %6812 = vmatpush1.bf16.msra.mxu1 %v6811_v54  ;;  %v6008_v54 = vld [vmem:[%s9850_s6 + $0x9b8] sm:$0xff] }
 0x540   : > { %6500 = vmatpush1.bf16.msra.mxu0 %v6499_v55  ;;  %6813 = vmatprep.subr.bf16.mxu1 %v7380_v30  ;;  %v3952_v55 = vrot.slane %v8134_v8, 2 }
 0x541   : > { %6501 = vmatprep.subr.bf16.mxu0 %v7380_v30 }
 0x543   : > { %6815 = vmatpush1.bf16.msra.mxu1 %v6814_v60  ;;  %v6841_v60 = vpack.c.bf16 %v6008_v54, %v6007_v53  ;;  %v6025_v54 = vld [vmem:[%s9850_s6 + $0xa40] sm:$0xff] }
 0x544   : > { %6503 = vmatpush1.bf16.msra.mxu0 %v6502_v61  ;;  %6816 = vmatprep.subr.bf16.mxu1 %v7380_v30  ;;  %v4707_v61 = vrot.slane %v8406_v16, 1 }
 0x545   : > { %6504 = vmatprep.subr.bf16.mxu0 %v7380_v30 }
 0x547   : > { %6818 = vmatpush1.bf16.msra.mxu1 %v6817_v27  ;;  %v5787_v27 = vld [vmem:[%s9850_s6 + $0x308] sm:$0xff] }
 0x548   : > { %6506 = vmatpush1.bf16.msra.mxu0 %v6505_v2  ;;  %6819 = vmatprep.subr.bf16.mxu1 %v7380_v30  ;;  %v5788_v2 = vld [vmem:[%s9850_s6 + $0x310] sm:$0xff] }
 0x549   : > { %6507 = vmatprep.subr.bf16.mxu0 %v7380_v30  ;;  %v6532_v4 = vpack.c.bf16 %v5788_v2, %v5787_v27  ;;  %v6029_v27 = vld [vmem:[%s9850_s6 + $0xa60] sm:$0xff]  ;;  %v6030_v2 = vld [vmem:[%s9850_s6 + $0xa68] sm:$0xff] }
 0x54a   : > { %v6874_v5 = vpack.c.bf16 %v6030_v2, %v6029_v27 }
 0x54b   : > { %6821 = vmatpush1.bf16.msra.mxu1 %v6820_v21  ;;  %v5789_v21 = vld [vmem:[%s9850_s6 + $0x318] sm:$0xff] }
 0x54c   : > { %6509 = vmatpush1.bf16.msra.mxu0 %v6508_v29  ;;  %6822 = vmatprep.subr.bf16.mxu1 %v7380_v30  ;;  %v5790_v29 = vld [vmem:[%s9850_s6 + $0x320] sm:$0xff] }
 0x54d   : > { %6510 = vmatprep.subr.bf16.mxu0 %v7380_v30  ;;  %v6535_v6 = vpack.c.bf16 %v5790_v29, %v5789_v21  ;;  %v6031_v21 = vld [vmem:[%s9850_s6 + $0xa70] sm:$0xff]  ;;  %v6032_v29 = vld [vmem:[%s9850_s6 + $0xa78] sm:$0xff] }
 0x54e   : > { %v6877_v7 = vpack.c.bf16 %v6032_v29, %v6031_v21 }
 0x54f   : > { %6824 = vmatpush1.bf16.msra.mxu1 %v6823_v12  ;;  %v5791_v12 = vld [vmem:[%s9850_s6 + $0x328] sm:$0xff] }
 0x550   : > { %6512 = vmatpush1.bf16.msra.mxu0 %v6511_v13  ;;  %6825 = vmatprep.subr.bf16.mxu1 %v7380_v30  ;;  %v5792_v13 = vld [vmem:[%s9850_s6 + $0x330] sm:$0xff] }
 0x551   : > { %6513 = vmatprep.subr.bf16.mxu0 %v7380_v30  ;;  %v6538_v15 = vpack.c.bf16 %v5792_v13, %v5791_v12  ;;  %v6033_v12 = vld [vmem:[%s9850_s6 + $0xa80] sm:$0xff]  ;;  %v6034_v13 = vld [vmem:[%s9850_s6 + $0xa88] sm:$0xff] }
 0x552   : > { %v6880_v17 = vpack.c.bf16 %v6034_v13, %v6033_v12 }
 0x553   : > { %6827 = vmatpush1.bf16.msra.mxu1 %v6826_v19  ;;  %v5793_v19 = vld [vmem:[%s9850_s6 + $0x338] sm:$0xff] }
 0x554   : > { %6515 = vmatpush1.bf16.msra.mxu0 %v6514_v20  ;;  %6828 = vmatprep.subr.bf16.mxu1 %v7380_v30  ;;  %v5794_v20 = vld [vmem:[%s9850_s6 + $0x340] sm:$0xff] }
 0x555   : > { %6516 = vmatprep.subr.bf16.mxu0 %v7380_v30  ;;  %v6541_v23 = vpack.c.bf16 %v5794_v20, %v5793_v19  ;;  %v6035_v19 = vld [vmem:[%s9850_s6 + $0xa90] sm:$0xff]  ;;  %v6036_v20 = vld [vmem:[%s9850_s6 + $0xa98] sm:$0xff] }
 0x557   : > { %6830 = vmatpush1.bf16.msra.mxu1 %v6829_v26  ;;  %v5795_v26 = vld [vmem:[%s9850_s6 + $0x348] sm:$0xff] }
 0x558   : > { %6518 = vmatpush1.bf16.msra.mxu0 %v6517_v28  ;;  %6831 = vmatprep.subr.bf16.mxu1 %v7380_v30  ;;  %v5796_v28 = vld [vmem:[%s9850_s6 + $0x350] sm:$0xff] }
 0x559   : > { %6519 = vmatprep.subr.bf16.mxu0 %v7380_v30  ;;  %v6544_v32 = vpack.c.bf16 %v5796_v28, %v5795_v26  ;;  %v6039_v28 = vld [vmem:[%s9850_s6 + $0xaa8] sm:$0xff] }
 0x55b   : > { %6833 = vmatpush1.bf16.msra.mxu1 %v6832_v35  ;;  %v5797_v35 = vld [vmem:[%s9850_s6 + $0x358] sm:$0xff] }
 0x55c   : > { %6521 = vmatpush1.bf16.msra.mxu0 %v6520_v36  ;;  %6834 = vmatprep.subr.bf16.mxu1 %v7380_v30  ;;  %v5798_v36 = vld [vmem:[%s9850_s6 + $0x360] sm:$0xff] }
 0x55d   : > { %6522 = vmatprep.subr.bf16.mxu0 %v7380_v30  ;;  %v6547_v38 = vpack.c.bf16 %v5798_v36, %v5797_v35  ;;  %v4169_v35 = vrot.slane %v8136_v9, 4  ;;  %v6037_v36 = vld [vmem:[%s9850_s6 + $0xaa0] sm:$0xff] }
 0x55f   : > { %6836 = vmatpush1.bf16.msra.mxu1 %v6835_v42  ;;  %v5799_v42 = vld [vmem:[%s9850_s6 + $0x368] sm:$0xff] }
 0x560   : > { %6524 = vmatpush1.bf16.msra.mxu0 %v6523_v43  ;;  %6837 = vmatprep.subr.bf16.mxu1 %v7380_v30  ;;  %v5800_v43 = vld [vmem:[%s9850_s6 + $0x370] sm:$0xff] }
 0x561   : > { %4017 = vmatprep.subr.mxu0 %v7368_v0  ;;  %v6550_v44 = vpack.c.bf16 %v5800_v43, %v5799_v42  ;;  %v6042_v42 = vld [vmem:[%s9850_s6 + $0xac0] sm:$0xff]  ;;  %v4924_v43 = vrot.slane %v8215_v51, 3 }
 0x563   : > { %6839 = vmatpush1.bf16.msra.mxu1 %v6838_v46  ;;  %v6023_v46 = vld [vmem:[%s9850_s6 + $0xa30] sm:$0xff] }
 0x564   : > { %4018 = vmatpush1.msra.mxu0 %v5781_v50  ;;  %4772 = vmatprep.subr.mxu1 %v7368_v0  ;;  %v5802_v50 = vld [vmem:[%s9850_s6 + $0x380] sm:$0xff] }
 0x565   : > { %4022 = vmatmul.mubr.f32.vlgmr.msra.gmra.mrb[20].mxu0 %v3952_v55  ;;  %6525 = vmatprep.subr.bf16.mxu0 %v7380_v30  ;;  %v6553_v53 = vpack.c.bf16 %v5802_v50, %v5801_v49  ;;  %v6026_v55 = vld [vmem:[%s9850_s6 + $0xa48] sm:$0xff]  ;;  %v6044_v50 = vld [vmem:[%s9850_s6 + $0xad0] sm:$0xff] }
 0x566   : > { %6527 = vmatpush1.bf16.msra.mxu0 %v6526_v52  ;;  %5814 = vmatprep.mubr.msk.f32.mxu0 %vm3736_vm13, %v4061_v58  ;;  %v6865_v52 = vpack.c.bf16 %v6024_v47, %v6023_v46  ;;  %v6868_v58 = vpack.c.bf16 %v6026_v55, %v6025_v54  ;;  %v6889_v46 = vpack.c.bf16 %v6042_v42, %v6041_v41  ;;  %v6043_v49 = vld [vmem:[%s9850_s6 + $0xac8] sm:$0xff]  ;;  %v5838_v41 = vld [vmem:[%s9850_s6 + $0x498] sm:$0xff] }
 0x567   : > { %4773 = vmatpush1.msra.mxu1 %v6005_v59  ;;  %6528 = vmatprep.subr.bf16.mxu0 %v7380_v30  ;;  %v6556_v59 = vpack.c.bf16 %v5804_v57, %v5803_v56  ;;  %v6892_v54 = vpack.c.bf16 %v6044_v50, %v6043_v49  ;;  %v6045_v56 = vld [vmem:[%s9850_s6 + $0xad8] sm:$0xff]  ;;  %v6046_v57 = vld [vmem:[%s9850_s6 + $0xae0] sm:$0xff] }
 0x568   : > { %4777 = vmatmul.mubr.f32.vlgmr.msra.gmra.mrb[6].mxu1 %v4707_v61  ;;  %6840 = vmatprep.subr.bf16.mxu1 %v7380_v30  ;;  %v6028_v61 = vld [vmem:[%s9850_s6 + $0xa58] sm:$0xff] }
 0x569   : > { %6842 = vmatpush1.bf16.msra.mxu1 %v6841_v60  ;;  %6038 = vmatprep.mubr.msk.f32.mxu1 %vm3736_vm13, %v4816_v11  ;;  %v6027_v60 = vld [vmem:[%s9850_s6 + $0xa50] sm:$0xff] }
 0x56a   : > { %6530 = vmatpush1.bf16.msra.mxu0 %v6529_v62  ;;  %6843 = vmatprep.subr.bf16.mxu1 %v7380_v30  ;;  %v5805_v62 = vld [vmem:[%s9850_s6 + $0x398] sm:$0xff]  ;;  %v6871_v1 = vpack.c.bf16 %v6028_v61, %v6027_v60  ;;  %v6895_v60 = vpack.c.bf16 %v6046_v57, %v6045_v56 }
 0x56b   : > { %6531 = vmatprep.subr.bf16.mxu0 %v7380_v30  ;;  %v6559_v11 = vpack.c.bf16 %v5806_v63, %v5805_v62  ;;  %v6047_v62 = vld [vmem:[%s9850_s6 + $0xae8] sm:$0xff]  ;;  %v6048_v63 = vld [vmem:[%s9850_s6 + $0xaf0] sm:$0xff] }
 0x56c   : > { %v6898_v27 = vpack.c.bf16 %v6048_v63, %v6047_v62 }
 0x56d   : > { %6845 = vmatpush1.bf16.msra.mxu1 %v6844_v3  ;;  %v5807_v3 = vld [vmem:[%s9850_s6 + $0x3a8] sm:$0xff] }
 0x56e   : > { %6533 = vmatpush1.bf16.msra.mxu0 %v6532_v4  ;;  %6846 = vmatprep.subr.bf16.mxu1 %v7380_v30  ;;  %v5808_v4 = vld [vmem:[%s9850_s6 + $0x3b0] sm:$0xff] }
 0x56f   : > { %6534 = vmatprep.subr.bf16.mxu0 %v7380_v30  ;;  %v6562_v48 = vpack.c.bf16 %v5808_v4, %v5807_v3  ;;  %v6049_v3 = vld [vmem:[%s9850_s6 + $0xaf8] sm:$0xff]  ;;  %v6050_v4 = vld [vmem:[%s9850_s6 + $0xb00] sm:$0xff] }
 0x570   : > { %v6901_v21 = vpack.c.bf16 %v6050_v4, %v6049_v3  ;;  %v5848_v3 = vld [vmem:[%s9850_s6 + $0x4e0] sm:$0xff]  ;;  %v5845_v4 = vld [vmem:[%s9850_s6 + $0x4d0] sm:$0xff] }
 0x571   : > { %6848 = vmatpush1.bf16.msra.mxu1 %v6847_v39  ;;  %v5809_v39 = vld [vmem:[%s9850_s6 + $0x3b8] sm:$0xff] }
 0x572   : > { %6536 = vmatpush1.bf16.msra.mxu0 %v6535_v6  ;;  %6849 = vmatprep.subr.bf16.mxu1 %v7380_v30  ;;  %v5810_v6 = vld [vmem:[%s9850_s6 + $0x3c0] sm:$0xff] }
 0x573   : > { %6537 = vmatprep.subr.bf16.mxu0 %v7380_v30  ;;  %v6565_v10 = vpack.c.bf16 %v5810_v6, %v5809_v39  ;;  %v6051_v39 = vld [vmem:[%s9850_s6 + $0xb08] sm:$0xff]  ;;  %v6052_v6 = vld [vmem:[%s9850_s6 + $0xb10] sm:$0xff] }
 0x574   : > { %v6904_v12 = vpack.c.bf16 %v6052_v6, %v6051_v39  ;;  %v5849_v39 = vld [vmem:[%s9850_s6 + $0x4e8] sm:$0xff]  ;;  %v5850_v6 = vld [vmem:[%s9850_s6 + $0x4f0] sm:$0xff] }
 0x575   : > { %6851 = vmatpush1.bf16.msra.mxu1 %v6850_v14  ;;  %v5811_v14 = vld [vmem:[%s9850_s6 + $0x3c8] sm:$0xff] }
 0x576   : > { %6539 = vmatpush1.bf16.msra.mxu0 %v6538_v15  ;;  %6852 = vmatprep.subr.bf16.mxu1 %v7380_v30  ;;  %v5812_v15 = vld [vmem:[%s9850_s6 + $0x3d0] sm:$0xff] }
 0x577   : > { %6540 = vmatprep.subr.bf16.mxu0 %v7380_v30  ;;  %v6568_v18 = vpack.c.bf16 %v5812_v15, %v5811_v14  ;;  %v6053_v14 = vld [vmem:[%s9850_s6 + $0xb18] sm:$0xff]  ;;  %v6054_v15 = vld [vmem:[%s9850_s6 + $0xb20] sm:$0xff] }
 0x579   : > { %6854 = vmatpush1.bf16.msra.mxu1 %v6853_v22  ;;  %v6883_v22 = vpack.c.bf16 %v6036_v20, %v6035_v19  ;;  %v6907_v19 = vpack.c.bf16 %v6054_v15, %v6053_v14  ;;  %v6619_v14 = vpack.c.bf16 %v5850_v6, %v5849_v39  ;;  %v6073_v15 = vld [vmem:[%s9850_s6 + $0xbb0] sm:$0xff]  ;;  %v5867_v39 = vld [vmem:[%s9850_s6 + $0x578] sm:$0xff]  ;;  %v5868_v6 = vld [vmem:[%s9850_s6 + $0x580] sm:$0xff] }
 0x57a   : > { %6542 = vmatpush1.bf16.msra.mxu0 %v6541_v23  ;;  %6855 = vmatprep.subr.bf16.mxu1 %v7380_v30  ;;  %v5815_v23 = vld [vmem:[%s9850_s6 + $0x3e0] sm:$0xff] }
 0x57b   : > { %6543 = vmatprep.subr.bf16.mxu0 %v7380_v30  ;;  %v6571_v26 = vpack.c.bf16 %v5816_v24, %v5815_v23  ;;  %v6056_v23 = vld [vmem:[%s9850_s6 + $0xb30] sm:$0xff] }
 0x57c   : > { %v5833_v24 = vld [vmem:[%s9850_s6 + $0x470] sm:$0xff] }
 0x57d   : > { %6857 = vmatpush1.bf16.msra.mxu1 %v6856_v31  ;;  %v6040_v31 = vld [vmem:[%s9850_s6 + $0xab0] sm:$0xff] }
 0x57e   : > { %6545 = vmatpush1.bf16.msra.mxu0 %v6544_v32  ;;  %6858 = vmatprep.subr.bf16.mxu1 %v7380_v30  ;;  %v4060_v32 = vrot.slane %v8134_v8, 3 }
 0x57f   : > { %6546 = vmatprep.subr.bf16.mxu0 %v7380_v30 }
 0x581   : > { %6860 = vmatpush1.bf16.msra.mxu1 %v6859_v37  ;;  %v6886_v37 = vpack.c.bf16 %v6040_v31, %v6039_v28  ;;  %v6057_v31 = vld [vmem:[%s9850_s6 + $0xb38] sm:$0xff] }
 0x582   : > { %6548 = vmatpush1.bf16.msra.mxu0 %v6547_v38  ;;  %6861 = vmatprep.subr.bf16.mxu1 %v7380_v30  ;;  %v4815_v38 = vrot.slane %v8406_v16, 2 }
 0x583   : > { %6549 = vmatprep.subr.bf16.mxu0 %v7380_v30 }
 0x585   : > { %6863 = vmatpush1.bf16.msra.mxu1 %v6862_v45  ;;  %v5819_v45 = vld [vmem:[%s9850_s6 + $0x400] sm:$0xff] }
 0x586   : > { %6551 = vmatpush1.bf16.msra.mxu0 %v6550_v44  ;;  %6864 = vmatprep.subr.bf16.mxu1 %v7380_v30  ;;  %v5820_v44 = vld [vmem:[%s9850_s6 + $0x408] sm:$0xff] }
 0x587   : > { %6552 = vmatprep.subr.bf16.mxu0 %v7380_v30  ;;  %v6577_v47 = vpack.c.bf16 %v5820_v44, %v5819_v45  ;;  %v6061_v45 = vld [vmem:[%s9850_s6 + $0xb58] sm:$0xff]  ;;  %v6062_v44 = vld [vmem:[%s9850_s6 + $0xb60] sm:$0xff] }
 0x588   : > { %v6919_v49 = vpack.c.bf16 %v6062_v44, %v6061_v45 }
 0x589   : > { %6866 = vmatpush1.bf16.msra.mxu1 %v6865_v52  ;;  %v5821_v52 = vld [vmem:[%s9850_s6 + $0x410] sm:$0xff] }
 0x58a   : > { %6554 = vmatpush1.bf16.msra.mxu0 %v6553_v53  ;;  %6867 = vmatprep.subr.bf16.mxu1 %v7380_v30  ;;  %v5822_v53 = vld [vmem:[%s9850_s6 + $0x418] sm:$0xff] }
 0x58b   : > { %6555 = vmatprep.subr.bf16.mxu0 %v7380_v30  ;;  %v6580_v55 = vpack.c.bf16 %v5822_v53, %v5821_v52  ;;  %v6063_v52 = vld [vmem:[%s9850_s6 + $0xb68] sm:$0xff]  ;;  %v6064_v53 = vld [vmem:[%s9850_s6 + $0xb70] sm:$0xff] }
 0x58c   : > { %v6922_v56 = vpack.c.bf16 %v6064_v53, %v6063_v52 }
 0x58d   : > { %6869 = vmatpush1.bf16.msra.mxu1 %v6868_v58  ;;  %v5823_v58 = vld [vmem:[%s9850_s6 + $0x420] sm:$0xff] }
 0x58e   : > { %6557 = vmatpush1.bf16.msra.mxu0 %v6556_v59  ;;  %6870 = vmatprep.subr.bf16.mxu1 %v7380_v30  ;;  %v5824_v59 = vld [vmem:[%s9850_s6 + $0x428] sm:$0xff] }
 0x58f   : > { %6558 = vmatprep.subr.bf16.mxu0 %v7380_v30  ;;  %v6583_v61 = vpack.c.bf16 %v5824_v59, %v5823_v58  ;;  %v6065_v58 = vld [vmem:[%s9850_s6 + $0xb78] sm:$0xff]  ;;  %v6066_v59 = vld [vmem:[%s9850_s6 + $0xb80] sm:$0xff] }
 0x590   : > { %v6925_v62 = vpack.c.bf16 %v6066_v59, %v6065_v58 }
 0x591   : > { %6872 = vmatpush1.bf16.msra.mxu1 %v6871_v1  ;;  %v5825_v1 = vld [vmem:[%s9850_s6 + $0x430] sm:$0xff] }
 0x592   : > { %6560 = vmatpush1.bf16.msra.mxu0 %v6559_v11  ;;  %6873 = vmatprep.subr.bf16.mxu1 %v7380_v30  ;;  %v5826_v11 = vld [vmem:[%s9850_s6 + $0x438] sm:$0xff] }
 0x593   : > { %6561 = vmatprep.subr.bf16.mxu0 %v7380_v30  ;;  %v6586_v2 = vpack.c.bf16 %v5826_v11, %v5825_v1  ;;  %v6067_v1 = vld [vmem:[%s9850_s6 + $0xb88] sm:$0xff]  ;;  %v6068_v11 = vld [vmem:[%s9850_s6 + $0xb90] sm:$0xff] }
 0x595   : > { %6875 = vmatpush1.bf16.msra.mxu1 %v6874_v5  ;;  %v5827_v5 = vld [vmem:[%s9850_s6 + $0x440] sm:$0xff] }
 0x596   : > { %6563 = vmatpush1.bf16.msra.mxu0 %v6562_v48  ;;  %6876 = vmatprep.subr.bf16.mxu1 %v7380_v30  ;;  %v5828_v48 = vld [vmem:[%s9850_s6 + $0x448] sm:$0xff] }
 0x597   : > { %6564 = vmatprep.subr.bf16.mxu0 %v7380_v30  ;;  %v6589_v29 = vpack.c.bf16 %v5828_v48, %v5827_v5  ;;  %v6071_v48 = vld [vmem:[%s9850_s6 + $0xba0] sm:$0xff] }
 0x599   : > { %6878 = vmatpush1.bf16.msra.mxu1 %v6877_v7  ;;  %v5829_v7 = vld [vmem:[%s9850_s6 + $0x450] sm:$0xff] }
 0x59a   : > { %6566 = vmatpush1.bf16.msra.mxu0 %v6565_v10  ;;  %6879 = vmatprep.subr.bf16.mxu1 %v7380_v30  ;;  %v5830_v10 = vld [vmem:[%s9850_s6 + $0x458] sm:$0xff] }
 0x59b   : > { %6567 = vmatprep.subr.bf16.mxu0 %v7380_v30  ;;  %v6592_v13 = vpack.c.bf16 %v5830_v10, %v5829_v7  ;;  %v4277_v7 = vrot.slane %v8136_v9, 5  ;;  %v6069_v10 = vld [vmem:[%s9850_s6 + $0xb98] sm:$0xff] }
 0x59d   : > { %6881 = vmatpush1.bf16.msra.mxu1 %v6880_v17  ;;  %v5831_v17 = vld [vmem:[%s9850_s6 + $0x460] sm:$0xff] }
 0x59e   : > { %6569 = vmatpush1.bf16.msra.mxu0 %v6568_v18  ;;  %6882 = vmatprep.subr.bf16.mxu1 %v7380_v30  ;;  %v5832_v18 = vld [vmem:[%s9850_s6 + $0x468] sm:$0xff] }
 0x59f   : > { %4125 = vmatprep.subr.mxu0 %v7368_v0  ;;  %v6595_v20 = vpack.c.bf16 %v5832_v18, %v5831_v17  ;;  %v6074_v17 = vld [vmem:[%s9850_s6 + $0xbb8] sm:$0xff]  ;;  %v5032_v18 = vrot.slane %v8215_v51, 4 }
 0x5a1   : > { %6884 = vmatpush1.bf16.msra.mxu1 %v6883_v22  ;;  %v6055_v22 = vld [vmem:[%s9850_s6 + $0xb28] sm:$0xff] }
 0x5a2   : > { %4126 = vmatpush1.msra.mxu0 %v5813_v25  ;;  %4880 = vmatprep.subr.mxu1 %v7368_v0  ;;  %v5834_v25 = vld [vmem:[%s9850_s6 + $0x478] sm:$0xff] }
 0x5a3   : > { %4130 = vmatmul.mubr.f32.vlgmr.msra.gmra.mrb[20].mxu0 %v4060_v32  ;;  %6570 = vmatprep.subr.bf16.mxu0 %v7380_v30  ;;  %v6598_v28 = vpack.c.bf16 %v5834_v25, %v5833_v24  ;;  %v6058_v32 = vld [vmem:[%s9850_s6 + $0xb40] sm:$0xff]  ;;  %v6076_v25 = vld [vmem:[%s9850_s6 + $0xbc8] sm:$0xff] }
 0x5a4   : > { %6572 = vmatpush1.bf16.msra.mxu0 %v6571_v26  ;;  %5846 = vmatprep.mubr.msk.f32.mxu0 %vm3736_vm13, %v4169_v35  ;;  %v6910_v26 = vpack.c.bf16 %v6056_v23, %v6055_v22  ;;  %v6913_v35 = vpack.c.bf16 %v6058_v32, %v6057_v31  ;;  %v6934_v22 = vpack.c.bf16 %v6074_v17, %v6073_v15  ;;  %v6075_v24 = vld [vmem:[%s9850_s6 + $0xbc0] sm:$0xff]  ;;  %v5870_v15 = vld [vmem:[%s9850_s6 + $0x590] sm:$0xff] }
 0x5a5   : > { %4881 = vmatpush1.msra.mxu1 %v6037_v36  ;;  %6573 = vmatprep.subr.bf16.mxu0 %v7380_v30  ;;  %v6601_v36 = vpack.c.bf16 %v5836_v34, %v5835_v33  ;;  %v6937_v31 = vpack.c.bf16 %v6076_v25, %v6075_v24  ;;  %v6077_v33 = vld [vmem:[%s9850_s6 + $0xbd0] sm:$0xff]  ;;  %v6078_v34 = vld [vmem:[%s9850_s6 + $0xbd8] sm:$0xff] }
 0x5a6   : > { %4885 = vmatmul.mubr.f32.vlgmr.msra.gmra.mrb[6].mxu1 %v4815_v38  ;;  %6885 = vmatprep.subr.bf16.mxu1 %v7380_v30  ;;  %v6060_v38 = vld [vmem:[%s9850_s6 + $0xb50] sm:$0xff] }
 0x5a7   : > { %6887 = vmatpush1.bf16.msra.mxu1 %v6886_v37  ;;  %6070 = vmatprep.mubr.msk.f32.mxu1 %vm3736_vm13, %v4924_v43  ;;  %v6059_v37 = vld [vmem:[%s9850_s6 + $0xb48] sm:$0xff] }
 0x5a8   : > { %6575 = vmatpush1.bf16.msra.mxu0 %v6574_v40  ;;  %6888 = vmatprep.subr.bf16.mxu1 %v7380_v30  ;;  %v5837_v40 = vld [vmem:[%s9850_s6 + $0x490] sm:$0xff]  ;;  %v6916_v42 = vpack.c.bf16 %v6060_v38, %v6059_v37  ;;  %v6940_v37 = vpack.c.bf16 %v6078_v34, %v6077_v33 }
 0x5a9   : > { %6576 = vmatprep.subr.bf16.mxu0 %v7380_v30  ;;  %v6604_v43 = vpack.c.bf16 %v5838_v41, %v5837_v40  ;;  %v6079_v40 = vld [vmem:[%s9850_s6 + $0xbe0] sm:$0xff]  ;;  %v6080_v41 = vld [vmem:[%s9850_s6 + $0xbe8] sm:$0xff] }
 0x5aa   : > { %v6943_v45 = vpack.c.bf16 %v6080_v41, %v6079_v40 }
 0x5ab   : > { %6890 = vmatpush1.bf16.msra.mxu1 %v6889_v46  ;;  %v5839_v46 = vld [vmem:[%s9850_s6 + $0x4a0] sm:$0xff] }
 0x5ac   : > { %6578 = vmatpush1.bf16.msra.mxu0 %v6577_v47  ;;  %6891 = vmatprep.subr.bf16.mxu1 %v7380_v30  ;;  %v5840_v47 = vld [vmem:[%s9850_s6 + $0x4a8] sm:$0xff] }
 0x5ad   : > { %6579 = vmatprep.subr.bf16.mxu0 %v7380_v30  ;;  %v6607_v50 = vpack.c.bf16 %v5840_v47, %v5839_v46  ;;  %v6081_v46 = vld [vmem:[%s9850_s6 + $0xbf0] sm:$0xff]  ;;  %v6082_v47 = vld [vmem:[%s9850_s6 + $0xbf8] sm:$0xff] }
 0x5ae   : > { %v6946_v52 = vpack.c.bf16 %v6082_v47, %v6081_v46  ;;  %v5880_v46 = vld [vmem:[%s9850_s6 + $0x5d8] sm:$0xff]  ;;  %v5877_v47 = vld [vmem:[%s9850_s6 + $0x5c8] sm:$0xff] }
 0x5af   : > { %6893 = vmatpush1.bf16.msra.mxu1 %v6892_v54  ;;  %v5841_v54 = vld [vmem:[%s9850_s6 + $0x4b0] sm:$0xff] }
 0x5b0   : > { %6581 = vmatpush1.bf16.msra.mxu0 %v6580_v55  ;;  %6894 = vmatprep.subr.bf16.mxu1 %v7380_v30  ;;  %v5842_v55 = vld [vmem:[%s9850_s6 + $0x4b8] sm:$0xff] }
 0x5b1   : > { %6582 = vmatprep.subr.bf16.mxu0 %v7380_v30  ;;  %v6610_v57 = vpack.c.bf16 %v5842_v55, %v5841_v54  ;;  %v6083_v54 = vld [vmem:[%s9850_s6 + $0xc00] sm:$0xff]  ;;  %v6084_v55 = vld [vmem:[%s9850_s6 + $0xc08] sm:$0xff] }
 0x5b2   : > { %v6949_v58 = vpack.c.bf16 %v6084_v55, %v6083_v54  ;;  %v5881_v54 = vld [vmem:[%s9850_s6 + $0x5e0] sm:$0xff]  ;;  %v5882_v55 = vld [vmem:[%s9850_s6 + $0x5e8] sm:$0xff] }
 0x5b3   : > { %6896 = vmatpush1.bf16.msra.mxu1 %v6895_v60  ;;  %v5843_v60 = vld [vmem:[%s9850_s6 + $0x4c0] sm:$0xff] }
 0x5b4   : > { %6584 = vmatpush1.bf16.msra.mxu0 %v6583_v61  ;;  %6897 = vmatprep.subr.bf16.mxu1 %v7380_v30  ;;  %v5844_v61 = vld [vmem:[%s9850_s6 + $0x4c8] sm:$0xff] }
 0x5b5   : > { %6585 = vmatprep.subr.bf16.mxu0 %v7380_v30  ;;  %v6613_v63 = vpack.c.bf16 %v5844_v61, %v5843_v60  ;;  %v6085_v60 = vld [vmem:[%s9850_s6 + $0xc10] sm:$0xff]  ;;  %v6086_v61 = vld [vmem:[%s9850_s6 + $0xc18] sm:$0xff] }
 0x5b7   : > { %6899 = vmatpush1.bf16.msra.mxu1 %v6898_v27  ;;  %v6928_v27 = vpack.c.bf16 %v6068_v11, %v6067_v1  ;;  %v6952_v1 = vpack.c.bf16 %v6086_v61, %v6085_v60  ;;  %v6664_v60 = vpack.c.bf16 %v5882_v55, %v5881_v54  ;;  %v6105_v61 = vld [vmem:[%s9850_s6 + $0xca8] sm:$0xff]  ;;  %v5900_v54 = vld [vmem:[%s9850_s6 + $0x678] sm:$0xff] }
 0x5b8   : > { %6587 = vmatpush1.bf16.msra.mxu0 %v6586_v2  ;;  %6900 = vmatprep.subr.bf16.mxu1 %v7380_v30  ;;  %v5847_v2 = vld [vmem:[%s9850_s6 + $0x4d8] sm:$0xff] }
 0x5b9   : > { %6588 = vmatprep.subr.bf16.mxu0 %v7380_v30  ;;  %v6616_v5 = vpack.c.bf16 %v5848_v3, %v5847_v2  ;;  %v6088_v2 = vld [vmem:[%s9850_s6 + $0xc28] sm:$0xff] }
 0x5ba   : > { %v5865_v3 = vld [vmem:[%s9850_s6 + $0x568] sm:$0xff] }
 0x5bb   : > { %6902 = vmatpush1.bf16.msra.mxu1 %v6901_v21  ;;  %v6072_v21 = vld [vmem:[%s9850_s6 + $0xba8] sm:$0xff] }
 0x5bc   : > { %6590 = vmatpush1.bf16.msra.mxu0 %v6589_v29  ;;  %6903 = vmatprep.subr.bf16.mxu1 %v7380_v30  ;;  %v4168_v29 = vrot.slane %v8134_v8, 4 }
 0x5bd   : > { %6591 = vmatprep.subr.bf16.mxu0 %v7380_v30 }
 0x5bf   : > { %6905 = vmatpush1.bf16.msra.mxu1 %v6904_v12  ;;  %v6931_v12 = vpack.c.bf16 %v6072_v21, %v6071_v48  ;;  %v6089_v21 = vld [vmem:[%s9850_s6 + $0xc30] sm:$0xff] }
 0x5c0   : > { %6593 = vmatpush1.bf16.msra.mxu0 %v6592_v13  ;;  %6906 = vmatprep.subr.bf16.mxu1 %v7380_v30  ;;  %v4923_v13 = vrot.slane %v8406_v16, 3 }
 0x5c1   : > { %6594 = vmatprep.subr.bf16.mxu0 %v7380_v30 }
 0x5c3   : > { %6908 = vmatpush1.bf16.msra.mxu1 %v6907_v19  ;;  %v5851_v19 = vld [vmem:[%s9850_s6 + $0x4f8] sm:$0xff] }
 0x5c4   : > { %6596 = vmatpush1.bf16.msra.mxu0 %v6595_v20  ;;  %6909 = vmatprep.subr.bf16.mxu1 %v7380_v30  ;;  %v5852_v20 = vld [vmem:[%s9850_s6 + $0x500] sm:$0xff] }
 0x5c5   : > { %6597 = vmatprep.subr.bf16.mxu0 %v7380_v30  ;;  %v6622_v23 = vpack.c.bf16 %v5852_v20, %v5851_v19  ;;  %v6093_v19 = vld [vmem:[%s9850_s6 + $0xc50] sm:$0xff]  ;;  %v6094_v20 = vld [vmem:[%s9850_s6 + $0xc58] sm:$0xff] }
 0x5c6   : > { %v6964_v24 = vpack.c.bf16 %v6094_v20, %v6093_v19  ;;  %v6113_v20 = vld [vmem:[%s9850_s6 + $0xce8] sm:$0xff] }
 0x5c7   : > { %6911 = vmatpush1.bf16.msra.mxu1 %v6910_v26  ;;  %v5853_v26 = vld [vmem:[%s9850_s6 + $0x508] sm:$0xff] }
 0x5c8   : > { %6599 = vmatpush1.bf16.msra.mxu0 %v6598_v28  ;;  %6912 = vmatprep.subr.bf16.mxu1 %v7380_v30  ;;  %v5854_v28 = vld [vmem:[%s9850_s6 + $0x510] sm:$0xff] }
 0x5c9   : > { %6600 = vmatprep.subr.bf16.mxu0 %v7380_v30  ;;  %v6625_v32 = vpack.c.bf16 %v5854_v28, %v5853_v26  ;;  %v6095_v26 = vld [vmem:[%s9850_s6 + $0xc60] sm:$0xff]  ;;  %v6096_v28 = vld [vmem:[%s9850_s6 + $0xc68] sm:$0xff] }
 0x5ca   : > { %v6967_v33 = vpack.c.bf16 %v6096_v28, %v6095_v26  ;;  %v6115_v28 = vld [vmem:[%s9850_s6 + $0xcf8] sm:$0xff] }
 0x5cb   : > { %6914 = vmatpush1.bf16.msra.mxu1 %v6913_v35  ;;  %v5855_v35 = vld [vmem:[%s9850_s6 + $0x518] sm:$0xff] }
 0x5cc   : > { %6602 = vmatpush1.bf16.msra.mxu0 %v6601_v36  ;;  %6915 = vmatprep.subr.bf16.mxu1 %v7380_v30  ;;  %v5856_v36 = vld [vmem:[%s9850_s6 + $0x520] sm:$0xff] }
 0x5cd   : > { %6603 = vmatprep.subr.bf16.mxu0 %v7380_v30  ;;  %v6628_v38 = vpack.c.bf16 %v5856_v36, %v5855_v35  ;;  %v6097_v35 = vld [vmem:[%s9850_s6 + $0xc70] sm:$0xff]  ;;  %v6098_v36 = vld [vmem:[%s9850_s6 + $0xc78] sm:$0xff] }
 0x5ce   : > { %v6970_v40 = vpack.c.bf16 %v6098_v36, %v6097_v35  ;;  %v6117_v36 = vld [vmem:[%s9850_s6 + $0xd08] sm:$0xff] }
 0x5cf   : > { %6917 = vmatpush1.bf16.msra.mxu1 %v6916_v42  ;;  %v5857_v42 = vld [vmem:[%s9850_s6 + $0x528] sm:$0xff] }
 0x5d0   : > { %6605 = vmatpush1.bf16.msra.mxu0 %v6604_v43  ;;  %6918 = vmatprep.subr.bf16.mxu1 %v7380_v30  ;;  %v5858_v43 = vld [vmem:[%s9850_s6 + $0x530] sm:$0xff] }
 0x5d1   : > { %6606 = vmatprep.subr.bf16.mxu0 %v7380_v30  ;;  %v6631_v44 = vpack.c.bf16 %v5858_v43, %v5857_v42  ;;  %v6099_v42 = vld [vmem:[%s9850_s6 + $0xc80] sm:$0xff]  ;;  %v6100_v43 = vld [vmem:[%s9850_s6 + $0xc88] sm:$0xff] }
 0x5d3   : > { %6920 = vmatpush1.bf16.msra.mxu1 %v6919_v49  ;;  %v5859_v49 = vld [vmem:[%s9850_s6 + $0x538] sm:$0xff] }
 0x5d4   : > { %6608 = vmatpush1.bf16.msra.mxu0 %v6607_v50  ;;  %6921 = vmatprep.subr.bf16.mxu1 %v7380_v30  ;;  %v5860_v50 = vld [vmem:[%s9850_s6 + $0x540] sm:$0xff] }
 0x5d5   : > { %6609 = vmatprep.subr.bf16.mxu0 %v7380_v30  ;;  %v6634_v53 = vpack.c.bf16 %v5860_v50, %v5859_v49  ;;  %v6103_v50 = vld [vmem:[%s9850_s6 + $0xc98] sm:$0xff] }
 0x5d7   : > { %6923 = vmatpush1.bf16.msra.mxu1 %v6922_v56  ;;  %v5861_v56 = vld [vmem:[%s9850_s6 + $0x548] sm:$0xff] }
 0x5d8   : > { %6611 = vmatpush1.bf16.msra.mxu0 %v6610_v57  ;;  %6924 = vmatprep.subr.bf16.mxu1 %v7380_v30  ;;  %v5862_v57 = vld [vmem:[%s9850_s6 + $0x550] sm:$0xff] }
 0x5d9   : > { %6612 = vmatprep.subr.bf16.mxu0 %v7380_v30  ;;  %v6637_v59 = vpack.c.bf16 %v5862_v57, %v5861_v56  ;;  %v4385_v56 = vrot.slane %v8136_v9, 6  ;;  %v6101_v57 = vld [vmem:[%s9850_s6 + $0xc90] sm:$0xff] }
 0x5da   : > { %v6106_v9 = vld [vmem:[%s9850_s6 + $0xcb0] sm:$0xff] }
 0x5db   : > { %6926 = vmatpush1.bf16.msra.mxu1 %v6925_v62  ;;  %v5863_v62 = vld [vmem:[%s9850_s6 + $0x558] sm:$0xff] }
 0x5dc   : > { %6614 = vmatpush1.bf16.msra.mxu0 %v6613_v63  ;;  %6927 = vmatprep.subr.bf16.mxu1 %v7380_v30  ;;  %v5864_v63 = vld [vmem:[%s9850_s6 + $0x560] sm:$0xff] }
 0x5dd   : > { %4233 = vmatprep.subr.mxu0 %v7368_v0  ;;  %v6640_v11 = vpack.c.bf16 %v5864_v63, %v5863_v62  ;;  %v5140_v62 = vrot.slane %v8215_v51, 5  ;;  %v5883_v63 = vld [vmem:[%s9850_s6 + $0x5f0] sm:$0xff] }
 0x5df   : > { %6929 = vmatpush1.bf16.msra.mxu1 %v6928_v27  ;;  %v6087_v27 = vld [vmem:[%s9850_s6 + $0xc20] sm:$0xff] }
 0x5e0   : > { %4234 = vmatpush1.msra.mxu0 %v5845_v4  ;;  %4988 = vmatprep.subr.mxu1 %v7368_v0  ;;  %v5866_v4 = vld [vmem:[%s9850_s6 + $0x570] sm:$0xff] }
 0x5e1   : > { %4238 = vmatmul.mubr.f32.vlgmr.msra.gmra.mrb[20].mxu0 %v4168_v29  ;;  %6615 = vmatprep.subr.bf16.mxu0 %v7380_v30  ;;  %v6643_v48 = vpack.c.bf16 %v5866_v4, %v5865_v3  ;;  %v6090_v29 = vld [vmem:[%s9850_s6 + $0xc38] sm:$0xff]  ;;  %v6108_v3 = vld [vmem:[%s9850_s6 + $0xcc0] sm:$0xff] }
 0x5e2   : > { %6617 = vmatpush1.bf16.msra.mxu0 %v6616_v5  ;;  %5878 = vmatprep.mubr.msk.f32.mxu0 %vm3736_vm13, %v4277_v7  ;;  %v6955_v5 = vpack.c.bf16 %v6088_v2, %v6087_v27  ;;  %v6958_v7 = vpack.c.bf16 %v6090_v29, %v6089_v21  ;;  %v6107_v2 = vld [vmem:[%s9850_s6 + $0xcb8] sm:$0xff]  ;;  %v5885_v4 = vld [vmem:[%s9850_s6 + $0x600] sm:$0xff]  ;;  %v6109_v29 = vld [vmem:[%s9850_s6 + $0xcc8] sm:$0xff] }
 0x5e3   : > { %4989 = vmatpush1.msra.mxu1 %v6069_v10  ;;  %6618 = vmatprep.subr.bf16.mxu0 %v7380_v30  ;;  %v6646_v10 = vpack.c.bf16 %v5868_v6, %v5867_v39  ;;  %v6110_v39 = vld [vmem:[%s9850_s6 + $0xcd0] sm:$0xff] }
 0x5e4   : > { %4993 = vmatmul.mubr.f32.vlgmr.msra.gmra.mrb[6].mxu1 %v4923_v13  ;;  %6930 = vmatprep.subr.bf16.mxu1 %v7380_v30  ;;  %v6092_v13 = vld [vmem:[%s9850_s6 + $0xc48] sm:$0xff]  ;;  %v5887_v6 = vld [vmem:[%s9850_s6 + $0x610] sm:$0xff] }
 0x5e5   : > { %6932 = vmatpush1.bf16.msra.mxu1 %v6931_v12  ;;  %6102 = vmatprep.mubr.msk.f32.mxu1 %vm3736_vm13, %v5032_v18  ;;  %v6091_v12 = vld [vmem:[%s9850_s6 + $0xc40] sm:$0xff] }
 0x5e6   : > { %6620 = vmatpush1.bf16.msra.mxu0 %v6619_v14  ;;  %6933 = vmatprep.subr.bf16.mxu1 %v7380_v30  ;;  %v5869_v14 = vld [vmem:[%s9850_s6 + $0x588] sm:$0xff]  ;;  %v6961_v17 = vpack.c.bf16 %v6092_v13, %v6091_v12  ;;  %v6111_v13 = vld [vmem:[%s9850_s6 + $0xcd8] sm:$0xff] }
 0x5e7   : > { %6621 = vmatprep.subr.bf16.mxu0 %v7380_v30  ;;  %v6649_v18 = vpack.c.bf16 %v5870_v15, %v5869_v14  ;;  %v6112_v14 = vld [vmem:[%s9850_s6 + $0xce0] sm:$0xff] }
 0x5e8   : > { %v5889_v15 = vld [vmem:[%s9850_s6 + $0x620] sm:$0xff] }
 0x5e9   : > { %6935 = vmatpush1.bf16.msra.mxu1 %v6934_v22  ;;  %v5871_v22 = vld [vmem:[%s9850_s6 + $0x598] sm:$0xff] }
 0x5ea   : > { %6623 = vmatpush1.bf16.msra.mxu0 %v6622_v23  ;;  %6936 = vmatprep.subr.bf16.mxu1 %v7380_v30  ;;  %v5872_v23 = vld [vmem:[%s9850_s6 + $0x5a0] sm:$0xff] }
 0x5eb   : > { %6624 = vmatprep.subr.bf16.mxu0 %v7380_v30  ;;  %v6652_v25 = vpack.c.bf16 %v5872_v23, %v5871_v22  ;;  %v6114_v22 = vld [vmem:[%s9850_s6 + $0xcf0] sm:$0xff] }
 0x5ec   : > { %v5891_v23 = vld [vmem:[%s9850_s6 + $0x630] sm:$0xff] }
 0x5ed   : > { %6938 = vmatpush1.bf16.msra.mxu1 %v6937_v31  ;;  %v5873_v31 = vld [vmem:[%s9850_s6 + $0x5a8] sm:$0xff] }
 0x5ee   : > { %6626 = vmatpush1.bf16.msra.mxu0 %v6625_v32  ;;  %6939 = vmatprep.subr.bf16.mxu1 %v7380_v30  ;;  %v5874_v32 = vld [vmem:[%s9850_s6 + $0x5b0] sm:$0xff] }
 0x5ef   : > { %6627 = vmatprep.subr.bf16.mxu0 %v7380_v30  ;;  %v6655_v34 = vpack.c.bf16 %v5874_v32, %v5873_v31  ;;  %v6116_v31 = vld [vmem:[%s9850_s6 + $0xd00] sm:$0xff] }
 0x5f0   : > { %v5893_v32 = vld [vmem:[%s9850_s6 + $0x640] sm:$0xff] }
 0x5f1   : > { %6941 = vmatpush1.bf16.msra.mxu1 %v6940_v37  ;;  %v5875_v37 = vld [vmem:[%s9850_s6 + $0x5b8] sm:$0xff] }
 0x5f2   : > { %6629 = vmatpush1.bf16.msra.mxu0 %v6628_v38  ;;  %6942 = vmatprep.subr.bf16.mxu1 %v7380_v30  ;;  %v5876_v38 = vld [vmem:[%s9850_s6 + $0x5c0] sm:$0xff] }
 0x5f3   : > { %6630 = vmatprep.subr.bf16.mxu0 %v7380_v30  ;;  %v6658_v41 = vpack.c.bf16 %v5876_v38, %v5875_v37  ;;  %v6118_v37 = vld [vmem:[%s9850_s6 + $0xd10] sm:$0xff] }
 0x5f4   : > { %v5895_v38 = vld [vmem:[%s9850_s6 + $0x650] sm:$0xff] }
 0x5f5   : > { %6944 = vmatpush1.bf16.msra.mxu1 %v6943_v45  ;;  %v6973_v45 = vpack.c.bf16 %v6100_v43, %v6099_v42  ;;  %v6119_v43 = vld [vmem:[%s9850_s6 + $0xd18] sm:$0xff] }
 0x5f6   : > { %6632 = vmatpush1.bf16.msra.mxu0 %v6631_v44  ;;  %6945 = vmatprep.subr.bf16.mxu1 %v7380_v30  ;;  %v5879_v44 = vld [vmem:[%s9850_s6 + $0x5d0] sm:$0xff] }
 0x5f7   : > { %6633 = vmatprep.subr.bf16.mxu0 %v7380_v30  ;;  %v6661_v49 = vpack.c.bf16 %v5880_v46, %v5879_v44  ;;  %v5897_v44 = vld [vmem:[%s9850_s6 + $0x660] sm:$0xff]  ;;  %v5898_v46 = vld [vmem:[%s9850_s6 + $0x668] sm:$0xff] }
 0x5f9   : > { %6947 = vmatpush1.bf16.msra.mxu1 %v6946_v52  ;;  %v6104_v52 = vld [vmem:[%s9850_s6 + $0xca0] sm:$0xff] }
 0x5fa   : > { %6635 = vmatpush1.bf16.msra.mxu0 %v6634_v53  ;;  %6948 = vmatprep.subr.bf16.mxu1 %v7380_v30  ;;  %v4276_v53 = vrot.slane %v8134_v8, 5 }
 0x5fb   : > { %6636 = vmatprep.subr.bf16.mxu0 %v7380_v30 }
 0x5fd   : > { %6950 = vmatpush1.bf16.msra.mxu1 %v6949_v58  ;;  %v6976_v58 = vpack.c.bf16 %v6104_v52, %v6103_v50  ;;  %v6121_v50 = vld [vmem:[%s9850_s6 + $0xd28] sm:$0xff]  ;;  %v6122_v52 = vld [vmem:[%s9850_s6 + $0xd30] sm:$0xff] }
 0x5fe   : > { %6638 = vmatpush1.bf16.msra.mxu0 %v6637_v59  ;;  %6951 = vmatprep.subr.bf16.mxu1 %v7380_v30  ;;  %v5031_v59 = vrot.slane %v8406_v16, 4  ;;  %v7003_v55 = vpack.c.bf16 %v6122_v52, %v6121_v50  ;;  %v6150_v50 = vld [vmem:[%s9850_s6 + $0xe08] sm:$0xff] }
 0x5ff   : > { %6639 = vmatprep.subr.bf16.mxu0 %v7380_v30 }
 0x601   : > { %6953 = vmatpush1.bf16.msra.mxu1 %v6952_v1  ;;  %v5884_v1 = vld [vmem:[%s9850_s6 + $0x5f8] sm:$0xff] }
 0x602   : > { %6641 = vmatpush1.bf16.msra.mxu0 %v6640_v11  ;;  %6954 = vmatprep.subr.bf16.mxu1 %v7380_v30  ;;  %v6979_v11 = vpack.c.bf16 %v6106_v9, %v6105_v61  ;;  %v6667_v27 = vpack.c.bf16 %v5884_v1, %v5883_v63  ;;  %v6126_v63 = vld [vmem:[%s9850_s6 + $0xd50] sm:$0xff] }
 0x603   : > { %6642 = vmatprep.subr.bf16.mxu0 %v7380_v30  ;;  %v5903_v1 = vld [vmem:[%s9850_s6 + $0x690] sm:$0xff] }
 0x605   : > { %6956 = vmatpush1.bf16.msra.mxu1 %v6955_v5  ;;  %v5886_v5 = vld [vmem:[%s9850_s6 + $0x608] sm:$0xff] }
 0x606   : > { %6644 = vmatpush1.bf16.msra.mxu0 %v6643_v48  ;;  %6957 = vmatprep.subr.bf16.mxu1 %v7380_v30  ;;  %v6982_v48 = vpack.c.bf16 %v6108_v3, %v6107_v2  ;;  %v6670_v21 = vpack.c.bf16 %v5886_v5, %v5885_v4  ;;  %v6127_v3 = vld [vmem:[%s9850_s6 + $0xd58] sm:$0xff]  ;;  %v6128_v4 = vld [vmem:[%s9850_s6 + $0xd60] sm:$0xff] }
 0x607   : > { %6645 = vmatprep.subr.bf16.mxu0 %v7380_v30  ;;  %v5905_v5 = vld [vmem:[%s9850_s6 + $0x6a0] sm:$0xff] }
 0x609   : > { %6959 = vmatpush1.bf16.msra.mxu1 %v6958_v7  ;;  %v5888_v7 = vld [vmem:[%s9850_s6 + $0x618] sm:$0xff] }
 0x60a   : > { %6647 = vmatpush1.bf16.msra.mxu0 %v6646_v10  ;;  %6960 = vmatprep.subr.bf16.mxu1 %v7380_v30  ;;  %v6985_v10 = vpack.c.bf16 %v6110_v39, %v6109_v29  ;;  %v6673_v12 = vpack.c.bf16 %v5888_v7, %v5887_v6  ;;  %v6129_v39 = vld [vmem:[%s9850_s6 + $0xd68] sm:$0xff]  ;;  %v6130_v6 = vld [vmem:[%s9850_s6 + $0xd70] sm:$0xff] }
 0x60b   : > { %6648 = vmatprep.subr.bf16.mxu0 %v7380_v30  ;;  %v5907_v7 = vld [vmem:[%s9850_s6 + $0x6b0] sm:$0xff] }
 0x60d   : > { %6962 = vmatpush1.bf16.msra.mxu1 %v6961_v17  ;;  %v5890_v17 = vld [vmem:[%s9850_s6 + $0x628] sm:$0xff] }
 0x60e   : > { %6650 = vmatpush1.bf16.msra.mxu0 %v6649_v18  ;;  %6963 = vmatprep.subr.bf16.mxu1 %v7380_v30  ;;  %v6988_v18 = vpack.c.bf16 %v6112_v14, %v6111_v13  ;;  %v6676_v19 = vpack.c.bf16 %v5890_v17, %v5889_v15  ;;  %v6131_v14 = vld [vmem:[%s9850_s6 + $0xd78] sm:$0xff]  ;;  %v6132_v15 = vld [vmem:[%s9850_s6 + $0xd80] sm:$0xff] }
 0x60f   : > { %6651 = vmatprep.subr.bf16.mxu0 %v7380_v30  ;;  %v7018_v17 = vpack.c.bf16 %v6132_v15, %v6131_v14  ;;  %v5356_v14 = vrot.slane %v8215_v51, 7 }
 0x611   : > { %6965 = vmatpush1.bf16.msra.mxu1 %v6964_v24  ;;  %v5892_v24 = vld [vmem:[%s9850_s6 + $0x638] sm:$0xff] }
 0x612   : > { %6653 = vmatpush1.bf16.msra.mxu0 %v6652_v25  ;;  %6966 = vmatprep.subr.bf16.mxu1 %v7380_v30  ;;  %v6991_v25 = vpack.c.bf16 %v6114_v22, %v6113_v20  ;;  %v6679_v26 = vpack.c.bf16 %v5892_v24, %v5891_v23  ;;  %v6136_v20 = vld [vmem:[%s9850_s6 + $0xd98] sm:$0xff]  ;;  %v4384_v22 = vrot.slane %v8134_v8, 6  ;;  %v6133_v23 = vld [vmem:[%s9850_s6 + $0xd88] sm:$0xff] }
 0x613   : > { %6654 = vmatprep.subr.bf16.mxu0 %v7380_v30  ;;  %v6138_v8 = vld [vmem:[%s9850_s6 + $0xda8] sm:$0xff] }
 0x615   : > { %6968 = vmatpush1.bf16.msra.mxu1 %v6967_v33  ;;  %v5894_v33 = vld [vmem:[%s9850_s6 + $0x648] sm:$0xff] }
 0x616   : > { %6656 = vmatpush1.bf16.msra.mxu0 %v6655_v34  ;;  %6969 = vmatprep.subr.bf16.mxu1 %v7380_v30  ;;  %v6994_v34 = vpack.c.bf16 %v6116_v31, %v6115_v28  ;;  %v6682_v35 = vpack.c.bf16 %v5894_v33, %v5893_v32  ;;  %v5248_v28 = vrot.slane %v8215_v51, 6  ;;  %v6139_v32 = vld [vmem:[%s9850_s6 + $0xdb0] sm:$0xff]  ;;  %v6140_v33 = vld [vmem:[%s9850_s6 + $0xdb8] sm:$0xff] }
 0x617   : > { %6657 = vmatprep.subr.bf16.mxu0 %v7380_v30  ;;  %v6173_v51 = vld [vmem:[%s9850_s6 + $0xeb8] sm:$0xff] }
 0x619   : > { %6971 = vmatpush1.bf16.msra.mxu1 %v6970_v40  ;;  %v5896_v40 = vld [vmem:[%s9850_s6 + $0x658] sm:$0xff] }
 0x61a   : > { %6659 = vmatpush1.bf16.msra.mxu0 %v6658_v41  ;;  %6972 = vmatprep.subr.bf16.mxu1 %v7380_v30  ;;  %v6997_v41 = vpack.c.bf16 %v6118_v37, %v6117_v36  ;;  %v6685_v42 = vpack.c.bf16 %v5896_v40, %v5895_v38  ;;  %v6142_v36 = vld [vmem:[%s9850_s6 + $0xdc8] sm:$0xff]  ;;  %v6143_v38 = vld [vmem:[%s9850_s6 + $0xdd0] sm:$0xff]  ;;  %v6144_v40 = vld [vmem:[%s9850_s6 + $0xdd8] sm:$0xff] }
 0x61b   : > { %4341 = vmatprep.subr.mxu0 %v7368_v0 }
 0x61d   : > { %6974 = vmatpush1.bf16.msra.mxu1 %v6973_v45  ;;  %v6120_v45 = vld [vmem:[%s9850_s6 + $0xd20] sm:$0xff] }
 0x61e   : > { %4342 = vmatpush1.msra.mxu0 %v5877_v47  ;;  %5096 = vmatprep.subr.mxu1 %v7368_v0  ;;  %v7000_v47 = vpack.c.bf16 %v6120_v45, %v6119_v43  ;;  %v6146_v43 = vld [vmem:[%s9850_s6 + $0xde8] sm:$0xff] }
 0x61f   : > { %4346 = vmatmul.mubr.f32.vlgmr.msra.gmra.mrb[20].mxu0 %v4276_v53  ;;  %6660 = vmatprep.subr.bf16.mxu0 %v7380_v30  ;;  %v5899_v53 = vld [vmem:[%s9850_s6 + $0x670] sm:$0xff] }
 0x620   : > { %6662 = vmatpush1.bf16.msra.mxu0 %v6661_v49  ;;  %5910 = vmatprep.mubr.msk.f32.mxu0 %vm3736_vm13, %v4385_v56  ;;  %v6688_v49 = vpack.c.bf16 %v5898_v46, %v5897_v44  ;;  %v6691_v56 = vpack.c.bf16 %v5900_v54, %v5899_v53  ;;  %v6147_v44 = vld [vmem:[%s9850_s6 + $0xdf0] sm:$0xff]  ;;  %v6148_v46 = vld [vmem:[%s9850_s6 + $0xdf8] sm:$0xff] }
 0x621   : > { %5097 = vmatpush1.msra.mxu1 %v6101_v57  ;;  %6663 = vmatprep.subr.bf16.mxu0 %v7380_v30  ;;  %v6123_v57 = vld [vmem:[%s9850_s6 + $0xd38] sm:$0xff]  ;;  %v6151_v53 = vld [vmem:[%s9850_s6 + $0xe10] sm:$0xff] }
 0x622   : > { %5101 = vmatmul.mubr.f32.vlgmr.msra.gmra.mrb[6].mxu1 %v5031_v59  ;;  %6975 = vmatprep.subr.bf16.mxu1 %v7380_v30  ;;  %v5901_v59 = vld [vmem:[%s9850_s6 + $0x680] sm:$0xff]  ;;  %v6152_v54 = vld [vmem:[%s9850_s6 + $0xe18] sm:$0xff] }
 0x623   : > { %6977 = vmatpush1.bf16.msra.mxu1 %v6976_v58  ;;  %6134 = vmatprep.mubr.msk.f32.mxu1 %vm3736_vm13, %v5140_v62  ;;  %v6124_v58 = vld [vmem:[%s9850_s6 + $0xd40] sm:$0xff]  ;;  %v6125_v62 = vld [vmem:[%s9850_s6 + $0xd48] sm:$0xff] }
 0x624   : > { %6665 = vmatpush1.bf16.msra.mxu0 %v6664_v60  ;;  %6978 = vmatprep.subr.bf16.mxu1 %v7380_v30  ;;  %v5902_v60 = vld [vmem:[%s9850_s6 + $0x688] sm:$0xff]  ;;  %v7006_v61 = vpack.c.bf16 %v6124_v58, %v6123_v57 }
 0x625   : > { %6666 = vmatprep.subr.bf16.mxu0 %v7380_v30  ;;  %v6694_v9 = vpack.c.bf16 %v5902_v60, %v5901_v59  ;;  %v6154_v57 = vld [vmem:[%s9850_s6 + $0xe28] sm:$0xff]  ;;  %v6155_v59 = vld [vmem:[%s9850_s6 + $0xe30] sm:$0xff]  ;;  %v6156_v60 = vld [vmem:[%s9850_s6 + $0xe38] sm:$0xff] }
 0x627   : > { %6980 = vmatpush1.bf16.msra.mxu1 %v6979_v11  ;;  %v5904_v11 = vld [vmem:[%s9850_s6 + $0x698] sm:$0xff] }
 0x628   : > { %6668 = vmatpush1.bf16.msra.mxu0 %v6667_v27  ;;  %6981 = vmatprep.subr.bf16.mxu1 %v7380_v30  ;;  %v7009_v27 = vpack.c.bf16 %v6126_v63, %v6125_v62  ;;  %v6697_v2 = vpack.c.bf16 %v5904_v11, %v5903_v1  ;;  %v6158_v62 = vld [vmem:[%s9850_s6 + $0xe48] sm:$0xff]  ;;  %v6159_v1 = vld [vmem:[%s9850_s6 + $0xe50] sm:$0xff]  ;;  %v6160_v11 = vld [vmem:[%s9850_s6 + $0xe58] sm:$0xff] }
 0x629   : > { %6669 = vmatprep.subr.bf16.mxu0 %v7380_v30 }
 0x62b   : > { %6983 = vmatpush1.bf16.msra.mxu1 %v6982_v48  ;;  %v5906_v48 = vld [vmem:[%s9850_s6 + $0x6a8] sm:$0xff] }
 0x62c   : > { %6671 = vmatpush1.bf16.msra.mxu0 %v6670_v21  ;;  %6984 = vmatprep.subr.bf16.mxu1 %v7380_v30  ;;  %v7012_v21 = vpack.c.bf16 %v6128_v4, %v6127_v3  ;;  %v6700_v29 = vpack.c.bf16 %v5906_v48, %v5905_v5  ;;  %v6162_v3 = vld [vmem:[%s9850_s6 + $0xe68] sm:$0xff]  ;;  %v6163_v5 = vld [vmem:[%s9850_s6 + $0xe70] sm:$0xff]  ;;  %v6164_v48 = vld [vmem:[%s9850_s6 + $0xe78] sm:$0xff] }
 0x62d   : > { %6672 = vmatprep.subr.bf16.mxu0 %v7380_v30 }
 0x62f   : > { %6986 = vmatpush1.bf16.msra.mxu1 %v6985_v10  ;;  %v5908_v10 = vld [vmem:[%s9850_s6 + $0x6b8] sm:$0xff] }
 0x630   : > { %6674 = vmatpush1.bf16.msra.mxu0 %v6673_v12  ;;  %6987 = vmatprep.subr.bf16.mxu1 %v7380_v30  ;;  %v7015_v12 = vpack.c.bf16 %v6130_v6, %v6129_v39  ;;  %v6703_v13 = vpack.c.bf16 %v5908_v10, %v5907_v7  ;;  %v6168_v39 = vld [vmem:[%s9850_s6 + $0xe90] sm:$0xff]  ;;  %v6165_v6 = vld [vmem:[%s9850_s6 + $0xe80] sm:$0xff]  ;;  %v5247_v10 = vrot.slane %v8406_v16, 6 }
 0x631   : > { %6675 = vmatprep.subr.bf16.mxu0 %v7380_v30 }
 0x633   : > { %6989 = vmatpush1.bf16.msra.mxu1 %v6988_v18  ;;  %v5909_v18 = vld [vmem:[%s9850_s6 + $0x6c0] sm:$0xff] }
 0x634   : > { %6677 = vmatpush1.bf16.msra.mxu0 %v6676_v19  ;;  %6990 = vmatprep.subr.bf16.mxu1 %v7380_v30  ;;  %v6135_v19 = vld [vmem:[%s9850_s6 + $0xd90] sm:$0xff] }
 0x635   : > { %6678 = vmatprep.subr.bf16.mxu0 %v7380_v30  ;;  %v7021_v24 = vpack.c.bf16 %v6136_v20, %v6135_v19  ;;  %v6174_v20 = vld [vmem:[%s9850_s6 + $0xec0] sm:$0xff] }
 0x637   : > { %6992 = vmatpush1.bf16.msra.mxu1 %v6991_v25  ;;  %v5139_v25 = vrot.slane %v8406_v16, 5 }
 0x638   : > { %6680 = vmatpush1.bf16.msra.mxu0 %v6679_v26  ;;  %6993 = vmatprep.subr.bf16.mxu1 %v7380_v30  ;;  %v6137_v26 = vld [vmem:[%s9850_s6 + $0xda0] sm:$0xff] }
 0x639   : > { %6681 = vmatprep.subr.bf16.mxu0 %v7380_v30  ;;  %v7024_v31 = vpack.c.bf16 %v6138_v8, %v6137_v26  ;;  %v6177_v26 = vld [vmem:[%s9850_s6 + $0xed8] sm:$0xff]  ;;  %v6178_v8 = vld [vmem:[%s9850_s6 + $0xee0] sm:$0xff] }
 0x63b   : > { %6995 = vmatpush1.bf16.msra.mxu1 %v6994_v34  ;;  %v7027_v34 = vpack.c.bf16 %v6140_v33, %v6139_v32  ;;  %v6180_v32 = vld [vmem:[%s9850_s6 + $0xef0] sm:$0xff]  ;;  %v5436_v33 = vld [vmem:[%s9852_s8] sm:$0xff] }
 0x63c   : > { %6683 = vmatpush1.bf16.msra.mxu0 %v6682_v35  ;;  %6996 = vmatprep.subr.bf16.mxu1 %v7380_v30  ;;  %v6141_v35 = vld [vmem:[%s9850_s6 + $0xdc0] sm:$0xff] }
 0x63d   : > { %6684 = vmatprep.subr.bf16.mxu0 %v7380_v30  ;;  %v7030_v37 = vpack.c.bf16 %v6142_v36, %v6141_v35  ;;  %v5438_v35 = vld [vmem:[%s9852_s8 + $0x10] sm:$0xff] }
 0x63f   : > { %6998 = vmatpush1.bf16.msra.mxu1 %v6997_v41  ;;  %v7033_v41 = vpack.c.bf16 %v6144_v40, %v6143_v38  ;;  %v6181_v40 = vld [vmem:[%s9850_s6 + $0xef8] sm:$0xff] }
 0x640   : > { %6686 = vmatpush1.bf16.msra.mxu0 %v6685_v42  ;;  %6999 = vmatprep.subr.bf16.mxu1 %v7380_v30  ;;  %v6145_v42 = vld [vmem:[%s9850_s6 + $0xde0] sm:$0xff] }
 0x641   : > { %6687 = vmatprep.subr.bf16.mxu0 %v7380_v30  ;;  %v7036_v45 = vpack.c.bf16 %v6146_v43, %v6145_v42  ;;  %v5440_v43 = vld [vmem:[%s9852_s8 + $0x20] sm:$0xff] }
 0x643   : > { %7001 = vmatpush1.bf16.msra.mxu1 %v7000_v47  ;;  %v7039_v47 = vpack.c.bf16 %v6148_v46, %v6147_v44  ;;  %v6183_v46 = vld [vmem:[%s9850_s6 + $0xf08] sm:$0xff] }
 0x644   : > { %6689 = vmatpush1.bf16.msra.mxu0 %v6688_v49  ;;  %7002 = vmatprep.subr.bf16.mxu1 %v7380_v30  ;;  %v6149_v49 = vld [vmem:[%s9850_s6 + $0xe00] sm:$0xff] }
 0x645   : > { %6690 = vmatprep.subr.bf16.mxu0 %v7380_v30  ;;  %v7042_v52 = vpack.c.bf16 %v6150_v50, %v6149_v49 }
 0x647   : > { %7004 = vmatpush1.bf16.msra.mxu1 %v7003_v55  ;;  %v7045_v55 = vpack.c.bf16 %v6152_v54, %v6151_v53  ;;  %v6186_v53 = vld [vmem:[%s9850_s6 + $0xf20] sm:$0xff] }
 0x648   : > { %6692 = vmatpush1.bf16.msra.mxu0 %v6691_v56  ;;  %7005 = vmatprep.subr.bf16.mxu1 %v7380_v30  ;;  %v6153_v56 = vld [vmem:[%s9850_s6 + $0xe20] sm:$0xff] }
 0x649   : > { %6693 = vmatprep.subr.bf16.mxu0 %v7380_v30  ;;  %v7048_v58 = vpack.c.bf16 %v6154_v57, %v6153_v56  ;;  %v6188_v56 = vld [vmem:[%s9850_s6 + $0xf30] sm:$0xff] }
 0x64b   : > { %7007 = vmatpush1.bf16.msra.mxu1 %v7006_v61  ;;  %v7051_v61 = vpack.c.bf16 %v6156_v60, %v6155_v59  ;;  %v6190_v59 = vld [vmem:[%s9850_s6 + $0xf40] sm:$0xff] }
 0x64c   : > { %6695 = vmatpush1.bf16.msra.mxu0 %v6694_v9  ;;  %7008 = vmatprep.subr.bf16.mxu1 %v7380_v30  ;;  %v6157_v9 = vld [vmem:[%s9850_s6 + $0xe40] sm:$0xff] }
 0x64d   : > { %6696 = vmatprep.subr.bf16.mxu0 %v7380_v30  ;;  %v7054_v63 = vpack.c.bf16 %v6158_v62, %v6157_v9  ;;  %v6192_v9 = vld [vmem:[%s9850_s6 + $0xf50] sm:$0xff] }
 0x64f   : > { %7010 = vmatpush1.bf16.msra.mxu1 %v7009_v27  ;;  %v7057_v27 = vpack.c.bf16 %v6160_v11, %v6159_v1  ;;  %v6194_v1 = vld [vmem:[%s9850_s6 + $0xf60] sm:$0xff] }
 0x650   : > { %6698 = vmatpush1.bf16.msra.mxu0 %v6697_v2  ;;  %7011 = vmatprep.subr.bf16.mxu1 %v7380_v30  ;;  %v6161_v2 = vld [vmem:[%s9850_s6 + $0xe60] sm:$0xff] }
 0x651   : > { %6699 = vmatprep.subr.bf16.mxu0 %v7380_v30  ;;  %v7060_v4 = vpack.c.bf16 %v6162_v3, %v6161_v2  ;;  %v6196_v2 = vld [vmem:[%s9850_s6 + $0xf70] sm:$0xff] }
 0x653   : > { %7013 = vmatpush1.bf16.msra.mxu1 %v7012_v21  ;;  %v7063_v21 = vpack.c.bf16 %v6164_v48, %v6163_v5  ;;  %v5355_v5 = vrot.slane %v8406_v16, 7  ;;  %v5442_v48 = vld [vmem:[%s9852_s8 + $0x30] sm:$0xff]  ;;  %v5444_v16 = vld [vmem:[%s9852_s8 + $0x40] sm:$0xff] }
 0x654   : > { %6701 = vmatpush1.bf16.msra.mxu0 %v6700_v29  ;;  %7014 = vmatprep.subr.bf16.mxu1 %v7380_v30  ;;  %v6167_v29 = vld [vmem:[%s9850_s6 + $0xe88] sm:$0xff] }
 0x655   : > { %6702 = vmatprep.subr.bf16.mxu0 %v7380_v30  ;;  %v7066_v7 = vpack.c.bf16 %v6168_v39, %v6167_v29 }
 0x657   : > { %7016 = vmatpush1.bf16.msra.mxu1 %v7015_v12  ;;  %v6169_v12 = vld [vmem:[%s9850_s6 + $0xe98] sm:$0xff] }
 0x658   : > { %6704 = vmatpush1.bf16.msra.mxu0 %v6703_v13  ;;  %7017 = vmatprep.subr.bf16.mxu1 %v7380_v30  ;;  %v6170_v13 = vld [vmem:[%s9850_s6 + $0xea0] sm:$0xff] }
 0x659   : > { %4449 = vmatprep.subr.mxu0 %v7368_v0  ;;  %v7069_v15 = vpack.c.bf16 %v6170_v13, %v6169_v12  ;;  %v5447_v12 = vld [vmem:[%s9852_s8 + $0x58] sm:$0xff] }
 0x65b   : > { %7019 = vmatpush1.bf16.msra.mxu1 %v7018_v17  ;;  %v6171_v17 = vld [vmem:[%s9850_s6 + $0xea8] sm:$0xff] }
 0x65c   : > { %4450 = vmatpush1.msra.mxu0 %v5909_v18  ;;  %5204 = vmatprep.subr.mxu1 %v7368_v0  ;;  %v6172_v18 = vld [vmem:[%s9850_s6 + $0xeb0] sm:$0xff] }
 0x65d   : > { %4454 = vmatmul.mubr.f32.vlgmr.msra.gmra.mrb[20].mxu0 %v4384_v22  ;;  %7110 = vmatprep.subr.bf16.mxu0 %v7380_v30  ;;  %v7072_v19 = vpack.c.bf16 %v6172_v18, %v6171_v17  ;;  %v7075_v22 = vpack.c.bf16 %v6174_v20, %v6173_v51  ;;  %v5450_v18 = vld [vmem:[%s9852_s8 + $0x70] sm:$0xff]  ;;  %v3704_v20 = vld [vmem:[%s9851_s7] sm:$0x1] }
 0x65e   : > { %6387 = vmatprep.mubr.msk.f32.mxu0 %vm7369_vm0, %v7368_v0 }
 0x65f   : > { %5205 = vmatpush1.msra.mxu1 %v6133_v23  ;;  %v6175_v23 = vld [vmem:[%s9850_s6 + $0xec8] sm:$0xff] }
 0x660   : > { %5209 = vmatmul.mubr.f32.vlgmr.msra.gmra.mrb[6].mxu1 %v5139_v25  ;;  %7020 = vmatprep.subr.bf16.mxu1 %v7380_v30 }
 0x661   : > { %7022 = vmatpush1.bf16.msra.mxu1 %v7021_v24  ;;  %6166 = vmatprep.mubr.msk.f32.mxu1 %vm3736_vm13, %v5248_v28  ;;  %v6176_v24 = vld [vmem:[%s9850_s6 + $0xed0] sm:$0xff]  ;;  %v7081_v28 = vpack.c.bf16 %v6178_v8, %v6177_v26 }
 0x662   : > { %7023 = vmatprep.subr.bf16.mxu1 %v7380_v30  ;;  %v7078_v25 = vpack.c.bf16 %v6176_v24, %v6175_v23 }
 0x665   : > { %7025 = vmatpush1.bf16.msra.mxu1 %v7024_v31  ;;  %v6179_v31 = vld [vmem:[%s9850_s6 + $0xee8] sm:$0xff] }
 0x666   : > { %7026 = vmatprep.subr.bf16.mxu1 %v7380_v30  ;;  %v7084_v38 = vpack.c.bf16 %v6180_v32, %v6179_v31 }
 0x669   : > { %7028 = vmatpush1.bf16.msra.mxu1 %v7027_v34  ;;  %v5437_v34 = vld [vmem:[%s9852_s8 + $0x8] sm:$0xff] }
 0x66a   : > { %7029 = vmatprep.subr.bf16.mxu1 %v7380_v30  ;;  %v7111_v36 = vpack.c.bf16 %v5437_v34, %v5436_v33 }
 0x66c   : > { %7112 = vmatpush3.bf16.msra.mxu0 %v7111_v36 }
 0x66d   : > { %7031 = vmatpush1.bf16.msra.mxu1 %v7030_v37  ;;  %v5439_v37 = vld [vmem:[%s9852_s8 + $0x18] sm:$0xff]  ;;  %7113 = vmatprep.subr.bf16.mxu0 %v7380_v30 }
 0x66e   : > { %7032 = vmatprep.subr.bf16.mxu1 %v7380_v30  ;;  %v7114_v42 = vpack.c.bf16 %v5439_v37, %v5438_v35 }
 0x670   : > { %7115 = vmatpush3.bf16.msra.mxu0 %v7114_v42 }
 0x671   : > { %7034 = vmatpush1.bf16.msra.mxu1 %v7033_v41  ;;  %v6182_v41 = vld [vmem:[%s9850_s6 + $0xf00] sm:$0xff]  ;;  %7116 = vmatprep.subr.bf16.mxu0 %v7380_v30 }
 0x672   : > { %7035 = vmatprep.subr.bf16.mxu1 %v7380_v30  ;;  %v7087_v44 = vpack.c.bf16 %v6182_v41, %v6181_v40 }
 0x675   : > { %7037 = vmatpush1.bf16.msra.mxu1 %v7036_v45  ;;  %v5441_v45 = vld [vmem:[%s9852_s8 + $0x28] sm:$0xff] }
 0x676   : > { %7038 = vmatprep.subr.bf16.mxu1 %v7380_v30  ;;  %v7117_v49 = vpack.c.bf16 %v5441_v45, %v5440_v43 }
 0x678   : > { %7118 = vmatpush3.bf16.msra.mxu0 %v7117_v49 }
 0x679   : > { %7040 = vmatpush1.bf16.msra.mxu1 %v7039_v47  ;;  %v6184_v47 = vld [vmem:[%s9850_s6 + $0xf10] sm:$0xff]  ;;  %7119 = vmatprep.subr.bf16.mxu0 %v7380_v30 }
 0x67a   : > { %7041 = vmatprep.subr.bf16.mxu1 %v7380_v30  ;;  %v7090_v50 = vpack.c.bf16 %v6184_v47, %v6183_v46 }
 0x67d   : > { %7043 = vmatpush1.bf16.msra.mxu1 %v7042_v52  ;;  %v6185_v52 = vld [vmem:[%s9850_s6 + $0xf18] sm:$0xff] }
 0x67e   : > { %7044 = vmatprep.subr.bf16.mxu1 %v7380_v30  ;;  %v7093_v54 = vpack.c.bf16 %v6186_v53, %v6185_v52 }
 0x681   : > { %7046 = vmatpush1.bf16.msra.mxu1 %v7045_v55  ;;  %v6187_v55 = vld [vmem:[%s9850_s6 + $0xf28] sm:$0xff] }
 0x682   : > { %7047 = vmatprep.subr.bf16.mxu1 %v7380_v30  ;;  %v7096_v57 = vpack.c.bf16 %v6188_v56, %v6187_v55 }
 0x685   : > { %7049 = vmatpush1.bf16.msra.mxu1 %v7048_v58  ;;  %v6189_v58 = vld [vmem:[%s9850_s6 + $0xf38] sm:$0xff] }
 0x686   : > { %7050 = vmatprep.subr.bf16.mxu1 %v7380_v30  ;;  %v7099_v60 = vpack.c.bf16 %v6190_v59, %v6189_v58 }
 0x689   : > { %7052 = vmatpush1.bf16.msra.mxu1 %v7051_v61  ;;  %v6191_v61 = vld [vmem:[%s9850_s6 + $0xf48] sm:$0xff] }
 0x68a   : > { %7053 = vmatprep.subr.bf16.mxu1 %v7380_v30  ;;  %v7102_v62 = vpack.c.bf16 %v6192_v9, %v6191_v61 }
 0x68d   : > { %7055 = vmatpush1.bf16.msra.mxu1 %v7054_v63  ;;  %v6193_v63 = vld [vmem:[%s9850_s6 + $0xf58] sm:$0xff] }
 0x68e   : > { %7056 = vmatprep.subr.bf16.mxu1 %v7380_v30  ;;  %v7105_v11 = vpack.c.bf16 %v6194_v1, %v6193_v63 }
 0x691   : > { %7058 = vmatpush1.bf16.msra.mxu1 %v7057_v27  ;;  %v6195_v27 = vld [vmem:[%s9850_s6 + $0xf68] sm:$0xff] }
 0x692   : > { %7059 = vmatprep.subr.bf16.mxu1 %v7380_v30  ;;  %v7108_v3 = vpack.c.bf16 %v6196_v2, %v6195_v27 }
 0x695   : > { %7061 = vmatpush1.bf16.msra.mxu1 %v7060_v4  ;;  %v6197_v4 = vld [vmem:[%s9850_s6 + $0xf78] sm:$0xff] }
 0x696   : > { %7062 = vmatprep.subr.bf16.mxu1 %v7380_v30 }
 0x699   : > { %7064 = vmatpush1.bf16.msra.mxu1 %v7063_v21  ;;  %v5443_v21 = vld [vmem:[%s9852_s8 + $0x38] sm:$0xff] }
 0x69a   : > { %5312 = vmatprep.subr.mxu1 %v7368_v0  ;;  %v7120_v29 = vpack.c.bf16 %v5443_v21, %v5442_v48 }
 0x69c   : > { %7121 = vmatpush3.bf16.msra.mxu0 %v7120_v29 }
 0x69d   : > { %5313 = vmatpush1.msra.mxu1 %v6165_v6  ;;  %7122 = vmatprep.subr.bf16.mxu0 %v7380_v30  ;;  %v5445_v6 = vld [vmem:[%s9852_s8 + $0x48] sm:$0xff] }
 0x69e   : > { %5317 = vmatmul.mubr.f32.vlgmr.msra.gmra.mrb[6].mxu1 %v5247_v10  ;;  %7065 = vmatprep.subr.bf16.mxu1 %v7380_v30  ;;  %v5446_v10 = vld [vmem:[%s9852_s8 + $0x50] sm:$0xff] }
 0x69f   : > { %7067 = vmatpush1.bf16.msra.mxu1 %v7066_v7  ;;  %6198 = vmatprep.mubr.msk.f32.mxu1 %vm3736_vm13, %v5356_v14  ;;  %v7123_v7 = vpack.c.bf16 %v5445_v6, %v5444_v16  ;;  %v7126_v13 = vpack.c.bf16 %v5447_v12, %v5446_v10  ;;  %v5448_v14 = vld [vmem:[%s9852_s8 + $0x60] sm:$0xff] }
 0x6a0   : > { %7068 = vmatprep.subr.bf16.mxu1 %v7380_v30 }
 0x6a1   : > { %7124 = vmatpush3.bf16.msra.mxu0 %v7123_v7 }
 0x6a2   : > { %7125 = vmatprep.subr.bf16.mxu0 %v7380_v30 }
 0x6a3   : > { %7070 = vmatpush1.bf16.msra.mxu1 %v7069_v15  ;;  %v5449_v15 = vld [vmem:[%s9852_s8 + $0x68] sm:$0xff] }
 0x6a4   : > { %7071 = vmatprep.subr.bf16.mxu1 %v7380_v30  ;;  %v7129_v17 = vpack.c.bf16 %v5449_v15, %v5448_v14 }
 0x6a5   : > { %7127 = vmatpush3.bf16.msra.mxu0 %v7126_v13 }
 0x6a6   : > { %7128 = vmatprep.subr.bf16.mxu0 %v7380_v30 }
 0x6a7   : > { %7073 = vmatpush1.bf16.msra.mxu1 %v7072_v19  ;;  %v5451_v19 = vld [vmem:[%s9852_s8 + $0x78] sm:$0xff] }
 0x6a8   : > { %7074 = vmatprep.subr.bf16.mxu1 %v7380_v30  ;;  %v7132_v51 = vpack.c.bf16 %v5451_v19, %v5450_v18 }
 0x6a9   : > { %7130 = vmatpush3.bf16.msra.mxu0 %v7129_v17 }
 0x6aa   : > { %7131 = vmatprep.subr.bf16.mxu0 %v7380_v30 }
 0x6ab   : > { %7076 = vmatpush1.bf16.msra.mxu1 %v7075_v22 }
 0x6ac   : > { %7077 = vmatprep.subr.bf16.mxu1 %v7380_v30 }
 0x6ad   : > { %7133 = vmatpush3.bf16.msra.mxu0 %v7132_v51 }
 0x6af   : > { %7079 = vmatpush1.bf16.msra.mxu1 %v7078_v25 }
 0x6b0   : > { %7080 = vmatprep.subr.bf16.mxu1 %v7380_v30 }
 0x6b3   : > { %7082 = vmatpush1.bf16.msra.mxu1 %v7081_v28 }
 0x6b4   : > { %7083 = vmatprep.subr.bf16.mxu1 %v7380_v30 }
 0x6b7   : > { %7085 = vmatpush1.bf16.msra.mxu1 %v7084_v38 }
 0x6b8   : > { %7086 = vmatprep.subr.bf16.mxu1 %v7380_v30 }
 0x6bb   : > { %7088 = vmatpush1.bf16.msra.mxu1 %v7087_v44 }
 0x6bc   : > { %7089 = vmatprep.subr.bf16.mxu1 %v7380_v30 }
 0x6bf   : > { %7091 = vmatpush1.bf16.msra.mxu1 %v7090_v50 }
 0x6c0   : > { %7092 = vmatprep.subr.bf16.mxu1 %v7380_v30 }
 0x6c3   : > { %7094 = vmatpush1.bf16.msra.mxu1 %v7093_v54 }
 0x6c4   : > { %7095 = vmatprep.subr.bf16.mxu1 %v7380_v30 }
 0x6c7   : > { %7097 = vmatpush1.bf16.msra.mxu1 %v7096_v57 }
 0x6c8   : > { %7098 = vmatprep.subr.bf16.mxu1 %v7380_v30 }
 0x6cb   : > { %7100 = vmatpush1.bf16.msra.mxu1 %v7099_v60 }
 0x6cc   : > { %7101 = vmatprep.subr.bf16.mxu1 %v7380_v30 }
 0x6cf   : > { %7103 = vmatpush1.bf16.msra.mxu1 %v7102_v62 }
 0x6d0   : > { %7104 = vmatprep.subr.bf16.mxu1 %v7380_v30 }
 0x6d3   : > { %7106 = vmatpush1.bf16.msra.mxu1 %v7105_v11 }
 0x6d4   : > { %7107 = vmatprep.subr.bf16.mxu1 %v7380_v30  ;;  %v5452_v30 = vld [vmem:[%s9853_s9] sm:$0x1] }
 0x6d7   : > { %7109 = vmatpush1.bf16.msra.mxu1 %v7108_v3 }
 0x6d8   : > { %5420 = vmatprep.subr.mxu1 %v7368_v0 }
 0x6db   : > { %5421 = vmatpush1.msra.mxu1 %v6197_v4 }
 0x6dc   : > { %5425 = vmatmul.mubr.f32.vlgmr.msra.gmra.mrb[6].mxu1 %v5355_v5 }
 0x730   : > { %v4455_v39 = vpop.f32.mrb[20].mxu0 }
 0x731   : > { %v4457_v0 = vpop.f32.mrb[21].mxu0  ;;  %v7134_v22 = vadd.f32 %v4455_v39, %v3704_v20 }
 0x7af   : > { %v5426_v23 = vpop.f32.mrb[6].mxu1 }
 0x7b0   : > { %v7135_v24 = vadd.f32 %v7134_v22, %v5426_v23  ;;  %v5428_v25 = vpop.f32.mrb[7].mxu1 }
 0x7b2   : > { %v5432_v26 = vmul.f32 1.442695, %v7135_v24  ;;  %vm5431_vm0 = vcmp.gt.f32.partialorder %v7135_v24, 0.0 }
 0x7b4   : > { %7302 = vpow2.f32 %v5432_v26 }
 0x7be   : > { %v7303_v8 = vpop.eup %7302 }
 0x7bf   : > { %v6199_v28 = vadd.f32 -1.0, %v7303_v8 }
 0x7c1   : > { %v5435_v31 = vsel %vm5431_vm0, %v7135_v24, %v6199_v28 }
 0x7c2   : > { %6388 = vmatmul.mubr.f32.vlgmr.msra.gmra.mrb[22].mxu0 %v5435_v31 }
 0x895   : > { %v5519_v32 = vpop.f32.mrb[22].mxu0 }
 0x896   : > { %v5520_v33 = vadd.f32 %v5519_v32, %v5452_v30  ;;  %v6389_v34 = vpop.f32.mrb[23].mxu0 }
 0x898   : > { %5524 = vst.msk [vmem:[%s351_s25] sm:$0x1] %vm5523_vm1, %v5520_v33 }
 0x899   : > { %7317 = shalt.err (!%p7314_p3)
}
 0x89a   : > { %s7318_s12 = scalar_lea.hbm %s9802_s29, 16  ;;  %s7322_s26 = scalar_lea.hbm %s9854_s10, 32 }
 0x89b   : > { %p7319_p4 = scmp.ne.s32.totalorder %s9802_s29, %s7318_s12  ;;  %p7323_p9 = scmp.lt.u32.totalorder %s9802_s29, %s9854_s10 }
 0x89c   : > { %p7324_p10 = scmp.lt.u32.totalorder %s7322_s26, %s7318_s12  ;;  %p7326_p12 = scmp.lt.u32.totalorder %s7318_s12, %s9802_s29 }
 0x89d   : > { %p7320_p7 = pnand %p7319_p4, %p7475_p5 }
 0x89e   : > { %p7325_p11 = por %p7324_p10, %p7323_p9 }
 0x89f   : > { %p7321_p8 = pneg %p7320_p7 }
 0x8a0   : > { %p7327_p13 = por %p7326_p12, %p7325_p11 }
 0x8a2   : > { %p7328_p0 = pnand %p7327_p13, %p7321_p8 }
 0x8a4   : > { %7331 = shalt.err (!%p7328_p0)
}
 0x8a5   : > { %7229 = dma.vmem_to_hbm [thread:$0]  (%p7475_p5), %s9804_s28, 16, %s9802_s29, %s5526_s18  }
 0x8a6 PF: > { %p7235_p1 = scmp.ge.s32.totalorder %s7366_s16, 2  ;;  %s5550_s21 = sand.u32 1, %s7354_s13  }
 0x8a7   : > { %s5551_s11 = scalar_lea.sflag [#allocation4], %s5550_s21 }
 0x8a8   : > { %p7232_p2 = pnand %p7235_p1, %p7479_p6 }
 0x8aa   : > { %7349 = dma.done.wait (!%p7232_p2), %s5551_s11, 16  }
 0x8ab   : > { %7351 = vsyncadd (!%p7232_p2), %s5551_s11, 4294967280  ;;  %p20_p3 = scmp.ge.s32.totalorder %s7462_s19, 4   ;;  %s9872_s13 = smov %s7358_s14 }
 0x8ac   : > { %s9873_s14 = smov %s7362_s15  ;;  %s9874_s15 = smov %s7473_s22 }
 0x8ad   : > { %s9875_s16 = smov %s7462_s19  ;;  %22 = sbr.rel (!%p20_p3) target bundleno = 3 (0x3), region = 130 }
 0x8b4   :  { %5555 = vsyncpa [#allocation4], 1 }
 0x8b5   :  { %5557 = vsyncpa [#allocation4 + $0x1], 1 }

</bundles_post_ra>
